<compile_context>
chip_gen: v5e
topology: v5e:2x2
jax: 0.10.0
libtpu: 0.0.40
codegen_flags: <defaults>
</compile_context>

<pallas_src>
from functools import partial

import jax
import jax.numpy as jnp
import numpy as np
from jax import lax
from jax.experimental import pallas as pl
from jax.experimental.pallas import tpu as pltpu


def _round_up(x, m):
    return (x + m - 1) // m * m


def _vmem_capacity_bytes():
    try:
        return int(pltpu.get_tpu_info().vmem_capacity_bytes)
    except Exception:  # conservative fallback (v5e/v6e have 128 MiB)
        return 128 * 1024 * 1024


def _mosaic_params(sem, needed_bytes, cap):
    """CompilerParams with a vmem limit derived from the block footprint."""
    limit = int(min(cap, max(needed_bytes + needed_bytes // 2 + (4 << 20),
                             32 << 20)))
    return pltpu.CompilerParams(dimension_semantics=sem,
                                vmem_limit_bytes=limit)


def _pick_batch(total, target, per_item_bytes, fixed_bytes, budget):
    """Largest batch <= target fitting the VMEM budget; prefer divisors of
    `total` (avoids masked-tail waste) when that does not halve the batch."""
    b = max(1, min(total, max(1, target)))
    while b > 1 and fixed_bytes + b * per_item_bytes > budget:
        b -= 1
    for d in range(b, 0, -1):
        if total % d == 0:
            if d * 2 >= b:
                return d
            break
    return b


# ----------------------------- Pallas kernels -------------------------------

def _conv1_kernel(*refs, kt):
    """(kt,1,1) temporal conv + BN + ReLU.  Taps accumulate in registers."""
    x_refs = refs[:kt]
    w_ref, b_ref, o_ref = refs[kt], refs[kt + 1], refs[kt + 2]
    bias = b_ref[...]                                   # hoisted (1, Cout)
    for b in range(o_ref.shape[0]):                     # small n-batch per step
        acc = None
        for k in range(kt):
            c = jnp.dot(x_refs[k][b, 0], w_ref[k],
                        preferred_element_type=jnp.float32)
            acc = c if acc is None else acc + c
        o_ref[b, 0] = jnp.maximum(acc + bias, 0.0).astype(o_ref.dtype)


def _conv2_kernel(x_ref, w_ref, b_ref, o_ref, *, taps, l_out):
    """(1,3,3) conv + BN + ReLU: 9 taps are shifted slices of one
    phase-decomposed VMEM slab; single bias/ReLU pass + lane-dense store."""
    bias = b_ref[...]                                   # hoisted (1, Cout)
    for b in range(o_ref.shape[0]):                     # (n,t) slabs per step
        acc = None
        for ti, (p, off) in enumerate(taps):
            a = x_ref[b, p, pl.ds(off, l_out), :]
            c = jnp.dot(a, w_ref[ti], preferred_element_type=jnp.float32)
            acc = c if acc is None else acc + c
        o_ref[b, :l_out, :] = jnp.maximum(acc + bias, 0.0).astype(o_ref.dtype)


def _conv3_res_kernel(a_ref, w_ref, b_ref, r_ref, o_ref):
    """1x1x1 conv + BN + identity-residual add + ReLU (fused)."""
    acc = jnp.dot(a_ref[...], w_ref[...], preferred_element_type=jnp.float32)
    out = acc + b_ref[...] + r_ref[...].astype(jnp.float32)
    o_ref[...] = jnp.maximum(out, 0.0).astype(o_ref.dtype)


def _conv3_sc_kernel(a_ref, w_ref, b_ref, r_ref, wr_ref, o_ref):
    """1x1x1 conv + BN + fused projection-shortcut matmul + add + ReLU."""
    acc = jnp.dot(a_ref[...], w_ref[...], preferred_element_type=jnp.float32)
    acc += jnp.dot(r_ref[...], wr_ref[...], preferred_element_type=jnp.float32)
    o_ref[...] = jnp.maximum(acc + b_ref[...], 0.0).astype(o_ref.dtype)


# ----------------------------- pallas_call wrappers --------------------------

def _conv1_pallas(xp, w_taps, bias, *, t_out, t_stride, cap):
    n, _, hw, cin = xp.shape
    kt, _, cout = w_taps.shape
    fixed = 2 * kt * cin * cout * 2 + 2 * cout * 4            # resident weights
    per_n = (2 * kt * hw * cin + 2 * hw * cout) * 2 + hw * cout * 4
    nb = _pick_batch(n, -(-256 // max(1, hw)), per_n, fixed, int(cap * 0.4))
    needed = fixed + nb * per_n

    x_specs = [
        pl.BlockSpec((nb, 1, hw, cin),
                     (lambda b, t, k=k: (b, t * t_stride + k, 0, 0)))
        for k in range(kt)
    ]
    return pl.pallas_call(
        partial(_conv1_kernel, kt=kt),
        out_shape=jax.ShapeDtypeStruct((n, t_out, hw, cout), jnp.bfloat16),
        grid=(pl.cdiv(n, nb), t_out),
        in_specs=x_specs + [
            pl.BlockSpec((kt, cin, cout), lambda b, t: (0, 0, 0)),   # resident
            pl.BlockSpec((1, cout), lambda b, t: (0, 0)),            # resident
        ],
        out_specs=pl.BlockSpec((nb, 1, hw, cout), lambda b, t: (b, t, 0, 0)),
        compiler_params=_mosaic_params(("parallel", "parallel"), needed, cap),
    )(*([xp] * kt + [w_taps, bias]))


def _conv2_pallas(slabs, w_taps, bias, *, taps, l_out, l_store, cap):
    nt, n_ph, l_ph, cin = slabs.shape
    ntap, _, cout = w_taps.shape
    fixed = 2 * ntap * cin * cout * 2 + 2 * cout * 4
    per_s = (2 * n_ph * l_ph * cin + 2 * l_store * cout) * 2 + l_out * cout * 4
    ntb = _pick_batch(nt, -(-512 // max(1, l_out)), per_s, fixed,
                      int(cap * 0.4))
    needed = fixed + ntb * per_s
    return pl.pallas_call(
        partial(_conv2_kernel, taps=tuple(taps), l_out=l_out),
        out_shape=jax.ShapeDtypeStruct((nt, l_store, cout), jnp.bfloat16),
        grid=(pl.cdiv(nt, ntb),),
        in_specs=[
            pl.BlockSpec((ntb, n_ph, l_ph, cin), lambda i: (i, 0, 0, 0)),
            pl.BlockSpec((ntap, cin, cout), lambda i: (0, 0, 0)),     # resident
            pl.BlockSpec((1, cout), lambda i: (0, 0)),                # resident
        ],
        out_specs=pl.BlockSpec((ntb, l_store, cout), lambda i: (i, 0, 0)),
        compiler_params=_mosaic_params(("parallel",), needed, cap),
    )(slabs, w_taps, bias)


def _conv3_pallas(a, w, bias, resid, w_res=None, *, cap):
    m, k1 = a.shape
    n_out = w.shape[1]
    k2 = resid.shape[1]

    budget = int(cap * 0.4)
    tm = 1024 if cap >= (100 << 20) else 512       # v5e/v6e: 1024, v7x: 512

    def footprint(t):
        blocks = 2 * t * (k1 + k2 + n_out) * 2     # dbl-buffered bf16 A/res/out
        wts = 2 * (k1 + k2) * n_out * 2 + 2 * n_out * 4
        return blocks + wts

    while tm > 128 and footprint(tm) > budget:
        tm //= 2
    if m <= tm:
        tm = m
    needed = footprint(tm)
    grid = (pl.cdiv(m, tm),)                       # masked tail: garbage rows
                                                   # feed only masked-out rows.
    if w_res is None:
        kernel = _conv3_res_kernel
        operands = (a, w, bias, resid)
        in_specs = [
            pl.BlockSpec((tm, k1), lambda i: (i, 0)),
            pl.BlockSpec((k1, n_out), lambda i: (0, 0)),
            pl.BlockSpec((1, n_out), lambda i: (0, 0)),
            pl.BlockSpec((tm, k2), lambda i: (i, 0)),
        ]
    else:
        kernel = _conv3_sc_kernel
        operands = (a, w, bias, resid, w_res)
        in_specs = [
            pl.BlockSpec((tm, k1), lambda i: (i, 0)),
            pl.BlockSpec((k1, n_out), lambda i: (0, 0)),
            pl.BlockSpec((1, n_out), lambda i: (0, 0)),
            pl.BlockSpec((tm, k2), lambda i: (i, 0)),
            pl.BlockSpec((k2, n_out), lambda i: (0, 0)),
        ]
    return pl.pallas_call(
        kernel,
        out_shape=jax.ShapeDtypeStruct((m, n_out), jnp.bfloat16),
        grid=grid,
        in_specs=in_specs,
        out_specs=pl.BlockSpec((tm, n_out), lambda i: (i, 0)),
        compiler_params=_mosaic_params(("parallel",), needed, cap),
    )(*operands)


# ------------------------------- helpers -------------------------------------

def _bn_scale_bias(bn, eps=1e-5):
    gamma, beta, mean, var = bn
    scale = gamma / jnp.sqrt(var + eps)
    bias = beta - mean * scale
    return scale, bias


def _phase_slabs(o1, s):
    """[N,T,H,W,C] -> ([N*T, s*s, Hq*Wq, C], Hq, Wq): pad H/W by 1 (conv pad),
    align to the stride and split into stride phases so every 3x3 tap becomes a
    contiguous shifted slice within one phase."""
    n, t, h, w, c = o1.shape
    hq = -(-(h + 2) // s)
    wq = -(-(w + 2) // s)
    xp = jnp.pad(o1, ((0, 0), (0, 0),
                      (1, hq * s - h - 1), (1, wq * s - w - 1), (0, 0)))
    xp = xp.reshape(n * t, hq, s, wq, s, c)
    xp = jnp.transpose(xp, (0, 2, 4, 1, 3, 5))
    return xp.reshape(n * t, s * s, hq * wq, c), hq, wq


# --------------------------- Bottleneck forward ------------------------------

def bottleneck_forward(x_ncdhw, params, *, stride, temp_stride, use_temp_conv,
                       dim_in, dim_out):
    """Pallas implementation of Bottleneck.forward. x_ncdhw: [N,C,T,H,W]."""
    # TODO(synk): entry/exit NCDHW<->channels-last transposes stay as XLA ops to
    #             preserve the PyTorch NCDHW interface of a single block.
    x = jnp.transpose(x_ncdhw, (0, 2, 3, 4, 1)).astype(jnp.bfloat16)  # NTHWC
    n, t, h, w, _ = x.shape
    kt = 1 + 2 * use_temp_conv
    pt = use_temp_conv
    ts = temp_stride
    s = stride
    dim_inner = params["w1"].shape[0]
    c_in = _round_up(dim_in, 128)        # lane-dense entry / residual channels
    c_mid = _round_up(dim_inner, 128)    # lane-dense internal channel widths
    c_out = _round_up(dim_out, 128)
    cap = _vmem_capacity_bytes()

    # ---- conv1: (kt,1,1) stride (ts,1,1) pad (pt,0,0) + BN + ReLU ----
    t1 = (t + 2 * pt - kt) // ts + 1
    xp = jnp.pad(x, ((0, 0), (pt, pt), (0, 0), (0, 0), (0, c_in - dim_in)))
    xp = xp.reshape(n, t + 2 * pt, h * w, c_in)

    s1, b1 = _bn_scale_bias(params["bn1"])
    w1 = params["w1"][:, :, :, 0, 0] * s1[:, None, None]      # [Ci, Cin, kt]
    w1 = jnp.transpose(w1, (2, 1, 0))                         # [kt, Cin, Ci]
    w1 = jnp.pad(w1, ((0, 0), (0, c_in - dim_in),
                      (0, c_mid - dim_inner))).astype(jnp.bfloat16)
    b1 = jnp.pad(b1, (0, c_mid - dim_inner)).reshape(1, c_mid).astype(jnp.float32)

    o1 = _conv1_pallas(xp, w1, b1, t_out=t1, t_stride=ts, cap=cap)
    o1 = o1.reshape(n, t1, h, w, c_mid)

    # ---- conv2: (1,3,3) stride (1,s,s) pad (0,1,1) + BN + ReLU ----
    h2 = (h + 2 - 3) // s + 1
    w2 = (w + 2 - 3) // s + 1
    slabs, hq, wq = _phase_slabs(o1, s)                       # [NT1,s*s,hq*wq,c]
    taps = [((kh % s) * s + (kw % s), (kh // s) * wq + (kw // s))
            for kh in range(3) for kw in range(3)]
    l_out = (h2 - 1) * wq + w2
    l_store = h2 * wq                                         # halo kept, stripped in XLA

    s2, b2 = _bn_scale_bias(params["bn2"])
    wk2 = params["w2"][:, :, 0] * s2[:, None, None, None]     # [Ci, Ci, 3, 3]
    wk2 = jnp.transpose(wk2, (2, 3, 1, 0)).reshape(9, dim_inner, dim_inner)
    wk2 = jnp.pad(wk2, ((0, 0), (0, c_mid - dim_inner),
                        (0, c_mid - dim_inner))).astype(jnp.bfloat16)
    b2 = jnp.pad(b2, (0, c_mid - dim_inner)).reshape(1, c_mid).astype(jnp.float32)

    o2 = _conv2_pallas(slabs, wk2, b2, taps=taps, l_out=l_out,
                       l_store=l_store, cap=cap)              # [NT1, h2*wq, c_mid]
    # cheap XLA strided slice to drop the wq->w2 halo columns
    o2 = o2.reshape(n * t1, h2, wq, c_mid)[:, :, :w2, :]

    # ---- conv3: (1,1,1) + BN, fused with residual add + ReLU ----
    m = n * t1 * h2 * w2
    a = o2.reshape(m, c_mid)

    s3, b3 = _bn_scale_bias(params["bn3"])
    w3 = params["w3"][:, :, 0, 0, 0] * s3[:, None]            # [Cout, Ci]
    w3 = jnp.transpose(w3, (1, 0))                            # [Ci, Cout]
    w3 = jnp.pad(w3, ((0, c_mid - dim_inner),
                      (0, c_out - dim_out))).astype(jnp.bfloat16)
    b3 = jnp.pad(b3, (0, c_out - dim_out)).reshape(1, c_out).astype(jnp.float32)

    identity = (dim_in == dim_out and ts == 1 and s == 1)
    if identity:
        resid = x.reshape(m, dim_in)
        if c_out != dim_out:
            resid = jnp.pad(resid, ((0, 0), (0, c_out - dim_out)))
        o3 = _conv3_pallas(a, w3, b3, resid, cap=cap)
    else:
        # TODO(synk): the strided shortcut gather is still a (cheap) XLA slice,
        #             not expressed via the conv3 BlockSpec index_map.
        xs = x[:, ::ts, ::s, ::s, :][:, :t1, :h2, :w2, :]
        resid = xs.reshape(m, dim_in)
        if c_in != dim_in:
            resid = jnp.pad(resid, ((0, 0), (0, c_in - dim_in)))
        ssc, bsc = _bn_scale_bias(params["bnsc"])
        wsc = params["wsc"][:, :, 0, 0, 0] * ssc[:, None]     # [Cout, Cin]
        wsc = jnp.transpose(wsc, (1, 0))                      # [Cin, Cout]
        wsc = jnp.pad(wsc, ((0, c_in - dim_in),
                            (0, c_out - dim_out))).astype(jnp.bfloat16)
        bsc = jnp.pad(bsc, (0, c_out - dim_out)).reshape(1, c_out).astype(jnp.float32)
        o3 = _conv3_pallas(a, w3, b3 + bsc, resid, wsc, cap=cap)

    o3 = o3.reshape(n, t1, h2, w2, c_out)[..., :dim_out]
    # Output kept bf16 (perf: halves exit HBM writeback); upcast outside if the
    # surrounding network needs f32.
    return jnp.transpose(o3, (0, 4, 1, 2, 3))                 # NCDHW, bf16


# ------------------------- Pure-JAX reference --------------------------------

def bottleneck_ref(x_ncdhw, params, *, stride, temp_stride, use_temp_conv,
                   dim_in, dim_out):
    # Use the same bf16-rounded input the kernel path sees (math stays f32).
    x = jnp.transpose(x_ncdhw, (0, 2, 3, 4, 1)).astype(jnp.bfloat16)
    x = x.astype(jnp.float32)

    def conv_bn(y, wgt, bn, strides, pads, relu):
        scale, bias = _bn_scale_bias(bn)
        wf = wgt * scale[:, None, None, None, None]
        wk = jnp.transpose(wf, (2, 3, 4, 1, 0))               # OIDHW -> DHWIO
        out = lax.conv_general_dilated(
            y, wk, window_strides=strides, padding=[(p, p) for p in pads],
            dimension_numbers=("NDHWC", "DHWIO", "NDHWC"))
        out = out + bias
        return jnp.maximum(out, 0.0) if relu else out

    o = conv_bn(x, params["w1"], params["bn1"], (temp_stride, 1, 1),
                (use_temp_conv, 0, 0), True)
    o = conv_bn(o, params["w2"], params["bn2"], (1, stride, stride),
                (0, 1, 1), True)
    o = conv_bn(o, params["w3"], params["bn3"], (1, 1, 1), (0, 0, 0), False)
    if dim_in == dim_out and temp_stride == 1 and stride == 1:
        res = x
    else:
        res = conv_bn(x, params["wsc"], params["bnsc"],
                      (temp_stride, stride, stride), (0, 0, 0), False)
    out = jnp.maximum(o + res, 0.0)
    return jnp.transpose(out, (0, 4, 1, 2, 3))


# ----------------------------------- main ------------------------------------

def _make_params(key, dim_in, dim_inner, dim_out, kt, with_shortcut):
    keys = jax.random.split(key, 8)

    def bn(k, c):
        k1, k2, k3, k4 = jax.random.split(k, 4)
        gamma = 1.0 + 0.1 * jax.random.normal(k1, (c,), jnp.float32)
        beta = 0.1 * jax.random.normal(k2, (c,), jnp.float32)
        mean = 0.1 * jax.random.normal(k3, (c,), jnp.float32)
        var = jax.random.uniform(k4, (c,), jnp.float32, 0.5, 1.5)
        return (gamma, beta, mean, var)

    params = {
        "w1": 0.1 * jax.random.normal(keys[0], (dim_inner, dim_in, kt, 1, 1),
                                      jnp.float32),
        "bn1": bn(keys[1], dim_inner),
        "w2": 0.1 * jax.random.normal(keys[2], (dim_inner, dim_inner, 1, 3, 3),
                                      jnp.float32),
        "bn2": bn(keys[3], dim_inner),
        "w3": 0.1 * jax.random.normal(keys[4], (dim_out, dim_inner, 1, 1, 1),
                                      jnp.float32),
        "bn3": bn(keys[5], dim_out),
    }
    if with_shortcut:
        params["wsc"] = 0.1 * jax.random.normal(
            keys[6], (dim_out, dim_in, 1, 1, 1), jnp.float32)
        params["bnsc"] = bn(keys[7], dim_out)
    return params


if __name__ == "__main__":
    configs = [
        # projection shortcut: spatial stride 2, temporal stride 2, temp conv on
        dict(n=2, dim_in=8, dim_inner=8, dim_out=16, t=4, h=8, w=8,
             stride=2, temp_stride=2, use_temp_conv=1),
        # identity shortcut: all strides 1, no temporal conv
        dict(n=2, dim_in=16, dim_inner=8, dim_out=16, t=4, h=8, w=8,
             stride=1, temp_stride=1, use_temp_conv=0),
    ]

    key = jax.random.PRNGKey(0)
    for idx, cfg in enumerate(configs):
        kparam, kx = jax.random.split(jax.random.fold_in(key, idx))
        kt = 1 + 2 * cfg["use_temp_conv"]
        identity = (cfg["dim_in"] == cfg["dim_out"]
                    and cfg["temp_stride"] == 1 and cfg["stride"] == 1)
        params = _make_params(kparam, cfg["dim_in"], cfg["dim_inner"],
                              cfg["dim_out"], kt, with_shortcut=not identity)
        x = jax.random.normal(
            kx, (cfg["n"], cfg["dim_in"], cfg["t"], cfg["h"], cfg["w"]),
            jnp.float32)

        run = jax.jit(partial(bottleneck_forward, stride=cfg["stride"],
                              temp_stride=cfg["temp_stride"],
                              use_temp_conv=cfg["use_temp_conv"],
                              dim_in=cfg["dim_in"], dim_out=cfg["dim_out"]))
        out = jax.block_until_ready(run(x, params))

        ref = jax.block_until_ready(
            bottleneck_ref(x, params, stride=cfg["stride"],
                           temp_stride=cfg["temp_stride"],
                           use_temp_conv=cfg["use_temp_conv"],
                           dim_in=cfg["dim_in"], dim_out=cfg["dim_out"]))

        t1 = (cfg["t"] - 1) // cfg["temp_stride"] + 1
        h2 = (cfg["h"] - 1) // cfg["stride"] + 1
        w2 = (cfg["w"] - 1) // cfg["stride"] + 1
        assert out.shape == (cfg["n"], cfg["dim_out"], t1, h2, w2), out.shape
        np.testing.assert_allclose(np.asarray(out.astype(jnp.float32)),
                                   np.asarray(ref), rtol=3e-2, atol=3e-2)

    print("KERNEL_OK")
</pallas_src>

<mosaic_0001>
module attributes {stable_mosaic.version = 11 : i64} {
  func.func @_conv1_kernel(%arg0: i32, %arg1: i32, %arg2: memref<2x1x64x128xbf16, #tpu.memory_space<vmem>>, %arg3: memref<2x1x64x128xbf16, #tpu.memory_space<vmem>>, %arg4: memref<2x1x64x128xbf16, #tpu.memory_space<vmem>>, %arg5: memref<3x128x128xbf16, #tpu.memory_space<vmem>>, %arg6: memref<1x128xf32, #tpu.memory_space<vmem>>, %arg7: memref<2x1x64x128xbf16, #tpu.memory_space<vmem>>) attributes {dimension_semantics = [#tpu.dimension_semantics<parallel>, #tpu.dimension_semantics<parallel>], iteration_bounds = array<i64: 1, 2>, scalar_prefetch = 0 : i64, scratch_operands = 0 : i64, tpu.core_type = #tpu.core_type<tc>, window_params = [{transform_indices = @transform_0, window_bounds = array<i64: 2, 1, 64, 128>}, {transform_indices = @transform_1, window_bounds = array<i64: 2, 1, 64, 128>}, {transform_indices = @transform_2, window_bounds = array<i64: 2, 1, 64, 128>}, {pipeline_mode = #tpu.pipeline_mode<synchronous>, transform_indices = @transform_3, window_bounds = array<i64: 3, 128, 128>}, {pipeline_mode = #tpu.pipeline_mode<synchronous>, transform_indices = @transform_4, window_bounds = array<i64: 1, 128>}, {transform_indices = @transform_5, window_bounds = array<i64: 2, 1, 64, 128>}]} {
    %c0 = arith.constant 0 : index
    %c0_0 = arith.constant 0 : index
    %0 = vector.load %arg6[%c0, %c0_0] : memref<1x128xf32, #tpu.memory_space<vmem>>, vector<1x128xf32>
    %c0_1 = arith.constant 0 : index
    %c0_2 = arith.constant 0 : index
    %c0_3 = arith.constant 0 : index
    %c0_4 = arith.constant 0 : index
    %1 = vector.load %arg2[%c0_1, %c0_2, %c0_3, %c0_4] : memref<2x1x64x128xbf16, #tpu.memory_space<vmem>>, vector<1x1x64x128xbf16>
    %2 = vector.shape_cast %1 : vector<1x1x64x128xbf16> to vector<64x128xbf16>
    %c0_5 = arith.constant 0 : index
    %c0_6 = arith.constant 0 : index
    %c0_7 = arith.constant 0 : index
    %3 = vector.load %arg5[%c0_5, %c0_6, %c0_7] : memref<3x128x128xbf16, #tpu.memory_space<vmem>>, vector<1x128x128xbf16>
    %4 = vector.shape_cast %3 : vector<1x128x128xbf16> to vector<128x128xbf16>
    %cst = arith.constant dense<0.000000e+00> : vector<64x128xf32>
    %5 = tpu.matmul %2, %4, %cst {dimension_numbers = #tpu.dot_dimension_numbers<[1], [0], [0], [1], [0, 0, 1, 1], [], []>} : vector<64x128xbf16>, vector<128x128xbf16>, vector<64x128xf32> -> vector<64x128xf32>
    %c0_8 = arith.constant 0 : index
    %c0_9 = arith.constant 0 : index
    %c0_10 = arith.constant 0 : index
    %c0_11 = arith.constant 0 : index
    %6 = vector.load %arg3[%c0_8, %c0_9, %c0_10, %c0_11] : memref<2x1x64x128xbf16, #tpu.memory_space<vmem>>, vector<1x1x64x128xbf16>
    %7 = vector.shape_cast %6 : vector<1x1x64x128xbf16> to vector<64x128xbf16>
    %c1 = arith.constant 1 : index
    %c0_12 = arith.constant 0 : index
    %c0_13 = arith.constant 0 : index
    %8 = vector.load %arg5[%c1, %c0_12, %c0_13] : memref<3x128x128xbf16, #tpu.memory_space<vmem>>, vector<1x128x128xbf16>
    %9 = vector.shape_cast %8 : vector<1x128x128xbf16> to vector<128x128xbf16>
    %cst_14 = arith.constant dense<0.000000e+00> : vector<64x128xf32>
    %10 = tpu.matmul %7, %9, %cst_14 {dimension_numbers = #tpu.dot_dimension_numbers<[1], [0], [0], [1], [0, 0, 1, 1], [], []>} : vector<64x128xbf16>, vector<128x128xbf16>, vector<64x128xf32> -> vector<64x128xf32>
    %11 = arith.addf %5, %10 : vector<64x128xf32>
    %c0_15 = arith.constant 0 : index
    %c0_16 = arith.constant 0 : index
    %c0_17 = arith.constant 0 : index
    %c0_18 = arith.constant 0 : index
    %12 = vector.load %arg4[%c0_15, %c0_16, %c0_17, %c0_18] : memref<2x1x64x128xbf16, #tpu.memory_space<vmem>>, vector<1x1x64x128xbf16>
    %13 = vector.shape_cast %12 : vector<1x1x64x128xbf16> to vector<64x128xbf16>
    %c2 = arith.constant 2 : index
    %c0_19 = arith.constant 0 : index
    %c0_20 = arith.constant 0 : index
    %14 = vector.load %arg5[%c2, %c0_19, %c0_20] : memref<3x128x128xbf16, #tpu.memory_space<vmem>>, vector<1x128x128xbf16>
    %15 = vector.shape_cast %14 : vector<1x128x128xbf16> to vector<128x128xbf16>
    %cst_21 = arith.constant dense<0.000000e+00> : vector<64x128xf32>
    %16 = tpu.matmul %13, %15, %cst_21 {dimension_numbers = #tpu.dot_dimension_numbers<[1], [0], [0], [1], [0, 0, 1, 1], [], []>} : vector<64x128xbf16>, vector<128x128xbf16>, vector<64x128xf32> -> vector<64x128xf32>
    %17 = arith.addf %11, %16 : vector<64x128xf32>
    %18 = vector.broadcast %0 : vector<1x128xf32> to vector<64x128xf32>
    %19 = arith.addf %17, %18 : vector<64x128xf32>
    %cst_22 = arith.constant 0.000000e+00 : f32
    %20 = vector.broadcast %cst_22 : f32 to vector<64x128xf32>
    %21 = arith.maximumf %19, %20 : vector<64x128xf32>
    %22 = arith.truncf %21 : vector<64x128xf32> to vector<64x128xbf16>
    %c0_23 = arith.constant 0 : index
    %c0_24 = arith.constant 0 : index
    %c0_25 = arith.constant 0 : index
    %c0_26 = arith.constant 0 : index
    %23 = vector.load %arg7[%c0_23, %c0_24, %c0_25, %c0_26] : memref<2x1x64x128xbf16, #tpu.memory_space<vmem>>, vector<1x1x64x128xbf16>
    %24 = vector.shape_cast %23 : vector<1x1x64x128xbf16> to vector<64x128xbf16>
    %25 = vector.shape_cast %22 : vector<64x128xbf16> to vector<1x1x64x128xbf16>
    tpu.vector_store %arg7[%c0_23, %c0_24, %c0_25, %c0_26], %25 {strides = array<i32>} : memref<2x1x64x128xbf16, #tpu.memory_space<vmem>>, vector<1x1x64x128xbf16>,
    %c1_27 = arith.constant 1 : index
    %c0_28 = arith.constant 0 : index
    %c0_29 = arith.constant 0 : index
    %c0_30 = arith.constant 0 : index
    %26 = vector.load %arg2[%c1_27, %c0_28, %c0_29, %c0_30] : memref<2x1x64x128xbf16, #tpu.memory_space<vmem>>, vector<1x1x64x128xbf16>
    %27 = vector.shape_cast %26 : vector<1x1x64x128xbf16> to vector<64x128xbf16>
    %c0_31 = arith.constant 0 : index
    %c0_32 = arith.constant 0 : index
    %c0_33 = arith.constant 0 : index
    %28 = vector.load %arg5[%c0_31, %c0_32, %c0_33] : memref<3x128x128xbf16, #tpu.memory_space<vmem>>, vector<1x128x128xbf16>
    %29 = vector.shape_cast %28 : vector<1x128x128xbf16> to vector<128x128xbf16>
    %cst_34 = arith.constant dense<0.000000e+00> : vector<64x128xf32>
    %30 = tpu.matmul %27, %29, %cst_34 {dimension_numbers = #tpu.dot_dimension_numbers<[1], [0], [0], [1], [0, 0, 1, 1], [], []>} : vector<64x128xbf16>, vector<128x128xbf16>, vector<64x128xf32> -> vector<64x128xf32>
    %c1_35 = arith.constant 1 : index
    %c0_36 = arith.constant 0 : index
    %c0_37 = arith.constant 0 : index
    %c0_38 = arith.constant 0 : index
    %31 = vector.load %arg3[%c1_35, %c0_36, %c0_37, %c0_38] : memref<2x1x64x128xbf16, #tpu.memory_space<vmem>>, vector<1x1x64x128xbf16>
    %32 = vector.shape_cast %31 : vector<1x1x64x128xbf16> to vector<64x128xbf16>
    %c1_39 = arith.constant 1 : index
    %c0_40 = arith.constant 0 : index
    %c0_41 = arith.constant 0 : index
    %33 = vector.load %arg5[%c1_39, %c0_40, %c0_41] : memref<3x128x128xbf16, #tpu.memory_space<vmem>>, vector<1x128x128xbf16>
    %34 = vector.shape_cast %33 : vector<1x128x128xbf16> to vector<128x128xbf16>
    %cst_42 = arith.constant dense<0.000000e+00> : vector<64x128xf32>
    %35 = tpu.matmul %32, %34, %cst_42 {dimension_numbers = #tpu.dot_dimension_numbers<[1], [0], [0], [1], [0, 0, 1, 1], [], []>} : vector<64x128xbf16>, vector<128x128xbf16>, vector<64x128xf32> -> vector<64x128xf32>
    %36 = arith.addf %30, %35 : vector<64x128xf32>
    %c1_43 = arith.constant 1 : index
    %c0_44 = arith.constant 0 : index
    %c0_45 = arith.constant 0 : index
    %c0_46 = arith.constant 0 : index
    %37 = vector.load %arg4[%c1_43, %c0_44, %c0_45, %c0_46] : memref<2x1x64x128xbf16, #tpu.memory_space<vmem>>, vector<1x1x64x128xbf16>
    %38 = vector.shape_cast %37 : vector<1x1x64x128xbf16> to vector<64x128xbf16>
    %c2_47 = arith.constant 2 : index
    %c0_48 = arith.constant 0 : index
    %c0_49 = arith.constant 0 : index
    %39 = vector.load %arg5[%c2_47, %c0_48, %c0_49] : memref<3x128x128xbf16, #tpu.memory_space<vmem>>, vector<1x128x128xbf16>
    %40 = vector.shape_cast %39 : vector<1x128x128xbf16> to vector<128x128xbf16>
    %cst_50 = arith.constant dense<0.000000e+00> : vector<64x128xf32>
    %41 = tpu.matmul %38, %40, %cst_50 {dimension_numbers = #tpu.dot_dimension_numbers<[1], [0], [0], [1], [0, 0, 1, 1], [], []>} : vector<64x128xbf16>, vector<128x128xbf16>, vector<64x128xf32> -> vector<64x128xf32>
    %42 = arith.addf %36, %41 : vector<64x128xf32>
    %43 = vector.broadcast %0 : vector<1x128xf32> to vector<64x128xf32>
    %44 = arith.addf %42, %43 : vector<64x128xf32>
    %cst_51 = arith.constant 0.000000e+00 : f32
    %45 = vector.broadcast %cst_51 : f32 to vector<64x128xf32>
    %46 = arith.maximumf %44, %45 : vector<64x128xf32>
    %47 = arith.truncf %46 : vector<64x128xf32> to vector<64x128xbf16>
    %c1_52 = arith.constant 1 : index
    %c0_53 = arith.constant 0 : index
    %c0_54 = arith.constant 0 : index
    %c0_55 = arith.constant 0 : index
    %48 = vector.load %arg7[%c1_52, %c0_53, %c0_54, %c0_55] : memref<2x1x64x128xbf16, #tpu.memory_space<vmem>>, vector<1x1x64x128xbf16>
    %49 = vector.shape_cast %48 : vector<1x1x64x128xbf16> to vector<64x128xbf16>
    %50 = vector.shape_cast %47 : vector<64x128xbf16> to vector<1x1x64x128xbf16>
    tpu.vector_store %arg7[%c1_52, %c0_53, %c0_54, %c0_55], %50 {strides = array<i32>} : memref<2x1x64x128xbf16, #tpu.memory_space<vmem>>, vector<1x1x64x128xbf16>,
    return
  }
  func.func @transform_0(%arg0: i32, %arg1: i32) -> (i32, i32, i32, i32) {
    %c2_i32 = arith.constant 2 : i32
    %0 = arith.muli %arg1, %c2_i32 : i32
    %c0_i32 = arith.constant 0 : i32
    %1 = arith.addi %0, %c0_i32 : i32
    %c0_i32_0 = arith.constant 0 : i32
    %c0_i32_1 = arith.constant 0 : i32
    %c0_i32_2 = arith.constant 0 : i32
    return %arg0, %1, %c0_i32_0, %c0_i32_1 : i32, i32, i32, i32
  }
  func.func @transform_1(%arg0: i32, %arg1: i32) -> (i32, i32, i32, i32) {
    %c2_i32 = arith.constant 2 : i32
    %0 = arith.muli %arg1, %c2_i32 : i32
    %c1_i32 = arith.constant 1 : i32
    %1 = arith.addi %0, %c1_i32 : i32
    %c0_i32 = arith.constant 0 : i32
    %c0_i32_0 = arith.constant 0 : i32
    %c0_i32_1 = arith.constant 0 : i32
    return %arg0, %1, %c0_i32, %c0_i32_0 : i32, i32, i32, i32
  }
  func.func @transform_2(%arg0: i32, %arg1: i32) -> (i32, i32, i32, i32) {
    %c2_i32 = arith.constant 2 : i32
    %0 = arith.muli %arg1, %c2_i32 : i32
    %c2_i32_0 = arith.constant 2 : i32
    %1 = arith.addi %0, %c2_i32_0 : i32
    %c0_i32 = arith.constant 0 : i32
    %c0_i32_1 = arith.constant 0 : i32
    %c0_i32_2 = arith.constant 0 : i32
    return %arg0, %1, %c0_i32, %c0_i32_1 : i32, i32, i32, i32
  }
  func.func @transform_3(%arg0: i32, %arg1: i32) -> (i32, i32, i32) {
    %c0_i32 = arith.constant 0 : i32
    %c0_i32_0 = arith.constant 0 : i32
    %c0_i32_1 = arith.constant 0 : i32
    %c0_i32_2 = arith.constant 0 : i32
    return %c0_i32, %c0_i32_0, %c0_i32_1 : i32, i32, i32
  }
  func.func @transform_4(%arg0: i32, %arg1: i32) -> (i32, i32) {
    %c0_i32 = arith.constant 0 : i32
    %c0_i32_0 = arith.constant 0 : i32
    %c0_i32_1 = arith.constant 0 : i32
    return %c0_i32, %c0_i32_0 : i32, i32
  }
  func.func @transform_5(%arg0: i32, %arg1: i32) -> (i32, i32, i32, i32) {
    %c0_i32 = arith.constant 0 : i32
    %c0_i32_0 = arith.constant 0 : i32
    %c0_i32_1 = arith.constant 0 : i32
    return %arg0, %arg1, %c0_i32, %c0_i32_0 : i32, i32, i32, i32
  }
}

module attributes {stable_mosaic.version = 11 : i64} {
  func.func @_conv2_kernel(%arg0: i32, %arg1: memref<4x4x25x128xbf16, #tpu.memory_space<vmem>>, %arg2: memref<9x128x128xbf16, #tpu.memory_space<vmem>>, %arg3: memref<1x128xf32, #tpu.memory_space<vmem>>, %arg4: memref<4x20x128xbf16, #tpu.memory_space<vmem>>) attributes {dimension_semantics = [#tpu.dimension_semantics<parallel>], iteration_bounds = array<i64: 1>, scalar_prefetch = 0 : i64, scratch_operands = 0 : i64, tpu.core_type = #tpu.core_type<tc>, window_params = [{transform_indices = @transform_0, window_bounds = array<i64: 4, 4, 25, 128>}, {pipeline_mode = #tpu.pipeline_mode<synchronous>, transform_indices = @transform_1, window_bounds = array<i64: 9, 128, 128>}, {pipeline_mode = #tpu.pipeline_mode<synchronous>, transform_indices = @transform_2, window_bounds = array<i64: 1, 128>}, {transform_indices = @transform_3, window_bounds = array<i64: 4, 20, 128>}]} {
    %c0 = arith.constant 0 : index
    %c0_0 = arith.constant 0 : index
    %0 = vector.load %arg3[%c0, %c0_0] : memref<1x128xf32, #tpu.memory_space<vmem>>, vector<1x128xf32>
    %c0_1 = arith.constant 0 : index
    %c0_2 = arith.constant 0 : index
    %c0_3 = arith.constant 0 : index
    %c0_4 = arith.constant 0 : index
    %1 = vector.load %arg1[%c0_1, %c0_2, %c0_3, %c0_4] : memref<4x4x25x128xbf16, #tpu.memory_space<vmem>>, vector<1x1x19x128xbf16>
    %2 = vector.shape_cast %1 : vector<1x1x19x128xbf16> to vector<19x128xbf16>
    %c0_5 = arith.constant 0 : index
    %c0_6 = arith.constant 0 : index
    %c0_7 = arith.constant 0 : index
    %3 = vector.load %arg2[%c0_5, %c0_6, %c0_7] : memref<9x128x128xbf16, #tpu.memory_space<vmem>>, vector<1x128x128xbf16>
    %4 = vector.shape_cast %3 : vector<1x128x128xbf16> to vector<128x128xbf16>
    %cst = arith.constant dense<0.000000e+00> : vector<19x128xf32>
    %5 = tpu.matmul %2, %4, %cst {dimension_numbers = #tpu.dot_dimension_numbers<[1], [0], [0], [1], [0, 0, 1, 1], [], []>} : vector<19x128xbf16>, vector<128x128xbf16>, vector<19x128xf32> -> vector<19x128xf32>
    %c0_8 = arith.constant 0 : index
    %c1 = arith.constant 1 : index
    %c0_9 = arith.constant 0 : index
    %c0_10 = arith.constant 0 : index
    %6 = vector.load %arg1[%c0_8, %c1, %c0_9, %c0_10] : memref<4x4x25x128xbf16, #tpu.memory_space<vmem>>, vector<1x1x19x128xbf16>
    %7 = vector.shape_cast %6 : vector<1x1x19x128xbf16> to vector<19x128xbf16>
    %c1_11 = arith.constant 1 : index
    %c0_12 = arith.constant 0 : index
    %c0_13 = arith.constant 0 : index
    %8 = vector.load %arg2[%c1_11, %c0_12, %c0_13] : memref<9x128x128xbf16, #tpu.memory_space<vmem>>, vector<1x128x128xbf16>
    %9 = vector.shape_cast %8 : vector<1x128x128xbf16> to vector<128x128xbf16>
    %cst_14 = arith.constant dense<0.000000e+00> : vector<19x128xf32>
    %10 = tpu.matmul %7, %9, %cst_14 {dimension_numbers = #tpu.dot_dimension_numbers<[1], [0], [0], [1], [0, 0, 1, 1], [], []>} : vector<19x128xbf16>, vector<128x128xbf16>, vector<19x128xf32> -> vector<19x128xf32>
    %11 = arith.addf %5, %10 : vector<19x128xf32>
    %c0_15 = arith.constant 0 : index
    %c0_16 = arith.constant 0 : index
    %c1_17 = arith.constant 1 : index
    %c0_18 = arith.constant 0 : index
    %12 = vector.load %arg1[%c0_15, %c0_16, %c1_17, %c0_18] : memref<4x4x25x128xbf16, #tpu.memory_space<vmem>>, vector<1x1x19x128xbf16>
    %13 = vector.shape_cast %12 : vector<1x1x19x128xbf16> to vector<19x128xbf16>
    %c2 = arith.constant 2 : index
    %c0_19 = arith.constant 0 : index
    %c0_20 = arith.constant 0 : index
    %14 = vector.load %arg2[%c2, %c0_19, %c0_20] : memref<9x128x128xbf16, #tpu.memory_space<vmem>>, vector<1x128x128xbf16>
    %15 = vector.shape_cast %14 : vector<1x128x128xbf16> to vector<128x128xbf16>
    %cst_21 = arith.constant dense<0.000000e+00> : vector<19x128xf32>
    %16 = tpu.matmul %13, %15, %cst_21 {dimension_numbers = #tpu.dot_dimension_numbers<[1], [0], [0], [1], [0, 0, 1, 1], [], []>} : vector<19x128xbf16>, vector<128x128xbf16>, vector<19x128xf32> -> vector<19x128xf32>
    %17 = arith.addf %11, %16 : vector<19x128xf32>
    %c0_22 = arith.constant 0 : index
    %c2_23 = arith.constant 2 : index
    %c0_24 = arith.constant 0 : index
    %c0_25 = arith.constant 0 : index
    %18 = vector.load %arg1[%c0_22, %c2_23, %c0_24, %c0_25] : memref<4x4x25x128xbf16, #tpu.memory_space<vmem>>, vector<1x1x19x128xbf16>
    %19 = vector.shape_cast %18 : vector<1x1x19x128xbf16> to vector<19x128xbf16>
    %c3 = arith.constant 3 : index
    %c0_26 = arith.constant 0 : index
    %c0_27 = arith.constant 0 : index
    %20 = vector.load %arg2[%c3, %c0_26, %c0_27] : memref<9x128x128xbf16, #tpu.memory_space<vmem>>, vector<1x128x128xbf16>
    %21 = vector.shape_cast %20 : vector<1x128x128xbf16> to vector<128x128xbf16>
    %cst_28 = arith.constant dense<0.000000e+00> : vector<19x128xf32>
    %22 = tpu.matmul %19, %21, %cst_28 {dimension_numbers = #tpu.dot_dimension_numbers<[1], [0], [0], [1], [0, 0, 1, 1], [], []>} : vector<19x128xbf16>, vector<128x128xbf16>, vector<19x128xf32> -> vector<19x128xf32>
    %23 = arith.addf %17, %22 : vector<19x128xf32>
    %c0_29 = arith.constant 0 : index
    %c3_30 = arith.constant 3 : index
    %c0_31 = arith.constant 0 : index
    %c0_32 = arith.constant 0 : index
    %24 = vector.load %arg1[%c0_29, %c3_30, %c0_31, %c0_32] : memref<4x4x25x128xbf16, #tpu.memory_space<vmem>>, vector<1x1x19x128xbf16>
    %25 = vector.shape_cast %24 : vector<1x1x19x128xbf16> to vector<19x128xbf16>
    %c4 = arith.constant 4 : index
    %c0_33 = arith.constant 0 : index
    %c0_34 = arith.constant 0 : index
    %26 = vector.load %arg2[%c4, %c0_33, %c0_34] : memref<9x128x128xbf16, #tpu.memory_space<vmem>>, vector<1x128x128xbf16>
    %27 = vector.shape_cast %26 : vector<1x128x128xbf16> to vector<128x128xbf16>
    %cst_35 = arith.constant dense<0.000000e+00> : vector<19x128xf32>
    %28 = tpu.matmul %25, %27, %cst_35 {dimension_numbers = #tpu.dot_dimension_numbers<[1], [0], [0], [1], [0, 0, 1, 1], [], []>} : vector<19x128xbf16>, vector<128x128xbf16>, vector<19x128xf32> -> vector<19x128xf32>
    %29 = arith.addf %23, %28 : vector<19x128xf32>
    %c0_36 = arith.constant 0 : index
    %c2_37 = arith.constant 2 : index
    %c1_38 = arith.constant 1 : index
    %c0_39 = arith.constant 0 : index
    %30 = vector.load %arg1[%c0_36, %c2_37, %c1_38, %c0_39] : memref<4x4x25x128xbf16, #tpu.memory_space<vmem>>, vector<1x1x19x128xbf16>
    %31 = vector.shape_cast %30 : vector<1x1x19x128xbf16> to vector<19x128xbf16>
    %c5 = arith.constant 5 : index
    %c0_40 = arith.constant 0 : index
    %c0_41 = arith.constant 0 : index
    %32 = vector.load %arg2[%c5, %c0_40, %c0_41] : memref<9x128x128xbf16, #tpu.memory_space<vmem>>, vector<1x128x128xbf16>
    %33 = vector.shape_cast %32 : vector<1x128x128xbf16> to vector<128x128xbf16>
    %cst_42 = arith.constant dense<0.000000e+00> : vector<19x128xf32>
    %34 = tpu.matmul %31, %33, %cst_42 {dimension_numbers = #tpu.dot_dimension_numbers<[1], [0], [0], [1], [0, 0, 1, 1], [], []>} : vector<19x128xbf16>, vector<128x128xbf16>, vector<19x128xf32> -> vector<19x128xf32>
    %35 = arith.addf %29, %34 : vector<19x128xf32>
    %c0_43 = arith.constant 0 : index
    %c0_44 = arith.constant 0 : index
    %c5_45 = arith.constant 5 : index
    %c0_46 = arith.constant 0 : index
    %36 = vector.load %arg1[%c0_43, %c0_44, %c5_45, %c0_46] : memref<4x4x25x128xbf16, #tpu.memory_space<vmem>>, vector<1x1x19x128xbf16>
    %37 = vector.shape_cast %36 : vector<1x1x19x128xbf16> to vector<19x128xbf16>
    %c6 = arith.constant 6 : index
    %c0_47 = arith.constant 0 : index
    %c0_48 = arith.constant 0 : index
    %38 = vector.load %arg2[%c6, %c0_47, %c0_48] : memref<9x128x128xbf16, #tpu.memory_space<vmem>>, vector<1x128x128xbf16>
    %39 = vector.shape_cast %38 : vector<1x128x128xbf16> to vector<128x128xbf16>
    %cst_49 = arith.constant dense<0.000000e+00> : vector<19x128xf32>
    %40 = tpu.matmul %37, %39, %cst_49 {dimension_numbers = #tpu.dot_dimension_numbers<[1], [0], [0], [1], [0, 0, 1, 1], [], []>} : vector<19x128xbf16>, vector<128x128xbf16>, vector<19x128xf32> -> vector<19x128xf32>
    %41 = arith.addf %35, %40 : vector<19x128xf32>
    %c0_50 = arith.constant 0 : index
    %c1_51 = arith.constant 1 : index
    %c5_52 = arith.constant 5 : index
    %c0_53 = arith.constant 0 : index
    %42 = vector.load %arg1[%c0_50, %c1_51, %c5_52, %c0_53] : memref<4x4x25x128xbf16, #tpu.memory_space<vmem>>, vector<1x1x19x128xbf16>
    %43 = vector.shape_cast %42 : vector<1x1x19x128xbf16> to vector<19x128xbf16>
    %c7 = arith.constant 7 : index
    %c0_54 = arith.constant 0 : index
    %c0_55 = arith.constant 0 : index
    %44 = vector.load %arg2[%c7, %c0_54, %c0_55] : memref<9x128x128xbf16, #tpu.memory_space<vmem>>, vector<1x128x128xbf16>
    %45 = vector.shape_cast %44 : vector<1x128x128xbf16> to vector<128x128xbf16>
    %cst_56 = arith.constant dense<0.000000e+00> : vector<19x128xf32>
    %46 = tpu.matmul %43, %45, %cst_56 {dimension_numbers = #tpu.dot_dimension_numbers<[1], [0], [0], [1], [0, 0, 1, 1], [], []>} : vector<19x128xbf16>, vector<128x128xbf16>, vector<19x128xf32> -> vector<19x128xf32>
    %47 = arith.addf %41, %46 : vector<19x128xf32>
    %c0_57 = arith.constant 0 : index
    %c0_58 = arith.constant 0 : index
    %c6_59 = arith.constant 6 : index
    %c0_60 = arith.constant 0 : index
    %48 = vector.load %arg1[%c0_57, %c0_58, %c6_59, %c0_60] : memref<4x4x25x128xbf16, #tpu.memory_space<vmem>>, vector<1x1x19x128xbf16>
    %49 = vector.shape_cast %48 : vector<1x1x19x128xbf16> to vector<19x128xbf16>
    %c8 = arith.constant 8 : index
    %c0_61 = arith.constant 0 : index
    %c0_62 = arith.constant 0 : index
    %50 = vector.load %arg2[%c8, %c0_61, %c0_62] : memref<9x128x128xbf16, #tpu.memory_space<vmem>>, vector<1x128x128xbf16>
    %51 = vector.shape_cast %50 : vector<1x128x128xbf16> to vector<128x128xbf16>
    %cst_63 = arith.constant dense<0.000000e+00> : vector<19x128xf32>
    %52 = tpu.matmul %49, %51, %cst_63 {dimension_numbers = #tpu.dot_dimension_numbers<[1], [0], [0], [1], [0, 0, 1, 1], [], []>} : vector<19x128xbf16>, vector<128x128xbf16>, vector<19x128xf32> -> vector<19x128xf32>
    %53 = arith.addf %47, %52 : vector<19x128xf32>
    %54 = vector.broadcast %0 : vector<1x128xf32> to vector<19x128xf32>
    %55 = arith.addf %53, %54 : vector<19x128xf32>
    %cst_64 = arith.constant 0.000000e+00 : f32
    %56 = vector.broadcast %cst_64 : f32 to vector<19x128xf32>
    %57 = arith.maximumf %55, %56 : vector<19x128xf32>
    %58 = arith.truncf %57 : vector<19x128xf32> to vector<19x128xbf16>
    %c0_65 = arith.constant 0 : index
    %c0_66 = arith.constant 0 : index
    %c0_67 = arith.constant 0 : index
    %59 = vector.load %arg4[%c0_65, %c0_66, %c0_67] : memref<4x20x128xbf16, #tpu.memory_space<vmem>>, vector<1x19x128xbf16>
    %60 = vector.shape_cast %59 : vector<1x19x128xbf16> to vector<19x128xbf16>
    %61 = vector.shape_cast %58 : vector<19x128xbf16> to vector<1x19x128xbf16>
    tpu.vector_store %arg4[%c0_65, %c0_66, %c0_67], %61 {strides = array<i32>} : memref<4x20x128xbf16, #tpu.memory_space<vmem>>, vector<1x19x128xbf16>,
    %c1_68 = arith.constant 1 : index
    %c0_69 = arith.constant 0 : index
    %c0_70 = arith.constant 0 : index
    %c0_71 = arith.constant 0 : index
    %62 = vector.load %arg1[%c1_68, %c0_69, %c0_70, %c0_71] : memref<4x4x25x128xbf16, #tpu.memory_space<vmem>>, vector<1x1x19x128xbf16>
    %63 = vector.shape_cast %62 : vector<1x1x19x128xbf16> to vector<19x128xbf16>
    %c0_72 = arith.constant 0 : index
    %c0_73 = arith.constant 0 : index
    %c0_74 = arith.constant 0 : index
    %64 = vector.load %arg2[%c0_72, %c0_73, %c0_74] : memref<9x128x128xbf16, #tpu.memory_space<vmem>>, vector<1x128x128xbf16>
    %65 = vector.shape_cast %64 : vector<1x128x128xbf16> to vector<128x128xbf16>
    %cst_75 = arith.constant dense<0.000000e+00> : vector<19x128xf32>
    %66 = tpu.matmul %63, %65, %cst_75 {dimension_numbers = #tpu.dot_dimension_numbers<[1], [0], [0], [1], [0, 0, 1, 1], [], []>} : vector<19x128xbf16>, vector<128x128xbf16>, vector<19x128xf32> -> vector<19x128xf32>
    %c1_76 = arith.constant 1 : index
    %c1_77 = arith.constant 1 : index
    %c0_78 = arith.constant 0 : index
    %c0_79 = arith.constant 0 : index
    %67 = vector.load %arg1[%c1_76, %c1_77, %c0_78, %c0_79] : memref<4x4x25x128xbf16, #tpu.memory_space<vmem>>, vector<1x1x19x128xbf16>
    %68 = vector.shape_cast %67 : vector<1x1x19x128xbf16> to vector<19x128xbf16>
    %c1_80 = arith.constant 1 : index
    %c0_81 = arith.constant 0 : index
    %c0_82 = arith.constant 0 : index
    %69 = vector.load %arg2[%c1_80, %c0_81, %c0_82] : memref<9x128x128xbf16, #tpu.memory_space<vmem>>, vector<1x128x128xbf16>
    %70 = vector.shape_cast %69 : vector<1x128x128xbf16> to vector<128x128xbf16>
    %cst_83 = arith.constant dense<0.000000e+00> : vector<19x128xf32>
    %71 = tpu.matmul %68, %70, %cst_83 {dimension_numbers = #tpu.dot_dimension_numbers<[1], [0], [0], [1], [0, 0, 1, 1], [], []>} : vector<19x128xbf16>, vector<128x128xbf16>, vector<19x128xf32> -> vector<19x128xf32>
    %72 = arith.addf %66, %71 : vector<19x128xf32>
    %c1_84 = arith.constant 1 : index
    %c0_85 = arith.constant 0 : index
    %c1_86 = arith.constant 1 : index
    %c0_87 = arith.constant 0 : index
    %73 = vector.load %arg1[%c1_84, %c0_85, %c1_86, %c0_87] : memref<4x4x25x128xbf16, #tpu.memory_space<vmem>>, vector<1x1x19x128xbf16>
    %74 = vector.shape_cast %73 : vector<1x1x19x128xbf16> to vector<19x128xbf16>
    %c2_88 = arith.constant 2 : index
    %c0_89 = arith.constant 0 : index
    %c0_90 = arith.constant 0 : index
    %75 = vector.load %arg2[%c2_88, %c0_89, %c0_90] : memref<9x128x128xbf16, #tpu.memory_space<vmem>>, vector<1x128x128xbf16>
    %76 = vector.shape_cast %75 : vector<1x128x128xbf16> to vector<128x128xbf16>
    %cst_91 = arith.constant dense<0.000000e+00> : vector<19x128xf32>
    %77 = tpu.matmul %74, %76, %cst_91 {dimension_numbers = #tpu.dot_dimension_numbers<[1], [0], [0], [1], [0, 0, 1, 1], [], []>} : vector<19x128xbf16>, vector<128x128xbf16>, vector<19x128xf32> -> vector<19x128xf32>
    %78 = arith.addf %72, %77 : vector<19x128xf32>
    %c1_92 = arith.constant 1 : index
    %c2_93 = arith.constant 2 : index
    %c0_94 = arith.constant 0 : index
    %c0_95 = arith.constant 0 : index
    %79 = vector.load %arg1[%c1_92, %c2_93, %c0_94, %c0_95] : memref<4x4x25x128xbf16, #tpu.memory_space<vmem>>, vector<1x1x19x128xbf16>
    %80 = vector.shape_cast %79 : vector<1x1x19x128xbf16> to vector<19x128xbf16>
    %c3_96 = arith.constant 3 : index
    %c0_97 = arith.constant 0 : index
    %c0_98 = arith.constant 0 : index
    %81 = vector.load %arg2[%c3_96, %c0_97, %c0_98] : memref<9x128x128xbf16, #tpu.memory_space<vmem>>, vector<1x128x128xbf16>
    %82 = vector.shape_cast %81 : vector<1x128x128xbf16> to vector<128x128xbf16>
    %cst_99 = arith.constant dense<0.000000e+00> : vector<19x128xf32>
    %83 = tpu.matmul %80, %82, %cst_99 {dimension_numbers = #tpu.dot_dimension_numbers<[1], [0], [0], [1], [0, 0, 1, 1], [], []>} : vector<19x128xbf16>, vector<128x128xbf16>, vector<19x128xf32> -> vector<19x128xf32>
    %84 = arith.addf %78, %83 : vector<19x128xf32>
    %c1_100 = arith.constant 1 : index
    %c3_101 = arith.constant 3 : index
    %c0_102 = arith.constant 0 : index
    %c0_103 = arith.constant 0 : index
    %85 = vector.load %arg1[%c1_100, %c3_101, %c0_102, %c0_103] : memref<4x4x25x128xbf16, #tpu.memory_space<vmem>>, vector<1x1x19x128xbf16>
    %86 = vector.shape_cast %85 : vector<1x1x19x128xbf16> to vector<19x128xbf16>
    %c4_104 = arith.constant 4 : index
    %c0_105 = arith.constant 0 : index
    %c0_106 = arith.constant 0 : index
    %87 = vector.load %arg2[%c4_104, %c0_105, %c0_106] : memref<9x128x128xbf16, #tpu.memory_space<vmem>>, vector<1x128x128xbf16>
    %88 = vector.shape_cast %87 : vector<1x128x128xbf16> to vector<128x128xbf16>
    %cst_107 = arith.constant dense<0.000000e+00> : vector<19x128xf32>
    %89 = tpu.matmul %86, %88, %cst_107 {dimension_numbers = #tpu.dot_dimension_numbers<[1], [0], [0], [1], [0, 0, 1, 1], [], []>} : vector<19x128xbf16>, vector<128x128xbf16>, vector<19x128xf32> -> vector<19x128xf32>
    %90 = arith.addf %84, %89 : vector<19x128xf32>
    %c1_108 = arith.constant 1 : index
    %c2_109 = arith.constant 2 : index
    %c1_110 = arith.constant 1 : index
    %c0_111 = arith.constant 0 : index
    %91 = vector.load %arg1[%c1_108, %c2_109, %c1_110, %c0_111] : memref<4x4x25x128xbf16, #tpu.memory_space<vmem>>, vector<1x1x19x128xbf16>
    %92 = vector.shape_cast %91 : vector<1x1x19x128xbf16> to vector<19x128xbf16>
    %c5_112 = arith.constant 5 : index
    %c0_113 = arith.constant 0 : index
    %c0_114 = arith.constant 0 : index
    %93 = vector.load %arg2[%c5_112, %c0_113, %c0_114] : memref<9x128x128xbf16, #tpu.memory_space<vmem>>, vector<1x128x128xbf16>
    %94 = vector.shape_cast %93 : vector<1x128x128xbf16> to vector<128x128xbf16>
    %cst_115 = arith.constant dense<0.000000e+00> : vector<19x128xf32>
    %95 = tpu.matmul %92, %94, %cst_115 {dimension_numbers = #tpu.dot_dimension_numbers<[1], [0], [0], [1], [0, 0, 1, 1], [], []>} : vector<19x128xbf16>, vector<128x128xbf16>, vector<19x128xf32> -> vector<19x128xf32>
    %96 = arith.addf %90, %95 : vector<19x128xf32>
    %c1_116 = arith.constant 1 : index
    %c0_117 = arith.constant 0 : index
    %c5_118 = arith.constant 5 : index
    %c0_119 = arith.constant 0 : index
    %97 = vector.load %arg1[%c1_116, %c0_117, %c5_118, %c0_119] : memref<4x4x25x128xbf16, #tpu.memory_space<vmem>>, vector<1x1x19x128xbf16>
    %98 = vector.shape_cast %97 : vector<1x1x19x128xbf16> to vector<19x128xbf16>
    %c6_120 = arith.constant 6 : index
    %c0_121 = arith.constant 0 : index
    %c0_122 = arith.constant 0 : index
    %99 = vector.load %arg2[%c6_120, %c0_121, %c0_122] : memref<9x128x128xbf16, #tpu.memory_space<vmem>>, vector<1x128x128xbf16>
    %100 = vector.shape_cast %99 : vector<1x128x128xbf16> to vector<128x128xbf16>
    %cst_123 = arith.constant dense<0.000000e+00> : vector<19x128xf32>
    %101 = tpu.matmul %98, %100, %cst_123 {dimension_numbers = #tpu.dot_dimension_numbers<[1], [0], [0], [1], [0, 0, 1, 1], [], []>} : vector<19x128xbf16>, vector<128x128xbf16>, vector<19x128xf32> -> vector<19x128xf32>
    %102 = arith.addf %96, %101 : vector<19x128xf32>
    %c1_124 = arith.constant 1 : index
    %c1_125 = arith.constant 1 : index
    %c5_126 = arith.constant 5 : index
    %c0_127 = arith.constant 0 : index
    %103 = vector.load %arg1[%c1_124, %c1_125, %c5_126, %c0_127] : memref<4x4x25x128xbf16, #tpu.memory_space<vmem>>, vector<1x1x19x128xbf16>
    %104 = vector.shape_cast %103 : vector<1x1x19x128xbf16> to vector<19x128xbf16>
    %c7_128 = arith.constant 7 : index
    %c0_129 = arith.constant 0 : index
    %c0_130 = arith.constant 0 : index
    %105 = vector.load %arg2[%c7_128, %c0_129, %c0_130] : memref<9x128x128xbf16, #tpu.memory_space<vmem>>, vector<1x128x128xbf16>
    %106 = vector.shape_cast %105 : vector<1x128x128xbf16> to vector<128x128xbf16>
    %cst_131 = arith.constant dense<0.000000e+00> : vector<19x128xf32>
    %107 = tpu.matmul %104, %106, %cst_131 {dimension_numbers = #tpu.dot_dimension_numbers<[1], [0], [0], [1], [0, 0, 1, 1], [], []>} : vector<19x128xbf16>, vector<128x128xbf16>, vector<19x128xf32> -> vector<19x128xf32>
    %108 = arith.addf %102, %107 : vector<19x128xf32>
    %c1_132 = arith.constant 1 : index
    %c0_133 = arith.constant 0 : index
    %c6_134 = arith.constant 6 : index
    %c0_135 = arith.constant 0 : index
    %109 = vector.load %arg1[%c1_132, %c0_133, %c6_134, %c0_135] : memref<4x4x25x128xbf16, #tpu.memory_space<vmem>>, vector<1x1x19x128xbf16>
    %110 = vector.shape_cast %109 : vector<1x1x19x128xbf16> to vector<19x128xbf16>
    %c8_136 = arith.constant 8 : index
    %c0_137 = arith.constant 0 : index
    %c0_138 = arith.constant 0 : index
    %111 = vector.load %arg2[%c8_136, %c0_137, %c0_138] : memref<9x128x128xbf16, #tpu.memory_space<vmem>>, vector<1x128x128xbf16>
    %112 = vector.shape_cast %111 : vector<1x128x128xbf16> to vector<128x128xbf16>
    %cst_139 = arith.constant dense<0.000000e+00> : vector<19x128xf32>
    %113 = tpu.matmul %110, %112, %cst_139 {dimension_numbers = #tpu.dot_dimension_numbers<[1], [0], [0], [1], [0, 0, 1, 1], [], []>} : vector<19x128xbf16>, vector<128x128xbf16>, vector<19x128xf32> -> vector<19x128xf32>
    %114 = arith.addf %108, %113 : vector<19x128xf32>
    %115 = vector.broadcast %0 : vector<1x128xf32> to vector<19x128xf32>
    %116 = arith.addf %114, %115 : vector<19x128xf32>
    %cst_140 = arith.constant 0.000000e+00 : f32
    %117 = vector.broadcast %cst_140 : f32 to vector<19x128xf32>
    %118 = arith.maximumf %116, %117 : vector<19x128xf32>
    %119 = arith.truncf %118 : vector<19x128xf32> to vector<19x128xbf16>
    %c1_141 = arith.constant 1 : index
    %c0_142 = arith.constant 0 : index
    %c0_143 = arith.constant 0 : index
    %120 = vector.load %arg4[%c1_141, %c0_142, %c0_143] : memref<4x20x128xbf16, #tpu.memory_space<vmem>>, vector<1x19x128xbf16>
    %121 = vector.shape_cast %120 : vector<1x19x128xbf16> to vector<19x128xbf16>
    %122 = vector.shape_cast %119 : vector<19x128xbf16> to vector<1x19x128xbf16>
    tpu.vector_store %arg4[%c1_141, %c0_142, %c0_143], %122 {strides = array<i32>} : memref<4x20x128xbf16, #tpu.memory_space<vmem>>, vector<1x19x128xbf16>,
    %c2_144 = arith.constant 2 : index
    %c0_145 = arith.constant 0 : index
    %c0_146 = arith.constant 0 : index
    %c0_147 = arith.constant 0 : index
    %123 = vector.load %arg1[%c2_144, %c0_145, %c0_146, %c0_147] : memref<4x4x25x128xbf16, #tpu.memory_space<vmem>>, vector<1x1x19x128xbf16>
    %124 = vector.shape_cast %123 : vector<1x1x19x128xbf16> to vector<19x128xbf16>
    %c0_148 = arith.constant 0 : index
    %c0_149 = arith.constant 0 : index
    %c0_150 = arith.constant 0 : index
    %125 = vector.load %arg2[%c0_148, %c0_149, %c0_150] : memref<9x128x128xbf16, #tpu.memory_space<vmem>>, vector<1x128x128xbf16>
    %126 = vector.shape_cast %125 : vector<1x128x128xbf16> to vector<128x128xbf16>
    %cst_151 = arith.constant dense<0.000000e+00> : vector<19x128xf32>
    %127 = tpu.matmul %124, %126, %cst_151 {dimension_numbers = #tpu.dot_dimension_numbers<[1], [0], [0], [1], [0, 0, 1, 1], [], []>} : vector<19x128xbf16>, vector<128x128xbf16>, vector<19x128xf32> -> vector<19x128xf32>
    %c2_152 = arith.constant 2 : index
    %c1_153 = arith.constant 1 : index
    %c0_154 = arith.constant 0 : index
    %c0_155 = arith.constant 0 : index
    %128 = vector.load %arg1[%c2_152, %c1_153, %c0_154, %c0_155] : memref<4x4x25x128xbf16, #tpu.memory_space<vmem>>, vector<1x1x19x128xbf16>
    %129 = vector.shape_cast %128 : vector<1x1x19x128xbf16> to vector<19x128xbf16>
    %c1_156 = arith.constant 1 : index
    %c0_157 = arith.constant 0 : index
    %c0_158 = arith.constant 0 : index
    %130 = vector.load %arg2[%c1_156, %c0_157, %c0_158] : memref<9x128x128xbf16, #tpu.memory_space<vmem>>, vector<1x128x128xbf16>
    %131 = vector.shape_cast %130 : vector<1x128x128xbf16> to vector<128x128xbf16>
    %cst_159 = arith.constant dense<0.000000e+00> : vector<19x128xf32>
    %132 = tpu.matmul %129, %131, %cst_159 {dimension_numbers = #tpu.dot_dimension_numbers<[1], [0], [0], [1], [0, 0, 1, 1], [], []>} : vector<19x128xbf16>, vector<128x128xbf16>, vector<19x128xf32> -> vector<19x128xf32>
    %133 = arith.addf %127, %132 : vector<19x128xf32>
    %c2_160 = arith.constant 2 : index
    %c0_161 = arith.constant 0 : index
    %c1_162 = arith.constant 1 : index
    %c0_163 = arith.constant 0 : index
    %134 = vector.load %arg1[%c2_160, %c0_161, %c1_162, %c0_163] : memref<4x4x25x128xbf16, #tpu.memory_space<vmem>>, vector<1x1x19x128xbf16>
    %135 = vector.shape_cast %134 : vector<1x1x19x128xbf16> to vector<19x128xbf16>
    %c2_164 = arith.constant 2 : index
    %c0_165 = arith.constant 0 : index
    %c0_166 = arith.constant 0 : index
    %136 = vector.load %arg2[%c2_164, %c0_165, %c0_166] : memref<9x128x128xbf16, #tpu.memory_space<vmem>>, vector<1x128x128xbf16>
    %137 = vector.shape_cast %136 : vector<1x128x128xbf16> to vector<128x128xbf16>
    %cst_167 = arith.constant dense<0.000000e+00> : vector<19x128xf32>
    %138 = tpu.matmul %135, %137, %cst_167 {dimension_numbers = #tpu.dot_dimension_numbers<[1], [0], [0], [1], [0, 0, 1, 1], [], []>} : vector<19x128xbf16>, vector<128x128xbf16>, vector<19x128xf32> -> vector<19x128xf32>
    %139 = arith.addf %133, %138 : vector<19x128xf32>
    %c2_168 = arith.constant 2 : index
    %c2_169 = arith.constant 2 : index
    %c0_170 = arith.constant 0 : index
    %c0_171 = arith.constant 0 : index
    %140 = vector.load %arg1[%c2_168, %c2_169, %c0_170, %c0_171] : memref<4x4x25x128xbf16, #tpu.memory_space<vmem>>, vector<1x1x19x128xbf16>
    %141 = vector.shape_cast %140 : vector<1x1x19x128xbf16> to vector<19x128xbf16>
    %c3_172 = arith.constant 3 : index
    %c0_173 = arith.constant 0 : index
    %c0_174 = arith.constant 0 : index
    %142 = vector.load %arg2[%c3_172, %c0_173, %c0_174] : memref<9x128x128xbf16, #tpu.memory_space<vmem>>, vector<1x128x128xbf16>
    %143 = vector.shape_cast %142 : vector<1x128x128xbf16> to vector<128x128xbf16>
    %cst_175 = arith.constant dense<0.000000e+00> : vector<19x128xf32>
    %144 = tpu.matmul %141, %143, %cst_175 {dimension_numbers = #tpu.dot_dimension_numbers<[1], [0], [0], [1], [0, 0, 1, 1], [], []>} : vector<19x128xbf16>, vector<128x128xbf16>, vector<19x128xf32> -> vector<19x128xf32>
    %145 = arith.addf %139, %144 : vector<19x128xf32>
    %c2_176 = arith.constant 2 : index
    %c3_177 = arith.constant 3 : index
    %c0_178 = arith.constant 0 : index
    %c0_179 = arith.constant 0 : index
    %146 = vector.load %arg1[%c2_176, %c3_177, %c0_178, %c0_179] : memref<4x4x25x128xbf16, #tpu.memory_space<vmem>>, vector<1x1x19x128xbf16>
    %147 = vector.shape_cast %146 : vector<1x1x19x128xbf16> to vector<19x128xbf16>
    %c4_180 = arith.constant 4 : index
    %c0_181 = arith.constant 0 : index
    %c0_182 = arith.constant 0 : index
    %148 = vector.load %arg2[%c4_180, %c0_181, %c0_182] : memref<9x128x128xbf16, #tpu.memory_space<vmem>>, vector<1x128x128xbf16>
    %149 = vector.shape_cast %148 : vector<1x128x128xbf16> to vector<128x128xbf16>
    %cst_183 = arith.constant dense<0.000000e+00> : vector<19x128xf32>
    %150 = tpu.matmul %147, %149, %cst_183 {dimension_numbers = #tpu.dot_dimension_numbers<[1], [0], [0], [1], [0, 0, 1, 1], [], []>} : vector<19x128xbf16>, vector<128x128xbf16>, vector<19x128xf32> -> vector<19x128xf32>
    %151 = arith.addf %145, %150 : vector<19x128xf32>
    %c2_184 = arith.constant 2 : index
    %c2_185 = arith.constant 2 : index
    %c1_186 = arith.constant 1 : index
    %c0_187 = arith.constant 0 : index
    %152 = vector.load %arg1[%c2_184, %c2_185, %c1_186, %c0_187] : memref<4x4x25x128xbf16, #tpu.memory_space<vmem>>, vector<1x1x19x128xbf16>
    %153 = vector.shape_cast %152 : vector<1x1x19x128xbf16> to vector<19x128xbf16>
    %c5_188 = arith.constant 5 : index
    %c0_189 = arith.constant 0 : index
    %c0_190 = arith.constant 0 : index
    %154 = vector.load %arg2[%c5_188, %c0_189, %c0_190] : memref<9x128x128xbf16, #tpu.memory_space<vmem>>, vector<1x128x128xbf16>
    %155 = vector.shape_cast %154 : vector<1x128x128xbf16> to vector<128x128xbf16>
    %cst_191 = arith.constant dense<0.000000e+00> : vector<19x128xf32>
    %156 = tpu.matmul %153, %155, %cst_191 {dimension_numbers = #tpu.dot_dimension_numbers<[1], [0], [0], [1], [0, 0, 1, 1], [], []>} : vector<19x128xbf16>, vector<128x128xbf16>, vector<19x128xf32> -> vector<19x128xf32>
    %157 = arith.addf %151, %156 : vector<19x128xf32>
    %c2_192 = arith.constant 2 : index
    %c0_193 = arith.constant 0 : index
    %c5_194 = arith.constant 5 : index
    %c0_195 = arith.constant 0 : index
    %158 = vector.load %arg1[%c2_192, %c0_193, %c5_194, %c0_195] : memref<4x4x25x128xbf16, #tpu.memory_space<vmem>>, vector<1x1x19x128xbf16>
    %159 = vector.shape_cast %158 : vector<1x1x19x128xbf16> to vector<19x128xbf16>
    %c6_196 = arith.constant 6 : index
    %c0_197 = arith.constant 0 : index
    %c0_198 = arith.constant 0 : index
    %160 = vector.load %arg2[%c6_196, %c0_197, %c0_198] : memref<9x128x128xbf16, #tpu.memory_space<vmem>>, vector<1x128x128xbf16>
    %161 = vector.shape_cast %160 : vector<1x128x128xbf16> to vector<128x128xbf16>
    %cst_199 = arith.constant dense<0.000000e+00> : vector<19x128xf32>
    %162 = tpu.matmul %159, %161, %cst_199 {dimension_numbers = #tpu.dot_dimension_numbers<[1], [0], [0], [1], [0, 0, 1, 1], [], []>} : vector<19x128xbf16>, vector<128x128xbf16>, vector<19x128xf32> -> vector<19x128xf32>
    %163 = arith.addf %157, %162 : vector<19x128xf32>
    %c2_200 = arith.constant 2 : index
    %c1_201 = arith.constant 1 : index
    %c5_202 = arith.constant 5 : index
    %c0_203 = arith.constant 0 : index
    %164 = vector.load %arg1[%c2_200, %c1_201, %c5_202, %c0_203] : memref<4x4x25x128xbf16, #tpu.memory_space<vmem>>, vector<1x1x19x128xbf16>
    %165 = vector.shape_cast %164 : vector<1x1x19x128xbf16> to vector<19x128xbf16>
    %c7_204 = arith.constant 7 : index
    %c0_205 = arith.constant 0 : index
    %c0_206 = arith.constant 0 : index
    %166 = vector.load %arg2[%c7_204, %c0_205, %c0_206] : memref<9x128x128xbf16, #tpu.memory_space<vmem>>, vector<1x128x128xbf16>
    %167 = vector.shape_cast %166 : vector<1x128x128xbf16> to vector<128x128xbf16>
    %cst_207 = arith.constant dense<0.000000e+00> : vector<19x128xf32>
    %168 = tpu.matmul %165, %167, %cst_207 {dimension_numbers = #tpu.dot_dimension_numbers<[1], [0], [0], [1], [0, 0, 1, 1], [], []>} : vector<19x128xbf16>, vector<128x128xbf16>, vector<19x128xf32> -> vector<19x128xf32>
    %169 = arith.addf %163, %168 : vector<19x128xf32>
    %c2_208 = arith.constant 2 : index
    %c0_209 = arith.constant 0 : index
    %c6_210 = arith.constant 6 : index
    %c0_211 = arith.constant 0 : index
    %170 = vector.load %arg1[%c2_208, %c0_209, %c6_210, %c0_211] : memref<4x4x25x128xbf16, #tpu.memory_space<vmem>>, vector<1x1x19x128xbf16>
    %171 = vector.shape_cast %170 : vector<1x1x19x128xbf16> to vector<19x128xbf16>
    %c8_212 = arith.constant 8 : index
    %c0_213 = arith.constant 0 : index
    %c0_214 = arith.constant 0 : index
    %172 = vector.load %arg2[%c8_212, %c0_213, %c0_214] : memref<9x128x128xbf16, #tpu.memory_space<vmem>>, vector<1x128x128xbf16>
    %173 = vector.shape_cast %172 : vector<1x128x128xbf16> to vector<128x128xbf16>
    %cst_215 = arith.constant dense<0.000000e+00> : vector<19x128xf32>
    %174 = tpu.matmul %171, %173, %cst_215 {dimension_numbers = #tpu.dot_dimension_numbers<[1], [0], [0], [1], [0, 0, 1, 1], [], []>} : vector<19x128xbf16>, vector<128x128xbf16>, vector<19x128xf32> -> vector<19x128xf32>
    %175 = arith.addf %169, %174 : vector<19x128xf32>
    %176 = vector.broadcast %0 : vector<1x128xf32> to vector<19x128xf32>
    %177 = arith.addf %175, %176 : vector<19x128xf32>
    %cst_216 = arith.constant 0.000000e+00 : f32
    %178 = vector.broadcast %cst_216 : f32 to vector<19x128xf32>
    %179 = arith.maximumf %177, %178 : vector<19x128xf32>
    %180 = arith.truncf %179 : vector<19x128xf32> to vector<19x128xbf16>
    %c2_217 = arith.constant 2 : index
    %c0_218 = arith.constant 0 : index
    %c0_219 = arith.constant 0 : index
    %181 = vector.load %arg4[%c2_217, %c0_218, %c0_219] : memref<4x20x128xbf16, #tpu.memory_space<vmem>>, vector<1x19x128xbf16>
    %182 = vector.shape_cast %181 : vector<1x19x128xbf16> to vector<19x128xbf16>
    %183 = vector.shape_cast %180 : vector<19x128xbf16> to vector<1x19x128xbf16>
    tpu.vector_store %arg4[%c2_217, %c0_218, %c0_219], %183 {strides = array<i32>} : memref<4x20x128xbf16, #tpu.memory_space<vmem>>, vector<1x19x128xbf16>,
    %c3_220 = arith.constant 3 : index
    %c0_221 = arith.constant 0 : index
    %c0_222 = arith.constant 0 : index
    %c0_223 = arith.constant 0 : index
    %184 = vector.load %arg1[%c3_220, %c0_221, %c0_222, %c0_223] : memref<4x4x25x128xbf16, #tpu.memory_space<vmem>>, vector<1x1x19x128xbf16>
    %185 = vector.shape_cast %184 : vector<1x1x19x128xbf16> to vector<19x128xbf16>
    %c0_224 = arith.constant 0 : index
    %c0_225 = arith.constant 0 : index
    %c0_226 = arith.constant 0 : index
    %186 = vector.load %arg2[%c0_224, %c0_225, %c0_226] : memref<9x128x128xbf16, #tpu.memory_space<vmem>>, vector<1x128x128xbf16>
    %187 = vector.shape_cast %186 : vector<1x128x128xbf16> to vector<128x128xbf16>
    %cst_227 = arith.constant dense<0.000000e+00> : vector<19x128xf32>
    %188 = tpu.matmul %185, %187, %cst_227 {dimension_numbers = #tpu.dot_dimension_numbers<[1], [0], [0], [1], [0, 0, 1, 1], [], []>} : vector<19x128xbf16>, vector<128x128xbf16>, vector<19x128xf32> -> vector<19x128xf32>
    %c3_228 = arith.constant 3 : index
    %c1_229 = arith.constant 1 : index
    %c0_230 = arith.constant 0 : index
    %c0_231 = arith.constant 0 : index
    %189 = vector.load %arg1[%c3_228, %c1_229, %c0_230, %c0_231] : memref<4x4x25x128xbf16, #tpu.memory_space<vmem>>, vector<1x1x19x128xbf16>
    %190 = vector.shape_cast %189 : vector<1x1x19x128xbf16> to vector<19x128xbf16>
    %c1_232 = arith.constant 1 : index
    %c0_233 = arith.constant 0 : index
    %c0_234 = arith.constant 0 : index
    %191 = vector.load %arg2[%c1_232, %c0_233, %c0_234] : memref<9x128x128xbf16, #tpu.memory_space<vmem>>, vector<1x128x128xbf16>
    %192 = vector.shape_cast %191 : vector<1x128x128xbf16> to vector<128x128xbf16>
    %cst_235 = arith.constant dense<0.000000e+00> : vector<19x128xf32>
    %193 = tpu.matmul %190, %192, %cst_235 {dimension_numbers = #tpu.dot_dimension_numbers<[1], [0], [0], [1], [0, 0, 1, 1], [], []>} : vector<19x128xbf16>, vector<128x128xbf16>, vector<19x128xf32> -> vector<19x128xf32>
    %194 = arith.addf %188, %193 : vector<19x128xf32>
    %c3_236 = arith.constant 3 : index
    %c0_237 = arith.constant 0 : index
    %c1_238 = arith.constant 1 : index
    %c0_239 = arith.constant 0 : index
    %195 = vector.load %arg1[%c3_236, %c0_237, %c1_238, %c0_239] : memref<4x4x25x128xbf16, #tpu.memory_space<vmem>>, vector<1x1x19x128xbf16>
    %196 = vector.shape_cast %195 : vector<1x1x19x128xbf16> to vector<19x128xbf16>
    %c2_240 = arith.constant 2 : index
    %c0_241 = arith.constant 0 : index
    %c0_242 = arith.constant 0 : index
    %197 = vector.load %arg2[%c2_240, %c0_241, %c0_242] : memref<9x128x128xbf16, #tpu.memory_space<vmem>>, vector<1x128x128xbf16>
    %198 = vector.shape_cast %197 : vector<1x128x128xbf16> to vector<128x128xbf16>
    %cst_243 = arith.constant dense<0.000000e+00> : vector<19x128xf32>
    %199 = tpu.matmul %196, %198, %cst_243 {dimension_numbers = #tpu.dot_dimension_numbers<[1], [0], [0], [1], [0, 0, 1, 1], [], []>} : vector<19x128xbf16>, vector<128x128xbf16>, vector<19x128xf32> -> vector<19x128xf32>
    %200 = arith.addf %194, %199 : vector<19x128xf32>
    %c3_244 = arith.constant 3 : index
    %c2_245 = arith.constant 2 : index
    %c0_246 = arith.constant 0 : index
    %c0_247 = arith.constant 0 : index
    %201 = vector.load %arg1[%c3_244, %c2_245, %c0_246, %c0_247] : memref<4x4x25x128xbf16, #tpu.memory_space<vmem>>, vector<1x1x19x128xbf16>
    %202 = vector.shape_cast %201 : vector<1x1x19x128xbf16> to vector<19x128xbf16>
    %c3_248 = arith.constant 3 : index
    %c0_249 = arith.constant 0 : index
    %c0_250 = arith.constant 0 : index
    %203 = vector.load %arg2[%c3_248, %c0_249, %c0_250] : memref<9x128x128xbf16, #tpu.memory_space<vmem>>, vector<1x128x128xbf16>
    %204 = vector.shape_cast %203 : vector<1x128x128xbf16> to vector<128x128xbf16>
    %cst_251 = arith.constant dense<0.000000e+00> : vector<19x128xf32>
    %205 = tpu.matmul %202, %204, %cst_251 {dimension_numbers = #tpu.dot_dimension_numbers<[1], [0], [0], [1], [0, 0, 1, 1], [], []>} : vector<19x128xbf16>, vector<128x128xbf16>, vector<19x128xf32> -> vector<19x128xf32>
    %206 = arith.addf %200, %205 : vector<19x128xf32>
    %c3_252 = arith.constant 3 : index
    %c3_253 = arith.constant 3 : index
    %c0_254 = arith.constant 0 : index
    %c0_255 = arith.constant 0 : index
    %207 = vector.load %arg1[%c3_252, %c3_253, %c0_254, %c0_255] : memref<4x4x25x128xbf16, #tpu.memory_space<vmem>>, vector<1x1x19x128xbf16>
    %208 = vector.shape_cast %207 : vector<1x1x19x128xbf16> to vector<19x128xbf16>
    %c4_256 = arith.constant 4 : index
    %c0_257 = arith.constant 0 : index
    %c0_258 = arith.constant 0 : index
    %209 = vector.load %arg2[%c4_256, %c0_257, %c0_258] : memref<9x128x128xbf16, #tpu.memory_space<vmem>>, vector<1x128x128xbf16>
    %210 = vector.shape_cast %209 : vector<1x128x128xbf16> to vector<128x128xbf16>
    %cst_259 = arith.constant dense<0.000000e+00> : vector<19x128xf32>
    %211 = tpu.matmul %208, %210, %cst_259 {dimension_numbers = #tpu.dot_dimension_numbers<[1], [0], [0], [1], [0, 0, 1, 1], [], []>} : vector<19x128xbf16>, vector<128x128xbf16>, vector<19x128xf32> -> vector<19x128xf32>
    %212 = arith.addf %206, %211 : vector<19x128xf32>
    %c3_260 = arith.constant 3 : index
    %c2_261 = arith.constant 2 : index
    %c1_262 = arith.constant 1 : index
    %c0_263 = arith.constant 0 : index
    %213 = vector.load %arg1[%c3_260, %c2_261, %c1_262, %c0_263] : memref<4x4x25x128xbf16, #tpu.memory_space<vmem>>, vector<1x1x19x128xbf16>
    %214 = vector.shape_cast %213 : vector<1x1x19x128xbf16> to vector<19x128xbf16>
    %c5_264 = arith.constant 5 : index
    %c0_265 = arith.constant 0 : index
    %c0_266 = arith.constant 0 : index
    %215 = vector.load %arg2[%c5_264, %c0_265, %c0_266] : memref<9x128x128xbf16, #tpu.memory_space<vmem>>, vector<1x128x128xbf16>
    %216 = vector.shape_cast %215 : vector<1x128x128xbf16> to vector<128x128xbf16>
    %cst_267 = arith.constant dense<0.000000e+00> : vector<19x128xf32>
    %217 = tpu.matmul %214, %216, %cst_267 {dimension_numbers = #tpu.dot_dimension_numbers<[1], [0], [0], [1], [0, 0, 1, 1], [], []>} : vector<19x128xbf16>, vector<128x128xbf16>, vector<19x128xf32> -> vector<19x128xf32>
    %218 = arith.addf %212, %217 : vector<19x128xf32>
    %c3_268 = arith.constant 3 : index
    %c0_269 = arith.constant 0 : index
    %c5_270 = arith.constant 5 : index
    %c0_271 = arith.constant 0 : index
    %219 = vector.load %arg1[%c3_268, %c0_269, %c5_270, %c0_271] : memref<4x4x25x128xbf16, #tpu.memory_space<vmem>>, vector<1x1x19x128xbf16>
    %220 = vector.shape_cast %219 : vector<1x1x19x128xbf16> to vector<19x128xbf16>
    %c6_272 = arith.constant 6 : index
    %c0_273 = arith.constant 0 : index
    %c0_274 = arith.constant 0 : index
    %221 = vector.load %arg2[%c6_272, %c0_273, %c0_274] : memref<9x128x128xbf16, #tpu.memory_space<vmem>>, vector<1x128x128xbf16>
    %222 = vector.shape_cast %221 : vector<1x128x128xbf16> to vector<128x128xbf16>
    %cst_275 = arith.constant dense<0.000000e+00> : vector<19x128xf32>
    %223 = tpu.matmul %220, %222, %cst_275 {dimension_numbers = #tpu.dot_dimension_numbers<[1], [0], [0], [1], [0, 0, 1, 1], [], []>} : vector<19x128xbf16>, vector<128x128xbf16>, vector<19x128xf32> -> vector<19x128xf32>
    %224 = arith.addf %218, %223 : vector<19x128xf32>
    %c3_276 = arith.constant 3 : index
    %c1_277 = arith.constant 1 : index
    %c5_278 = arith.constant 5 : index
    %c0_279 = arith.constant 0 : index
    %225 = vector.load %arg1[%c3_276, %c1_277, %c5_278, %c0_279] : memref<4x4x25x128xbf16, #tpu.memory_space<vmem>>, vector<1x1x19x128xbf16>
    %226 = vector.shape_cast %225 : vector<1x1x19x128xbf16> to vector<19x128xbf16>
    %c7_280 = arith.constant 7 : index
    %c0_281 = arith.constant 0 : index
    %c0_282 = arith.constant 0 : index
    %227 = vector.load %arg2[%c7_280, %c0_281, %c0_282] : memref<9x128x128xbf16, #tpu.memory_space<vmem>>, vector<1x128x128xbf16>
    %228 = vector.shape_cast %227 : vector<1x128x128xbf16> to vector<128x128xbf16>
    %cst_283 = arith.constant dense<0.000000e+00> : vector<19x128xf32>
    %229 = tpu.matmul %226, %228, %cst_283 {dimension_numbers = #tpu.dot_dimension_numbers<[1], [0], [0], [1], [0, 0, 1, 1], [], []>} : vector<19x128xbf16>, vector<128x128xbf16>, vector<19x128xf32> -> vector<19x128xf32>
    %230 = arith.addf %224, %229 : vector<19x128xf32>
    %c3_284 = arith.constant 3 : index
    %c0_285 = arith.constant 0 : index
    %c6_286 = arith.constant 6 : index
    %c0_287 = arith.constant 0 : index
    %231 = vector.load %arg1[%c3_284, %c0_285, %c6_286, %c0_287] : memref<4x4x25x128xbf16, #tpu.memory_space<vmem>>, vector<1x1x19x128xbf16>
    %232 = vector.shape_cast %231 : vector<1x1x19x128xbf16> to vector<19x128xbf16>
    %c8_288 = arith.constant 8 : index
    %c0_289 = arith.constant 0 : index
    %c0_290 = arith.constant 0 : index
    %233 = vector.load %arg2[%c8_288, %c0_289, %c0_290] : memref<9x128x128xbf16, #tpu.memory_space<vmem>>, vector<1x128x128xbf16>
    %234 = vector.shape_cast %233 : vector<1x128x128xbf16> to vector<128x128xbf16>
    %cst_291 = arith.constant dense<0.000000e+00> : vector<19x128xf32>
    %235 = tpu.matmul %232, %234, %cst_291 {dimension_numbers = #tpu.dot_dimension_numbers<[1], [0], [0], [1], [0, 0, 1, 1], [], []>} : vector<19x128xbf16>, vector<128x128xbf16>, vector<19x128xf32> -> vector<19x128xf32>
    %236 = arith.addf %230, %235 : vector<19x128xf32>
    %237 = vector.broadcast %0 : vector<1x128xf32> to vector<19x128xf32>
    %238 = arith.addf %236, %237 : vector<19x128xf32>
    %cst_292 = arith.constant 0.000000e+00 : f32
    %239 = vector.broadcast %cst_292 : f32 to vector<19x128xf32>
    %240 = arith.maximumf %238, %239 : vector<19x128xf32>
    %241 = arith.truncf %240 : vector<19x128xf32> to vector<19x128xbf16>
    %c3_293 = arith.constant 3 : index
    %c0_294 = arith.constant 0 : index
    %c0_295 = arith.constant 0 : index
    %242 = vector.load %arg4[%c3_293, %c0_294, %c0_295] : memref<4x20x128xbf16, #tpu.memory_space<vmem>>, vector<1x19x128xbf16>
    %243 = vector.shape_cast %242 : vector<1x19x128xbf16> to vector<19x128xbf16>
    %244 = vector.shape_cast %241 : vector<19x128xbf16> to vector<1x19x128xbf16>
    tpu.vector_store %arg4[%c3_293, %c0_294, %c0_295], %244 {strides = array<i32>} : memref<4x20x128xbf16, #tpu.memory_space<vmem>>, vector<1x19x128xbf16>,
    return
  }
  func.func @transform_0(%arg0: i32) -> (i32, i32, i32, i32) {
    %c0_i32 = arith.constant 0 : i32
    %c0_i32_0 = arith.constant 0 : i32
    %c0_i32_1 = arith.constant 0 : i32
    %c0_i32_2 = arith.constant 0 : i32
    return %arg0, %c0_i32, %c0_i32_0, %c0_i32_1 : i32, i32, i32, i32
  }
  func.func @transform_1(%arg0: i32) -> (i32, i32, i32) {
    %c0_i32 = arith.constant 0 : i32
    %c0_i32_0 = arith.constant 0 : i32
    %c0_i32_1 = arith.constant 0 : i32
    %c0_i32_2 = arith.constant 0 : i32
    return %c0_i32, %c0_i32_0, %c0_i32_1 : i32, i32, i32
  }
  func.func @transform_2(%arg0: i32) -> (i32, i32) {
    %c0_i32 = arith.constant 0 : i32
    %c0_i32_0 = arith.constant 0 : i32
    %c0_i32_1 = arith.constant 0 : i32
    return %c0_i32, %c0_i32_0 : i32, i32
  }
  func.func @transform_3(%arg0: i32) -> (i32, i32, i32) {
    %c0_i32 = arith.constant 0 : i32
    %c0_i32_0 = arith.constant 0 : i32
    %c0_i32_1 = arith.constant 0 : i32
    return %arg0, %c0_i32, %c0_i32_0 : i32, i32, i32
  }
}

module attributes {stable_mosaic.version = 11 : i64} {
  func.func @_conv3_sc_kernel(%arg0: i32, %arg1: memref<64x128xbf16, #tpu.memory_space<vmem>>, %arg2: memref<128x128xbf16, #tpu.memory_space<vmem>>, %arg3: memref<1x128xf32, #tpu.memory_space<vmem>>, %arg4: memref<64x128xbf16, #tpu.memory_space<vmem>>, %arg5: memref<128x128xbf16, #tpu.memory_space<vmem>>, %arg6: memref<64x128xbf16, #tpu.memory_space<vmem>>) attributes {dimension_semantics = [#tpu.dimension_semantics<parallel>], iteration_bounds = array<i64: 1>, scalar_prefetch = 0 : i64, scratch_operands = 0 : i64, tpu.core_type = #tpu.core_type<tc>, window_params = [{transform_indices = @transform_0, window_bounds = array<i64: 64, 128>}, {pipeline_mode = #tpu.pipeline_mode<synchronous>, transform_indices = @transform_1, window_bounds = array<i64: 128, 128>}, {pipeline_mode = #tpu.pipeline_mode<synchronous>, transform_indices = @transform_2, window_bounds = array<i64: 1, 128>}, {transform_indices = @transform_3, window_bounds = array<i64: 64, 128>}, {pipeline_mode = #tpu.pipeline_mode<synchronous>, transform_indices = @transform_4, window_bounds = array<i64: 128, 128>}, {transform_indices = @transform_5, window_bounds = array<i64: 64, 128>}]} {
    %c0 = arith.constant 0 : index
    %c0_0 = arith.constant 0 : index
    %0 = vector.load %arg1[%c0, %c0_0] : memref<64x128xbf16, #tpu.memory_space<vmem>>, vector<64x128xbf16>
    %c0_1 = arith.constant 0 : index
    %c0_2 = arith.constant 0 : index
    %1 = vector.load %arg2[%c0_1, %c0_2] : memref<128x128xbf16, #tpu.memory_space<vmem>>, vector<128x128xbf16>
    %cst = arith.constant dense<0.000000e+00> : vector<64x128xf32>
    %2 = tpu.matmul %0, %1, %cst {dimension_numbers = #tpu.dot_dimension_numbers<[1], [0], [0], [1], [0, 0, 1, 1], [], []>} : vector<64x128xbf16>, vector<128x128xbf16>, vector<64x128xf32> -> vector<64x128xf32>
    %c0_3 = arith.constant 0 : index
    %c0_4 = arith.constant 0 : index
    %3 = vector.load %arg4[%c0_3, %c0_4] : memref<64x128xbf16, #tpu.memory_space<vmem>>, vector<64x128xbf16>
    %c0_5 = arith.constant 0 : index
    %c0_6 = arith.constant 0 : index
    %4 = vector.load %arg5[%c0_5, %c0_6] : memref<128x128xbf16, #tpu.memory_space<vmem>>, vector<128x128xbf16>
    %cst_7 = arith.constant dense<0.000000e+00> : vector<64x128xf32>
    %5 = tpu.matmul %3, %4, %cst_7 {dimension_numbers = #tpu.dot_dimension_numbers<[1], [0], [0], [1], [0, 0, 1, 1], [], []>} : vector<64x128xbf16>, vector<128x128xbf16>, vector<64x128xf32> -> vector<64x128xf32>
    %6 = arith.addf %2, %5 : vector<64x128xf32>
    %c0_8 = arith.constant 0 : index
    %c0_9 = arith.constant 0 : index
    %7 = vector.load %arg3[%c0_8, %c0_9] : memref<1x128xf32, #tpu.memory_space<vmem>>, vector<1x128xf32>
    %8 = vector.broadcast %7 : vector<1x128xf32> to vector<64x128xf32>
    %9 = arith.addf %6, %8 : vector<64x128xf32>
    %cst_10 = arith.constant 0.000000e+00 : f32
    %10 = vector.broadcast %cst_10 : f32 to vector<64x128xf32>
    %11 = arith.maximumf %9, %10 : vector<64x128xf32>
    %12 = arith.truncf %11 : vector<64x128xf32> to vector<64x128xbf16>
    %c0_11 = arith.constant 0 : index
    %c0_12 = arith.constant 0 : index
    %13 = vector.load %arg6[%c0_11, %c0_12] : memref<64x128xbf16, #tpu.memory_space<vmem>>, vector<64x128xbf16>
    tpu.vector_store %arg6[%c0_11, %c0_12], %12 {strides = array<i32>} : memref<64x128xbf16, #tpu.memory_space<vmem>>, vector<64x128xbf16>,
    return
  }
  func.func @transform_0(%arg0: i32) -> (i32, i32) {
    %c0_i32 = arith.constant 0 : i32
    %c0_i32_0 = arith.constant 0 : i32
    return %arg0, %c0_i32 : i32, i32
  }
  func.func @transform_1(%arg0: i32) -> (i32, i32) {
    %c0_i32 = arith.constant 0 : i32
    %c0_i32_0 = arith.constant 0 : i32
    %c0_i32_1 = arith.constant 0 : i32
    return %c0_i32, %c0_i32_0 : i32, i32
  }
  func.func @transform_2(%arg0: i32) -> (i32, i32) {
    %c0_i32 = arith.constant 0 : i32
    %c0_i32_0 = arith.constant 0 : i32
    %c0_i32_1 = arith.constant 0 : i32
    return %c0_i32, %c0_i32_0 : i32, i32
  }
  func.func @transform_3(%arg0: i32) -> (i32, i32) {
    %c0_i32 = arith.constant 0 : i32
    %c0_i32_0 = arith.constant 0 : i32
    return %arg0, %c0_i32 : i32, i32
  }
  func.func @transform_4(%arg0: i32) -> (i32, i32) {
    %c0_i32 = arith.constant 0 : i32
    %c0_i32_0 = arith.constant 0 : i32
    %c0_i32_1 = arith.constant 0 : i32
    return %c0_i32, %c0_i32_0 : i32, i32
  }
  func.func @transform_5(%arg0: i32) -> (i32, i32) {
    %c0_i32 = arith.constant 0 : i32
    %c0_i32_0 = arith.constant 0 : i32
    return %arg0, %c0_i32 : i32, i32
  }
}

</mosaic_0001>

<bundles_post_ra>
// kernel: bottleneck_forward.3
= control target key start
LH: loop header
LB: loop body
LE: loop exit
PB: predicated region body
PF: predicated region fallthrough
CT: control target
= control target key end

     0   :  { %s2902_s0 = inlined_call_operand.vmem [shape: bf16[2,6,64,128], index: 0, kind: input, shape index: {}, may-alias: {0,1,2}]   ;;  %s2903_s1 = inlined_call_operand.vmem [shape: bf16[2,6,64,128], index: 1, kind: input, shape index: {}, may-alias: {0,1,2}]   ;;  %s2904_s2 = inlined_call_operand.vmem [shape: bf16[2,6,64,128], index: 2, kind: input, shape index: {}, may-alias: {0,1,2}]   ;;  %s2905_s3 = inlined_call_operand.vmem [shape: bf16[3,128,128], index: 3, kind: input, shape index: {}]   ;;  %s2906_s4 = inlined_call_operand.vmem [shape: f32[1,128], index: 4, kind: input, shape index: {}]   ;;  %s2907_s5 = inlined_call_operand.vmem [shape: bf16[2,2,64,128], index: 5, kind: output, shape index: {}]  }
   0x1   :  { %2908 = sst [smem:[#allocation8_spill]] %s2907_s5 }
   0x2   :  { %s2492_s18 = smov 0   ;;  %s2494_s19 = smov 0  }
   0x3   :  { %s2496_s20 = smov 0   ;;  %s2498_s21 = smov 0  }
   0x4   :  { %s2500_s22 = smov 0   ;;  %s2502_s23 = smov 0  }
   0x5   :  { %s2504_s24 = smov 0   ;;  %s2506_s25 = smov 0  }
   0x6   :  { %s2508_s26 = smov 0   ;;  %s2510_s27 = smov 0  }
   0x7   :  { %s2512_s28 = smov 0  }
   0x8 LB: > { %2909 = sst [smem:[#allocation6_spill]] %s2452_s26  ;;  %s24_s30 = sadd.s32 1, %s2456_s27  ;;  %s2460_s28 = sphi %s2512_s28, %s15_s28   ;;  %s2456_s27 = sphi %s2510_s27, %s2928_s27   ;;  %s2452_s26 = sphi %s2508_s26, %s2927_s26   ;;  %s2448_s25 = sphi %s2506_s25, %s2926_s25   ;;  %s2444_s24 = sphi %s2504_s24, %s2925_s24   ;;  %s2440_s23 = sphi %s2502_s23, %s2924_s23   ;;  %s2436_s22 = sphi %s2500_s22, %s2923_s22   ;;  %s2432_s21 = sphi %s2498_s21, %s2922_s21   ;;  %s2428_s20 = sphi %s2496_s20, %s2921_s20   ;;  %s2424_s19 = sphi %s2494_s19, %s2920_s19   ;;  %s2420_s18 = sphi %s2492_s18, %s2919_s18  }
   0x9   : > { %p25_p0 = scmp.ge.s32.totalorder %s24_s30, 2  ;;  %s1697_s6 = sshll.u32 %s2456_s27, 1 }
   0xa   : > { %s38_s7 = sadd.s32 1, %s2448_s25  ;;  %p45_p1 = scmp.ne.s32.totalorder %s2448_s25, %s2444_s24 }
   0xb   : > { %s2930_s30 = smov (%p25_p0, %s24_s30), 0  ;;  %p46_p2 = scmp.eq.s32.totalorder %s2460_s28, 0 }
   0xc   : > { %s62_s8 = sadd.s32 1, %s1697_s6  ;;  %s1698_s9 = sshll.u32 %s2930_s30, 1 }
   0xd   : > { %s70_s10 = sadd.s32 1, %s2440_s23  ;;  %s34_s11 = ssub.s32 %s1697_s6, %s1698_s9 }
   0xe   : > { %p2560_p3 = por %p46_p2, %p45_p1  ;;  %p36_p4 = scmp.eq.s32.totalorder %s34_s11, 0 }
   0xf   : > { %s64_s13 = sadd.s32 1, %s1698_s9  ;;  %p77_p5 = scmp.ne.s32.totalorder %s2440_s23, %s2436_s22 }
  0x10   : > { %s66_s14 = ssub.s32 %s62_s8, %s64_s13  ;;  %s94_s17 = sadd.s32 2, %s1697_s6 }
  0x11   : > { %s2567_s15 = scalar_select %p36_p4, %s2448_s25, %s38_s7  }
  0x12   : > { %p68_p6 = scmp.eq.s32.totalorder %s66_s14, 0  ;;  %p2571_p7 = por %p77_p5, %p46_p2 }
  0x13   : > { %2911 = sst [smem:[#allocation7_spill]] %s2567_s15  ;;  %s96_s29 = sadd.s32 2, %s1698_s9 }
  0x14   : > { %s2576_s11 = scalar_select %p68_p6, %s2440_s23, %s70_s10  }
  0x15   : > { %s98_s5 = ssub.s32 %s94_s17, %s96_s29  ;;  %s102_s26 = sadd.s32 1, %s2432_s21 }
  0x16   : > { %p100_p8 = scmp.eq.s32.totalorder %s98_s5, 0  ;;  %p109_p9 = scmp.ne.s32.totalorder %s2432_s21, %s2428_s20 }
  0x17   : > { %s168_s8 = ssub.s32 %s2456_s27, %s2930_s30  ;;  %s172_s13 = sadd.s32 1, %s2424_s19 }
  0x18   : > { %s2585_s7 = scalar_select %p100_p8, %s2432_s21, %s102_s26  }
  0x19   : > { %p2589_p10 = por %p109_p9, %p46_p2  ;;  %p170_p11 = scmp.eq.s32.totalorder %s168_s8, 0 }
  0x1a   : > { %p182_p12 = scmp.ne.s32.totalorder %s2424_s19, %s2420_s18  ;;  %s2914_s15 = sadd.s32 4294967295, %s2460_s28  }
  0x1b   : > { %p183_p13 = scmp.eq.s32.totalorder %s2914_s15, 1  ;;  %p1704_p1 = scmp.ge.s32.totalorder %s2460_s28, 2 }
  0x1c   : > { %s2598_s6 = scalar_select %p170_p11, %s2424_s19, %s172_s13  }
  0x1d   : > { %p2600_p0 = por %p183_p13, %p182_p12  ;;  %211 = sbr.rel (%p1704_p1) target bundleno = 70 (0x46), region = 24 }
  0x22   : > { %214 = sbr.rel (!%p2560_p3) target bundleno = 46 (0x2e), region = 28  ;;  %s216_s5 = sand.u32 (%p2560_p3), 1, %s2448_s25  }
  0x23   : > { %s2144_s26 = sshll.u32 (%p2560_p3), %s2456_s27, 6  ;;  %s1705_s9 = sshll.u32 (%p2560_p3), %s216_s5, 6 }
  0x24   : > { %s225_s15 = scalar_lea.vmem (%p2560_p3), %s2902_s0, %s2144_s26  ;;  %s218_s8 = scalar_lea.vmem (%p2560_p3), [#allocation2], %s1705_s9 }
  0x25   : > { %v242_v0 = vld [vmem:[%s225_s15] sm:$0xff] (%p2560_p3)   ;;  %v246_v1 = vld [vmem:[%s225_s15 + $0x8] sm:$0xff] (%p2560_p3)   ;;  %v250_v2 = vld [vmem:[%s225_s15 + $0x10] sm:$0xff] (%p2560_p3)  }
  0x26   : > { %243 = vst [vmem:[%s218_s8] sm:$0xff] (%p2560_p3), %v242_v0   ;;  %v254_v3 = vld [vmem:[%s225_s15 + $0x18] sm:$0xff] (%p2560_p3)   ;;  %v258_v4 = vld [vmem:[%s225_s15 + $0xc0] sm:$0xff] (%p2560_p3)   ;;  %v262_v5 = vld [vmem:[%s225_s15 + $0xc8] sm:$0xff] (%p2560_p3)  }
  0x27   : > { %247 = vst [vmem:[%s218_s8 + $0x8] sm:$0xff] %v246_v1   ;;  %v266_v6 = vld [vmem:[%s225_s15 + $0xd0] sm:$0xff]   ;;  %v270_v7 = vld [vmem:[%s225_s15 + $0xd8] sm:$0xff]  }
  0x28   : > { %251 = vst [vmem:[%s218_s8 + $0x10] sm:$0xff] %v250_v2  }
  0x29   : > { %255 = vst [vmem:[%s218_s8 + $0x18] sm:$0xff] %v254_v3  }
  0x2a   : > { %259 = vst [vmem:[%s218_s8 + $0x20] sm:$0xff] %v258_v4  }
  0x2b   : > { %263 = vst [vmem:[%s218_s8 + $0x28] sm:$0xff] %v262_v5  }
  0x2c   : > { %267 = vst [vmem:[%s218_s8 + $0x30] sm:$0xff] %v266_v6  }
  0x2d   : > { %271 = vst [vmem:[%s218_s8 + $0x38] sm:$0xff] %v270_v7  }
  0x2e PF: > { %329 = sbr.rel (!%p2571_p7) target bundleno = 58 (0x3a), region = 69  ;;  %s331_s12 = sand.u32 (%p2571_p7), 1, %s2440_s23  }
  0x2f   : > { %s2146_s13 = sshll.u32 (%p2571_p7), %s2456_s27, 6  ;;  %s1709_s5 = sshll.u32 (%p2571_p7), %s331_s12, 6 }
  0x30   : > { %s1604_s10 = scalar_lea.vmem (%p2571_p7), %s2903_s1, %s2146_s13  ;;  %s333_s17 = scalar_lea.vmem (%p2571_p7), [#allocation3], %s1709_s5 }
  0x31   : > { %v1713_v8 = vld [vmem:[%s1604_s10 + $0x20] sm:$0xff] (%p2571_p7)   ;;  %v1715_v9 = vld [vmem:[%s1604_s10 + $0x28] sm:$0xff] (%p2571_p7)   ;;  %v1717_v10 = vld [vmem:[%s1604_s10 + $0x30] sm:$0xff] (%p2571_p7)  }
  0x32   : > { %359 = vst [vmem:[%s333_s17] sm:$0xff] (%p2571_p7), %v1713_v8   ;;  %v1719_v11 = vld [vmem:[%s1604_s10 + $0x38] sm:$0xff] (%p2571_p7)   ;;  %v1721_v12 = vld [vmem:[%s1604_s10 + $0xe0] sm:$0xff] (%p2571_p7)   ;;  %v1723_v13 = vld [vmem:[%s1604_s10 + $0xe8] sm:$0xff] (%p2571_p7)  }
  0x33   : > { %363 = vst [vmem:[%s333_s17 + $0x8] sm:$0xff] %v1715_v9   ;;  %v1725_v14 = vld [vmem:[%s1604_s10 + $0xf0] sm:$0xff]   ;;  %v1727_v15 = vld [vmem:[%s1604_s10 + $0xf8] sm:$0xff]  }
  0x34   : > { %367 = vst [vmem:[%s333_s17 + $0x10] sm:$0xff] %v1717_v10  }
  0x35   : > { %371 = vst [vmem:[%s333_s17 + $0x18] sm:$0xff] %v1719_v11  }
  0x36   : > { %375 = vst [vmem:[%s333_s17 + $0x20] sm:$0xff] %v1721_v12  }
  0x37   : > { %379 = vst [vmem:[%s333_s17 + $0x28] sm:$0xff] %v1723_v13  }
  0x38   : > { %383 = vst [vmem:[%s333_s17 + $0x30] sm:$0xff] %v1725_v14  }
  0x39   : > { %387 = vst [vmem:[%s333_s17 + $0x38] sm:$0xff] %v1727_v15  }
  0x3a PF: > { %445 = sbr.rel (!%p2589_p10) target bundleno = 70 (0x46), region = 110  ;;  %s447_s16 = sand.u32 (%p2589_p10), 1, %s2432_s21  }
  0x3b   : > { %s2148_s15 = sshll.u32 (%p2589_p10), %s2456_s27, 6  ;;  %s1729_s8 = sshll.u32 (%p2589_p10), %s447_s16, 6 }
  0x3c   : > { %s1613_s5 = scalar_lea.vmem (%p2589_p10), %s2904_s2, %s2148_s15  ;;  %s449_s26 = scalar_lea.vmem (%p2589_p10), [#allocation4], %s1729_s8 }
  0x3d   : > { %v1733_v16 = vld [vmem:[%s1613_s5 + $0x40] sm:$0xff] (%p2589_p10)   ;;  %v1735_v17 = vld [vmem:[%s1613_s5 + $0x48] sm:$0xff] (%p2589_p10)   ;;  %v1737_v18 = vld [vmem:[%s1613_s5 + $0x50] sm:$0xff] (%p2589_p10)  }
  0x3e   : > { %475 = vst [vmem:[%s449_s26] sm:$0xff] (%p2589_p10), %v1733_v16   ;;  %v1739_v19 = vld [vmem:[%s1613_s5 + $0x58] sm:$0xff] (%p2589_p10)   ;;  %v1741_v20 = vld [vmem:[%s1613_s5 + $0x100] sm:$0xff] (%p2589_p10)   ;;  %v1743_v21 = vld [vmem:[%s1613_s5 + $0x108] sm:$0xff] (%p2589_p10)  }
  0x3f   : > { %479 = vst [vmem:[%s449_s26 + $0x8] sm:$0xff] %v1735_v17   ;;  %v1745_v22 = vld [vmem:[%s1613_s5 + $0x110] sm:$0xff]   ;;  %v1747_v23 = vld [vmem:[%s1613_s5 + $0x118] sm:$0xff]  }
  0x40   : > { %483 = vst [vmem:[%s449_s26 + $0x10] sm:$0xff] %v1737_v18  }
  0x41   : > { %487 = vst [vmem:[%s449_s26 + $0x18] sm:$0xff] %v1739_v19  }
  0x42   : > { %491 = vst [vmem:[%s449_s26 + $0x20] sm:$0xff] %v1741_v20  }
  0x43   : > { %495 = vst [vmem:[%s449_s26 + $0x28] sm:$0xff] %v1743_v21  }
  0x44   : > { %499 = vst [vmem:[%s449_s26 + $0x30] sm:$0xff] %v1745_v22  }
  0x45   : > { %503 = vst [vmem:[%s449_s26 + $0x38] sm:$0xff] %v1747_v23  }
  0x46 PF: > { %p1749_p2 = scmp.ge.s32.totalorder %s2460_s28, 1  ;;  %p560_p3 = scmp.lt.s32.totalorder %s2460_s28, 3 }
  0x48   : > { %p561_p4 = pnand %p1749_p2, %p560_p3 }
  0x49   : > { %s574_s10 = sand.u32 (!%p561_p4), 1, %s2436_s22   ;;  %s567_s17 = sand.u32 (!%p561_p4), 1, %s2444_s24  }
  0x4a   : > { %564 = sbr.rel (%p561_p4) target bundleno = 353 (0x161), region = 151  ;;  %s1751_s13 = sshll.u32 (!%p561_p4), %s574_s10, 6 }
  0x4b   : > { %s1750_s5 = sshll.u32 (!%p561_p4), %s567_s17, 6  ;;  %s2684_s10 = scalar_lea.vmem (!%p561_p4), [#allocation3], %s1751_s13 }
  0x4c   : > { %s2688_s17 = scalar_lea.vmem (!%p561_p4), [#allocation2], %s1750_s5  ;;  %s581_s22 = sand.u32 (!%p561_p4), 1, %s2428_s20  }
  0x4d   : > { %s1752_s15 = sshll.u32 (!%p561_p4), %s581_s22, 6  ;;  %s612_s9 = sand.u32 (!%p561_p4), 1, %s2420_s18  }
  0x4e   : > { %s2787_s22 = scalar_lea.vmem (!%p561_p4), [#allocation4], %s1752_s15  ;;  %s1753_s16 = sshll.u32 (!%p561_p4), %s612_s9, 6 }
  0x4f   : > { %v2172_v24 = vld [vmem:[%s2905_s3 + $0x78] sm:$0xff]  ;;  %v2171_v26 = vld [vmem:[%s2905_s3 + $0x70] sm:$0xff]  ;;  %v2170_v28 = vld [vmem:[%s2905_s3 + $0x68] sm:$0xff]  ;;  %s2827_s18 = scalar_lea.vmem [#allocation5], %s1753_s16  ;;  %s2916_s15 = sld [smem:[#allocation6_spill]] (%p2600_p0) }
  0x50   : > { %v2160_v25 = vld [vmem:[%s2905_s3 + $0x38] sm:$0xff]  ;;  %746 = vmatpush.bf16.msra.mxu0 %v2172_v24  ;;  %2269 = vmatpush.bf16.msra.mxu2 %v2172_v24  ;;  %v2159_v27 = vld [vmem:[%s2905_s3 + $0x30] sm:$0xff]  ;;  %v2158_v29 = vld [vmem:[%s2905_s3 + $0x28] sm:$0xff]  ;;  %s2917_s26 = sld [smem:[#allocation8_spill]] (%p2600_p0) }
  0x51   : > { %847 = vmatpush.bf16.msra.mxu1 %v2160_v25  ;;  %2277 = vmatpush.bf16.msra.mxu3 %v2160_v25  ;;  %v2169_v30 = vld [vmem:[%s2905_s3 + $0x60] sm:$0xff]  ;;  %v2168_v32 = vld [vmem:[%s2905_s3 + $0x58] sm:$0xff]  ;;  %v2167_v34 = vld [vmem:[%s2905_s3 + $0x50] sm:$0xff] }
  0x52   : > { %v2157_v31 = vld [vmem:[%s2905_s3 + $0x20] sm:$0xff]  ;;  %v2156_v33 = vld [vmem:[%s2905_s3 + $0x18] sm:$0xff]  ;;  %v2155_v35 = vld [vmem:[%s2905_s3 + $0x10] sm:$0xff] }
  0x53   : > { %v2166_v36 = vld [vmem:[%s2905_s3 + $0x48] sm:$0xff]  ;;  %v2165_v38 = vld [vmem:[%s2905_s3 + $0x40] sm:$0xff]  ;;  %v2208_v40 = vld [vmem:[%s2905_s3 + $0x78] sm:$0xff] }
  0x54   : > { %747 = vmatpush.bf16.msra.mxu0 %v2171_v26  ;;  %2270 = vmatpush.bf16.msra.mxu2 %v2171_v26  ;;  %v2154_v37 = vld [vmem:[%s2905_s3 + $0x8] sm:$0xff]  ;;  %v2153_v39 = vld [vmem:[%s2905_s3] sm:$0xff]  ;;  %v2184_v41 = vld [vmem:[%s2905_s3 + $0xb8] sm:$0xff] }
  0x55   : > { %848 = vmatpush.bf16.msra.mxu1 %v2159_v27  ;;  %2278 = vmatpush.bf16.msra.mxu3 %v2159_v27  ;;  %v2161_v42 = vld [vmem:[%s2684_s10] sm:$0xff]  ;;  %v2163_v43 = vld [vmem:[%s2684_s10 + $0x10] sm:$0xff]  ;;  %v2196_v46 = vld [vmem:[%s2905_s3 + $0x38] sm:$0xff]  ;;  %s2221_s8 = sshll.u32 (%p2600_p0), %s2916_s15, 5 }
  0x56   : > { %v2149_v44 = vld [vmem:[%s2688_s17] sm:$0xff]  ;;  %v2151_v45 = vld [vmem:[%s2688_s17 + $0x10] sm:$0xff]  ;;  %v2220_v47 = vld [vmem:[%s2905_s3 + $0xb8] sm:$0xff]  ;;  %s1476_s13 = scalar_lea.vmem (%p2600_p0), %s2917_s26, %s2221_s8 }
  0x57   : > { %v2207_v48 = vld [vmem:[%s2905_s3 + $0x70] sm:$0xff]  ;;  %v2206_v52 = vld [vmem:[%s2905_s3 + $0x68] sm:$0xff]  ;;  %v2205_v56 = vld [vmem:[%s2905_s3 + $0x60] sm:$0xff] }
  0x58   : > { %748 = vmatpush.bf16.msra.mxu0 %v2170_v28  ;;  %2271 = vmatpush.bf16.msra.mxu2 %v2170_v28  ;;  %v2183_v49 = vld [vmem:[%s2905_s3 + $0xb0] sm:$0xff]  ;;  %v2182_v53 = vld [vmem:[%s2905_s3 + $0xa8] sm:$0xff]  ;;  %v2181_v57 = vld [vmem:[%s2905_s3 + $0xa0] sm:$0xff] }
  0x59   : > { %849 = vmatpush.bf16.msra.mxu1 %v2158_v29  ;;  %2279 = vmatpush.bf16.msra.mxu3 %v2158_v29  ;;  %v2195_v50 = vld [vmem:[%s2905_s3 + $0x30] sm:$0xff]  ;;  %v2194_v54 = vld [vmem:[%s2905_s3 + $0x28] sm:$0xff]  ;;  %v2193_v58 = vld [vmem:[%s2905_s3 + $0x20] sm:$0xff] }
  0x5a   : > { %v2219_v51 = vld [vmem:[%s2905_s3 + $0xb0] sm:$0xff]  ;;  %v2218_v55 = vld [vmem:[%s2905_s3 + $0xa8] sm:$0xff]  ;;  %v2217_v59 = vld [vmem:[%s2905_s3 + $0xa0] sm:$0xff] }
  0x5b   : > { %v2204_v60 = vld [vmem:[%s2905_s3 + $0x58] sm:$0xff]  ;;  %v2162_v62 = vld [vmem:[%s2684_s10 + $0x8] sm:$0xff]  ;;  %v2203_v4 = vld [vmem:[%s2905_s3 + $0x50] sm:$0xff] }
  0x5c   : > { %749 = vmatpush.bf16.msra.mxu0 %v2169_v30  ;;  %2272 = vmatpush.bf16.msra.mxu2 %v2169_v30  ;;  %v2180_v61 = vld [vmem:[%s2905_s3 + $0x98] sm:$0xff]  ;;  %v2150_v0 = vld [vmem:[%s2688_s17 + $0x8] sm:$0xff]  ;;  %v2179_v5 = vld [vmem:[%s2905_s3 + $0x90] sm:$0xff] }
  0x5d   : > { %850 = vmatpush.bf16.msra.mxu1 %v2157_v31  ;;  %2280 = vmatpush.bf16.msra.mxu3 %v2157_v31  ;;  %v2164_v63 = vld [vmem:[%s2684_s10 + $0x18] sm:$0xff]  ;;  %v2191_v6 = vld [vmem:[%s2905_s3 + $0x10] sm:$0xff]  ;;  %v2202_v8 = vld [vmem:[%s2905_s3 + $0x48] sm:$0xff] }
  0x5e   : > { %v2152_v1 = vld [vmem:[%s2688_s17 + $0x18] sm:$0xff]  ;;  %v2215_v7 = vld [vmem:[%s2905_s3 + $0x90] sm:$0xff]  ;;  %v2178_v9 = vld [vmem:[%s2905_s3 + $0x88] sm:$0xff] }
  0x5f   : > { %v2192_v2 = vld [vmem:[%s2905_s3 + $0x18] sm:$0xff]  ;;  %v2190_v10 = vld [vmem:[%s2905_s3 + $0x8] sm:$0xff]  ;;  %v2201_v12 = vld [vmem:[%s2905_s3 + $0x40] sm:$0xff] }
  0x60   : > { %750 = vmatpush.bf16.msra.mxu0 %v2168_v32  ;;  %2273 = vmatpush.bf16.msra.mxu2 %v2168_v32  ;;  %v2216_v3 = vld [vmem:[%s2905_s3 + $0x98] sm:$0xff]  ;;  %v2214_v11 = vld [vmem:[%s2905_s3 + $0x88] sm:$0xff]  ;;  %v2177_v13 = vld [vmem:[%s2905_s3 + $0x80] sm:$0xff] }
  0x61   : > { %851 = vmatpush.bf16.msra.mxu1 %v2156_v33  ;;  %2281 = vmatpush.bf16.msra.mxu3 %v2156_v33  ;;  %v2189_v14 = vld [vmem:[%s2905_s3] sm:$0xff]  ;;  %v2174_v20 = vld [vmem:[%s2787_s22 + $0x8] sm:$0xff]  ;;  %v2175_v24 = vld [vmem:[%s2787_s22 + $0x10] sm:$0xff] }
  0x62   : > { %v2213_v15 = vld [vmem:[%s2905_s3 + $0x80] sm:$0xff]  ;;  %v2198_v21 = vld [vmem:[%s2684_s10 + $0x28] sm:$0xff]  ;;  %v2199_v25 = vld [vmem:[%s2684_s10 + $0x30] sm:$0xff] }
  0x63   : > { %v2173_v16 = vld [vmem:[%s2787_s22] sm:$0xff]  ;;  %v2186_v22 = vld [vmem:[%s2688_s17 + $0x28] sm:$0xff]  ;;  %v2187_v26 = vld [vmem:[%s2688_s17 + $0x30] sm:$0xff] }
  0x64   : > { %751 = vmatpush.bf16.msra.mxu0 %v2167_v34  ;;  %2274 = vmatpush.bf16.msra.mxu2 %v2167_v34  ;;  %v2197_v17 = vld [vmem:[%s2684_s10 + $0x20] sm:$0xff]  ;;  %v2210_v23 = vld [vmem:[%s2787_s22 + $0x28] sm:$0xff]  ;;  %v2211_v27 = vld [vmem:[%s2787_s22 + $0x30] sm:$0xff] }
  0x65   : > { %852 = vmatpush.bf16.msra.mxu1 %v2155_v35  ;;  %2282 = vmatpush.bf16.msra.mxu3 %v2155_v35  ;;  %v2185_v18 = vld [vmem:[%s2688_s17 + $0x20] sm:$0xff]  ;;  %v2176_v28 = vld [vmem:[%s2787_s22 + $0x18] sm:$0xff] }
  0x66   : > { %v2209_v19 = vld [vmem:[%s2787_s22 + $0x20] sm:$0xff]  ;;  %v2200_v29 = vld [vmem:[%s2684_s10 + $0x38] sm:$0xff] }
  0x67   : > { %v2188_v30 = vld [vmem:[%s2688_s17 + $0x38] sm:$0xff] }
  0x68   : > { %752 = vmatpush.bf16.msra.mxu0 %v2166_v36  ;;  %2275 = vmatpush.bf16.msra.mxu2 %v2166_v36  ;;  %v2212_v31 = vld [vmem:[%s2787_s22 + $0x38] sm:$0xff] }
  0x69   : > { %853 = vmatpush.bf16.msra.mxu1 %v2154_v37  ;;  %2283 = vmatpush.bf16.msra.mxu3 %v2154_v37 }
  0x6c   : > { %753 = vmatpush.bf16.msra.mxu0 %v2165_v38  ;;  %2276 = vmatpush.bf16.msra.mxu2 %v2165_v38 }
  0x6d   : > { %854 = vmatpush.bf16.msra.mxu1 %v2153_v39  ;;  %2284 = vmatpush.bf16.msra.mxu3 %v2153_v39 }
  0x6f   : > { %754 = vmatmul.bf16.vlgmr.msra.gmra.mxu0 %v2161_v42  ;;  %764 = vmatmul.bf16.vlgmr.msra.gmra.mxu2 %v2163_v43 }
  0x70   : > { %973 = vmatpush.bf16.msrb.mxu2 %v2184_v41  ;;  %855 = vmatmul.bf16.vlgmr.msra.gmra.mxu1 %v2149_v44 }
  0x71   : > { %1167 = vmatpush.bf16.msrb.mxu3 %v2208_v40  ;;  %1268 = vmatpush.bf16.msrb.mxu0 %v2196_v46 }
  0x72   : > { %865 = vmatmul.bf16.vlgmr.msra.gmra.mxu3 %v2151_v45  ;;  %1394 = vmatpush.bf16.msrb.mxu1 %v2220_v47 }
  0x74   : > { %974 = vmatpush.bf16.msrb.mxu2 %v2183_v49 }
  0x75   : > { %1168 = vmatpush.bf16.msrb.mxu3 %v2207_v48  ;;  %1269 = vmatpush.bf16.msrb.mxu0 %v2195_v50 }
  0x76   : > { %1395 = vmatpush.bf16.msrb.mxu1 %v2219_v51 }
  0x78   : > { %975 = vmatpush.bf16.msrb.mxu2 %v2182_v53 }
  0x79   : > { %1169 = vmatpush.bf16.msrb.mxu3 %v2206_v52  ;;  %1270 = vmatpush.bf16.msrb.mxu0 %v2194_v54 }
  0x7a   : > { %1396 = vmatpush.bf16.msrb.mxu1 %v2218_v55 }
  0x7c   : > { %976 = vmatpush.bf16.msrb.mxu2 %v2181_v57 }
  0x7d   : > { %1170 = vmatpush.bf16.msrb.mxu3 %v2205_v56  ;;  %1271 = vmatpush.bf16.msrb.mxu0 %v2193_v58 }
  0x7e   : > { %1397 = vmatpush.bf16.msrb.mxu1 %v2217_v59  ;;  %v2820_v59 = vld [vmem:[%s2906_s4] ss:$0 sm:$0xff] }
  0x7f   : > { %759 = vmatmul.bf16.gmra.mxu0 %v2162_v62  ;;  %769 = vmatmul.bf16.gmra.mxu2 %v2164_v63 }
  0x80   : > { %977 = vmatpush.bf16.msrb.mxu2 %v2180_v61  ;;  %860 = vmatmul.bf16.gmra.mxu1 %v2150_v0 }
  0x81   : > { %1171 = vmatpush.bf16.msrb.mxu3 %v2204_v60  ;;  %1272 = vmatpush.bf16.msrb.mxu0 %v2192_v2 }
  0x82   : > { %870 = vmatmul.bf16.gmra.mxu3 %v2152_v1  ;;  %1398 = vmatpush.bf16.msrb.mxu1 %v2216_v3 }
  0x84   : > { %978 = vmatpush.bf16.msrb.mxu2 %v2179_v5 }
  0x85   : > { %1172 = vmatpush.bf16.msrb.mxu3 %v2203_v4  ;;  %1273 = vmatpush.bf16.msrb.mxu0 %v2191_v6 }
  0x86   : > { %1399 = vmatpush.bf16.msrb.mxu1 %v2215_v7 }
  0x88   : > { %979 = vmatpush.bf16.msrb.mxu2 %v2178_v9 }
  0x89   : > { %1173 = vmatpush.bf16.msrb.mxu3 %v2202_v8  ;;  %1274 = vmatpush.bf16.msrb.mxu0 %v2190_v10 }
  0x8a   : > { %1400 = vmatpush.bf16.msrb.mxu1 %v2214_v11 }
  0x8c   : > { %980 = vmatpush.bf16.msrb.mxu2 %v2177_v13 }
  0x8d   : > { %1174 = vmatpush.bf16.msrb.mxu3 %v2201_v12  ;;  %1275 = vmatpush.bf16.msrb.mxu0 %v2189_v14 }
  0x8e   : > { %1401 = vmatpush.bf16.msrb.mxu1 %v2213_v15 }
  0x8f   : > { %981 = vmatmul.bf16.vlgmr.msrb.gmra.mxu2 %v2173_v16 }
  0x90   : > { %1276 = vmatmul.bf16.vlgmr.msrb.gmra.mxu0 %v2185_v18 }
  0x91   : > { %1402 = vmatmul.bf16.vlgmr.msrb.gmra.mxu1 %v2209_v19 }
  0x92   : > { %1175 = vmatmul.bf16.vlgmr.msrb.gmra.mxu3 %v2197_v17 }
  0x9f   : > { %986 = vmatmul.bf16.gmra.mxu2 %v2174_v20 }
  0xa0   : > { %1281 = vmatmul.bf16.gmra.mxu0 %v2186_v22 }
  0xa1   : > { %1407 = vmatmul.bf16.gmra.mxu1 %v2210_v23 }
  0xa2   : > { %1180 = vmatmul.bf16.gmra.mxu3 %v2198_v21 }
  0xaf   : > { %991 = vmatmul.bf16.gmra.mxu2 %v2175_v24 }
  0xb0   : > { %1286 = vmatmul.bf16.gmra.mxu0 %v2187_v26 }
  0xb1   : > { %1412 = vmatmul.bf16.gmra.mxu1 %v2211_v27 }
  0xb2   : > { %1185 = vmatmul.bf16.gmra.mxu3 %v2199_v25 }
  0xbf   : > { %996 = vmatmul.bf16.gmra.mxu2 %v2176_v28 }
  0xc0   : > { %1291 = vmatmul.bf16.gmra.mxu0 %v2188_v30 }
  0xc1   : > { %1417 = vmatmul.bf16.gmra.mxu1 %v2212_v31 }
  0xc2   : > { %1190 = vmatmul.bf16.gmra.mxu3 %v2200_v29 }
  0xec   : > { %v755_v32 = vpop.f32.mrf.mxu0 }
  0xed   : > { %v856_v33 = vpop.f32.mrf.mxu1 }
  0xee   : > { %v857_v54 = vadd.f32 %v856_v33, %v755_v32 }
  0xf2   : > { %v765_v34 = vpop.f32.mrf.mxu2 }
  0xf4   : > { %v757_v37 = vpop.f32.mrf.mxu0 }
  0xf5   : > { %v866_v35 = vpop.f32.mrf.mxu3  ;;  %v858_v38 = vpop.f32.mrf.mxu1 }
  0xf6   : > { %v2805_v36 = vadd.f32 %v866_v35, %v765_v34  ;;  %v859_v60 = vadd.f32 %v858_v38, %v757_v37 }
  0xfa   : > { %v2807_v39 = vpop.f32.mrf.mxu2 }
  0xfc   : > { %v760_v41 = vpop.f32.mrf.mxu0 }
  0xfd   : > { %v2809_v40 = vpop.f32.mrf.mxu3  ;;  %v861_v42 = vpop.f32.mrf.mxu1 }
  0xfe   : > { %v862_v17 = vadd.f32 %v861_v42, %v760_v41 }
 0x102   : > { %v770_v43 = vpop.f32.mrf.mxu2 }
 0x104   : > { %v762_v46 = vpop.f32.mrf.mxu0 }
 0x105   : > { %v871_v44 = vpop.f32.mrf.mxu3  ;;  %v863_v47 = vpop.f32.mrf.mxu1 }
 0x106   : > { %v2811_v45 = vadd.f32 %v871_v44, %v770_v43  ;;  %v864_v22 = vadd.f32 %v863_v47, %v762_v46 }
 0x10a   : > { %v2813_v48 = vpop.f32.mrf.mxu2 }
 0x10d   : > { %v2815_v49 = vpop.f32.mrf.mxu3  ;;  %v1277_v50 = vpop.f32.mrf.mxu0 }
 0x10e   : > { %v1403_v51 = vpop.f32.mrf.mxu1 }
 0x112   : > { %v982_v52 = vpop.f32.mrf.mxu2 }
 0x113   : > { %v1002_v58 = vadd.f32 %v982_v52, %v857_v54  ;;  %v869_v52 = vadd.f32 %v2809_v40, %v2807_v39 }
 0x115   : > { %v1176_v53 = vpop.f32.mrf.mxu3  ;;  %v1279_v55 = vpop.f32.mrf.mxu0  ;;  %v1013_v63 = vadd.f32 %v2820_v59, %v1002_v58 }
 0x116   : > { %v1278_v56 = vadd.f32 %v1277_v50, %v1176_v53  ;;  %v1405_v57 = vpop.f32.mrf.mxu1 }
 0x117   : > { %v1021_v8 = vmax.f32 %v1013_v63, 0.0 }
 0x118   : > { %v1423_v61 = vadd.f32 %v1403_v51, %v1278_v56 }
 0x11a   : > { %v984_v62 = vpop.f32.mrf.mxu2  ;;  %v1431_v5 = vadd.f32 %v2820_v59, %v1423_v61 }
 0x11b   : > { %v1003_v0 = vadd.f32 %v984_v62, %v859_v60 }
 0x11c   : > { %v1439_v12 = vmax.f32 %v1431_v5, 0.0 }
 0x11d   : > { %v1178_v1 = vpop.f32.mrf.mxu3  ;;  %v1014_v3 = vadd.f32 %v2820_v59, %v1003_v0  ;;  %v1282_v4 = vpop.f32.mrf.mxu0 }
 0x11e   : > { %v1280_v2 = vadd.f32 %v1279_v55, %v1178_v1  ;;  %v1408_v7 = vpop.f32.mrf.mxu1 }
 0x11f   : > { %v1022_v9 = vmax.f32 %v1014_v3, 0.0 }
 0x120   : > { %v1424_v6 = vadd.f32 %v1405_v57, %v1280_v2 }
 0x121   : > { %v2225_v11 = vpack.c.bf16 %v1022_v9, %v1021_v8 }
 0x122   : > { %v1432_v10 = vadd.f32 %v2820_v59, %v1424_v6  ;;  %v987_v14 = vpop.f32.mrf.mxu2 }
 0x123   : > { %2226 = vst [vmem:[%s2827_s18] sm:$0xff] %v2225_v11   ;;  %v1004_v21 = vadd.f32 %v987_v14, %v862_v17 }
 0x124   : > { %v1440_v13 = vmax.f32 %v1432_v10, 0.0  ;;  %v874_v10 = vadd.f32 %v2815_v49, %v2813_v48 }
 0x125   : > { %v1181_v15 = vpop.f32.mrf.mxu3  ;;  %v1284_v18 = vpop.f32.mrf.mxu0  ;;  %v1015_v25 = vadd.f32 %v2820_v59, %v1004_v21 }
 0x126   : > { %v2245_v16 = vpack.c.bf16 %v1440_v13, %v1439_v12  ;;  %v1283_v19 = vadd.f32 %v1282_v4, %v1181_v15  ;;  %v1410_v20 = vpop.f32.mrf.mxu1 }
 0x127   : > { %v1023_v33 = vmax.f32 %v1015_v25, 0.0 }
 0x128   : > { %2265 = vst [vmem:[%s2827_s18 + $0x20] sm:$0xff] %v2245_v16   ;;  %v1425_v23 = vadd.f32 %v1408_v7, %v1283_v19 }
 0x12a   : > { %v989_v24 = vpop.f32.mrf.mxu2  ;;  %v1433_v31 = vadd.f32 %v2820_v59, %v1425_v23 }
 0x12b   : > { %v1005_v26 = vadd.f32 %v989_v24, %v864_v22 }
 0x12c   : > { %v1441_v41 = vmax.f32 %v1433_v31, 0.0 }
 0x12d   : > { %v1183_v27 = vpop.f32.mrf.mxu3  ;;  %v1016_v29 = vadd.f32 %v2820_v59, %v1005_v26  ;;  %v1287_v30 = vpop.f32.mrf.mxu0 }
 0x12e   : > { %v1285_v28 = vadd.f32 %v1284_v18, %v1183_v27  ;;  %v1413_v35 = vpop.f32.mrf.mxu1 }
 0x12f   : > { %v1024_v34 = vmax.f32 %v1016_v29, 0.0  ;;  %v1509_v29 = vld [vmem:[%s2827_s18 + $0x20] sm:$0xff] (%p2600_p0)  }
 0x130   : > { %v1426_v32 = vadd.f32 %v1410_v20, %v1285_v28  ;;  %1510 = vst [vmem:[%s1476_s13 + $0x40] sm:$0xff] (%p2600_p0), %v1509_v29  }
 0x131   : > { %v2230_v38 = vpack.c.bf16 %v1024_v34, %v1023_v33 }
 0x132   : > { %v1434_v37 = vadd.f32 %v2820_v59, %v1426_v32  ;;  %v992_v43 = vpop.f32.mrf.mxu2 }
 0x133   : > { %2262 = vst [vmem:[%s2827_s18 + $0x8] sm:$0xff] %v2230_v38   ;;  %v1006_v50 = vadd.f32 %v992_v43, %v2805_v36 }
 0x134   : > { %v1442_v42 = vmax.f32 %v1434_v37, 0.0 }
 0x135   : > { %v1186_v44 = vpop.f32.mrf.mxu3  ;;  %v1289_v51 = vpop.f32.mrf.mxu0  ;;  %v1017_v56 = vadd.f32 %v2820_v59, %v1006_v50 }
 0x136   : > { %v2250_v46 = vpack.c.bf16 %v1442_v42, %v1441_v41  ;;  %v1288_v47 = vadd.f32 %v1287_v30, %v1186_v44  ;;  %v1415_v53 = vpop.f32.mrf.mxu1 }
 0x137   : > { %v1025_v36 = vmax.f32 %v1017_v56, 0.0 }
 0x138   : > { %2266 = vst [vmem:[%s2827_s18 + $0x28] sm:$0xff] %v2250_v46   ;;  %v1427_v54 = vadd.f32 %v1413_v35, %v1288_v47 }
 0x13a   : > { %v994_v55 = vpop.f32.mrf.mxu2  ;;  %v1435_v62 = vadd.f32 %v2820_v59, %v1427_v54  ;;  %v1497_v26 = vld [vmem:[%s2827_s18 + $0x8] sm:$0xff] (%p2600_p0)  }
 0x13b   : > { %v1007_v57 = vadd.f32 %v994_v55, %v869_v52  ;;  %1498 = vst [vmem:[%s1476_s13 + $0x8] sm:$0xff] (%p2600_p0), %v1497_v26  }
 0x13c   : > { %v1443_v2 = vmax.f32 %v1435_v62, 0.0 }
 0x13d   : > { %v1188_v58 = vpop.f32.mrf.mxu3  ;;  %v1018_v61 = vadd.f32 %v2820_v59, %v1007_v57  ;;  %v1292_v40 = vpop.f32.mrf.mxu0 }
 0x13e   : > { %v1290_v60 = vadd.f32 %v1289_v51, %v1188_v58  ;;  %v1418_v5 = vpop.f32.mrf.mxu1 }
 0x13f   : > { %v1026_v0 = vmax.f32 %v1018_v61, 0.0  ;;  %v1513_v30 = vld [vmem:[%s2827_s18 + $0x28] sm:$0xff] (%p2600_p0)  }
 0x140   : > { %v1428_v63 = vadd.f32 %v1415_v53, %v1290_v60  ;;  %1514 = vst [vmem:[%s1476_s13 + $0x48] sm:$0xff] (%p2600_p0), %v1513_v30  }
 0x141   : > { %v2235_v39 = vpack.c.bf16 %v1026_v0, %v1025_v36 }
 0x142   : > { %v1436_v1 = vadd.f32 %v2820_v59, %v1428_v63  ;;  %v997_v4 = vpop.f32.mrf.mxu2 }
 0x143   : > { %2263 = vst [vmem:[%s2827_s18 + $0x10] sm:$0xff] %v2235_v39   ;;  %v1008_v9 = vadd.f32 %v997_v4, %v2811_v45 }
 0x144   : > { %v1444_v3 = vmax.f32 %v1436_v1, 0.0 }
 0x145   : > { %v1191_v6 = vpop.f32.mrf.mxu3  ;;  %v1019_v13 = vadd.f32 %v2820_v59, %v1008_v9  ;;  %v1294_v14 = vpop.f32.mrf.mxu0 }
 0x146   : > { %v2255_v7 = vpack.c.bf16 %v1444_v3, %v1443_v2  ;;  %v1293_v8 = vadd.f32 %v1292_v40, %v1191_v6  ;;  %v1420_v18 = vpop.f32.mrf.mxu1 }
 0x147   : > { %v1027_v45 = vmax.f32 %v1019_v13, 0.0 }
 0x148   : > { %2267 = vst [vmem:[%s2827_s18 + $0x30] sm:$0xff] %v2255_v7   ;;  %v1429_v11 = vadd.f32 %v1418_v5, %v1293_v8 }
 0x14a   : > { %v999_v12 = vpop.f32.mrf.mxu2  ;;  %v1437_v20 = vadd.f32 %v2820_v59, %v1429_v11  ;;  %v1501_v27 = vld [vmem:[%s2827_s18 + $0x10] sm:$0xff] (%p2600_p0)  }
 0x14b   : > { %v1009_v15 = vadd.f32 %v999_v12, %v874_v10  ;;  %1502 = vst [vmem:[%s1476_s13 + $0x10] sm:$0xff] (%p2600_p0), %v1501_v27  }
 0x14c   : > { %v1445_v23 = vmax.f32 %v1437_v20, 0.0 }
 0x14d   : > { %v1193_v16 = vpop.f32.mrf.mxu3  ;;  %v1020_v19 = vadd.f32 %v2820_v59, %v1009_v15 }
 0x14e   : > { %v1295_v17 = vadd.f32 %v1294_v14, %v1193_v16 }
 0x14f   : > { %v1028_v22 = vmax.f32 %v1020_v19, 0.0  ;;  %v1517_v31 = vld [vmem:[%s2827_s18 + $0x30] sm:$0xff] (%p2600_p0)  }
 0x150   : > { %v1430_v21 = vadd.f32 %v1420_v18, %v1295_v17  ;;  %1518 = vst [vmem:[%s1476_s13 + $0x50] sm:$0xff] (%p2600_p0), %v1517_v31  }
 0x151   : > { %v2240_v49 = vpack.c.bf16 %v1028_v22, %v1027_v45 }
 0x152   : > { %v1438_v48 = vadd.f32 %v2820_v59, %v1430_v21  ;;  %v1493_v59 = vld [vmem:[%s2827_s18] sm:$0xff] (%p2600_p0)  }
 0x153   : > { %2264 = vst [vmem:[%s2827_s18 + $0x18] sm:$0xff] %v2240_v49  }
 0x154   : > { %v1446_v24 = vmax.f32 %v1438_v48, 0.0  ;;  %1470 = sbr.rel (!%p2600_p0) target bundleno = 353 (0x161), region = 167  ;;  %1494 = vst [vmem:[%s1476_s13] sm:$0xff] (%p2600_p0), %v1493_v59  }
 0x156   : > { %v2260_v25 = vpack.c.bf16 %v1446_v24, %v1445_v23 }
 0x158   : > { %2268 = vst [vmem:[%s2827_s18 + $0x38] sm:$0xff] %v2260_v25  }
 0x15a   : > { %v1505_v28 = vld [vmem:[%s2827_s18 + $0x18] sm:$0xff]  }
 0x15b   : > { %1506 = vst [vmem:[%s1476_s13 + $0x18] sm:$0xff] %v1505_v28  }
 0x15f   : > { %v1521_v32 = vld [vmem:[%s2827_s18 + $0x38] sm:$0xff]  }
 0x160   : > { %1522 = vst [vmem:[%s1476_s13 + $0x58] sm:$0xff] %v1521_v32  }
 0x161 PF: > { %s15_s28 = sadd.s32 1, %s2460_s28   ;;  %s2918_s29 = sld [smem:[#allocation7_spill]] }
 0x162   : > { %p12_p5 = scmp.ge.s32.totalorder %s15_s28, 4   ;;  %s2919_s18 = smov %s2424_s19 }
 0x163   : > { %s2920_s19 = smov %s2598_s6  ;;  %s2921_s20 = smov %s2432_s21 }
 0x164   : > { %s2922_s21 = smov %s2585_s7  ;;  %s2923_s22 = smov %s2440_s23 }
 0x165   : > { %s2924_s23 = smov %s2576_s11  ;;  %s2925_s24 = smov %s2448_s25 }
 0x166   : > { %s2927_s26 = smov %s2456_s27  ;;  %s2928_s27 = smov %s2930_s30 }
 0x167   : > { %s2926_s25 = smov %s2918_s29  ;;  %14 = sbr.rel (!%p12_p5) target bundleno = 8 (0x8), region = 261 }

// kernel: bottleneck_forward.5
= control target key start
LH: loop header
LB: loop body
LE: loop exit
PB: predicated region body
PF: predicated region fallthrough
CT: control target
= control target key end

     0   :  { %s587_s4 = inlined_call_operand.vmem [shape: bf16[128,128], index: 4, kind: input, shape index: {}]   ;;  %s588_s1 = inlined_call_operand.vmem [shape: bf16[128,128], index: 1, kind: input, shape index: {}]   ;;  %s589_s3 = inlined_call_operand.vmem [shape: bf16[64,128], index: 3, kind: input, shape index: {}]   ;;  %s590_s0 = inlined_call_operand.vmem [shape: bf16[64,128], index: 0, kind: input, shape index: {}]   ;;  %s591_s2 = inlined_call_operand.vmem [shape: f32[1,128], index: 2, kind: input, shape index: {}]   ;;  %s592_s5 = inlined_call_operand.vmem [shape: bf16[64,128], index: 5, kind: output, shape index: {}]  }
   0x1   :  { %v429_v0 = vld [vmem:[%s587_s4 + $0x38] sm:$0xff]  ;;  %v428_v2 = vld [vmem:[%s587_s4 + $0x30] sm:$0xff]  ;;  %v427_v4 = vld [vmem:[%s587_s4 + $0x28] sm:$0xff] }
   0x2   :  { %v417_v1 = vld [vmem:[%s588_s1 + $0x38] sm:$0xff]  ;;  %140 = vmatpush.bf16.msra.mxu0 %v429_v0  ;;  %453 = vmatpush.bf16.msra.mxu2 %v429_v0  ;;  %v416_v3 = vld [vmem:[%s588_s1 + $0x30] sm:$0xff]  ;;  %v415_v5 = vld [vmem:[%s588_s1 + $0x28] sm:$0xff] }
   0x3   :  { %241 = vmatpush.bf16.msra.mxu1 %v417_v1  ;;  %461 = vmatpush.bf16.msra.mxu3 %v417_v1  ;;  %v426_v6 = vld [vmem:[%s587_s4 + $0x20] sm:$0xff]  ;;  %v425_v8 = vld [vmem:[%s587_s4 + $0x18] sm:$0xff]  ;;  %v424_v10 = vld [vmem:[%s587_s4 + $0x10] sm:$0xff] }
   0x4   :  { %v414_v7 = vld [vmem:[%s588_s1 + $0x20] sm:$0xff]  ;;  %v413_v9 = vld [vmem:[%s588_s1 + $0x18] sm:$0xff]  ;;  %v412_v11 = vld [vmem:[%s588_s1 + $0x10] sm:$0xff] }
   0x5   :  { %v423_v12 = vld [vmem:[%s587_s4 + $0x8] sm:$0xff]  ;;  %v422_v14 = vld [vmem:[%s587_s4] sm:$0xff]  ;;  %v420_v17 = vld [vmem:[%s589_s3 + $0x10] sm:$0xff] }
   0x6   :  { %141 = vmatpush.bf16.msra.mxu0 %v428_v2  ;;  %454 = vmatpush.bf16.msra.mxu2 %v428_v2  ;;  %v411_v13 = vld [vmem:[%s588_s1 + $0x8] sm:$0xff]  ;;  %v410_v15 = vld [vmem:[%s588_s1] sm:$0xff]  ;;  %v408_v19 = vld [vmem:[%s590_s0 + $0x10] sm:$0xff] }
   0x7   :  { %242 = vmatpush.bf16.msra.mxu1 %v416_v3  ;;  %462 = vmatpush.bf16.msra.mxu3 %v416_v3  ;;  %v418_v16 = vld [vmem:[%s589_s3] sm:$0xff]  ;;  %v419_v20 = vld [vmem:[%s589_s3 + $0x8] sm:$0xff]  ;;  %v421_v21 = vld [vmem:[%s589_s3 + $0x18] sm:$0xff] }
   0x8   :  { %v406_v18 = vld [vmem:[%s590_s0] sm:$0xff]  ;;  %v407_v22 = vld [vmem:[%s590_s0 + $0x8] sm:$0xff]  ;;  %v409_v23 = vld [vmem:[%s590_s0 + $0x18] sm:$0xff] }
   0x9   :  { %v469_v27 = vld [vmem:[%s591_s2] ss:$0 sm:$0xff] }
   0xa   :  { %142 = vmatpush.bf16.msra.mxu0 %v427_v4  ;;  %455 = vmatpush.bf16.msra.mxu2 %v427_v4 }
   0xb   :  { %243 = vmatpush.bf16.msra.mxu1 %v415_v5  ;;  %463 = vmatpush.bf16.msra.mxu3 %v415_v5 }
   0xe   :  { %143 = vmatpush.bf16.msra.mxu0 %v426_v6  ;;  %456 = vmatpush.bf16.msra.mxu2 %v426_v6 }
   0xf   :  { %244 = vmatpush.bf16.msra.mxu1 %v414_v7  ;;  %464 = vmatpush.bf16.msra.mxu3 %v414_v7 }
  0x12   :  { %144 = vmatpush.bf16.msra.mxu0 %v425_v8  ;;  %457 = vmatpush.bf16.msra.mxu2 %v425_v8 }
  0x13   :  { %245 = vmatpush.bf16.msra.mxu1 %v413_v9  ;;  %465 = vmatpush.bf16.msra.mxu3 %v413_v9 }
  0x16   :  { %145 = vmatpush.bf16.msra.mxu0 %v424_v10  ;;  %458 = vmatpush.bf16.msra.mxu2 %v424_v10 }
  0x17   :  { %246 = vmatpush.bf16.msra.mxu1 %v412_v11  ;;  %466 = vmatpush.bf16.msra.mxu3 %v412_v11 }
  0x1a   :  { %146 = vmatpush.bf16.msra.mxu0 %v423_v12  ;;  %459 = vmatpush.bf16.msra.mxu2 %v423_v12 }
  0x1b   :  { %247 = vmatpush.bf16.msra.mxu1 %v411_v13  ;;  %467 = vmatpush.bf16.msra.mxu3 %v411_v13 }
  0x1e   :  { %147 = vmatpush.bf16.msra.mxu0 %v422_v14  ;;  %460 = vmatpush.bf16.msra.mxu2 %v422_v14 }
  0x1f   :  { %248 = vmatpush.bf16.msra.mxu1 %v410_v15  ;;  %468 = vmatpush.bf16.msra.mxu3 %v410_v15 }
  0x21   :  { %148 = vmatmul.bf16.vlgmr.msra.gmra.mxu0 %v418_v16  ;;  %158 = vmatmul.bf16.vlgmr.msra.gmra.mxu2 %v420_v17 }
  0x22   :  { %249 = vmatmul.bf16.vlgmr.msra.gmra.mxu1 %v406_v18  ;;  %259 = vmatmul.bf16.vlgmr.msra.gmra.mxu3 %v408_v19 }
  0x31   :  { %153 = vmatmul.bf16.gmra.mxu0 %v419_v20  ;;  %163 = vmatmul.bf16.gmra.mxu2 %v421_v21 }
  0x32   :  { %254 = vmatmul.bf16.gmra.mxu1 %v407_v22  ;;  %264 = vmatmul.bf16.gmra.mxu3 %v409_v23 }
  0x9e   :  { %v149_v24 = vpop.f32.mrf.mxu0 }
  0x9f   :  { %v250_v25 = vpop.f32.mrf.mxu1 }
  0xa0   :  { %v251_v26 = vadd.f32 %v250_v25, %v149_v24 }
  0xa2   :  { %v274_v32 = vadd.f32 %v469_v27, %v251_v26 }
  0xa4   :  { %v159_v28 = vpop.f32.mrf.mxu2  ;;  %v282_v36 = vmax.f32 %v274_v32, 0.0 }
  0xa5   :  { %v260_v29 = vpop.f32.mrf.mxu3 }
  0xa6   :  { %v151_v30 = vpop.f32.mrf.mxu0  ;;  %v261_v34 = vadd.f32 %v260_v29, %v159_v28 }
  0xa7   :  { %v252_v31 = vpop.f32.mrf.mxu1 }
  0xa8   :  { %v253_v33 = vadd.f32 %v252_v31, %v151_v30  ;;  %v278_v40 = vadd.f32 %v469_v27, %v261_v34 }
  0xaa   :  { %v275_v35 = vadd.f32 %v469_v27, %v253_v33  ;;  %v286_v46 = vmax.f32 %v278_v40, 0.0 }
  0xac   :  { %v283_v37 = vmax.f32 %v275_v35, 0.0  ;;  %v161_v38 = vpop.f32.mrf.mxu2 }
  0xad   :  { %v262_v39 = vpop.f32.mrf.mxu3 }
  0xae   :  { %v433_v41 = vpack.c.bf16 %v283_v37, %v282_v36  ;;  %v263_v42 = vadd.f32 %v262_v39, %v161_v38  ;;  %v154_v43 = vpop.f32.mrf.mxu0 }
  0xaf   :  { %v255_v44 = vpop.f32.mrf.mxu1 }
  0xb0   :  { %434 = vst [vmem:[%s592_s5] sm:$0xff] %v433_v41   ;;  %v279_v45 = vadd.f32 %v469_v27, %v263_v42  ;;  %v256_v49 = vadd.f32 %v255_v44, %v154_v43 }
  0xb2   :  { %v287_v47 = vmax.f32 %v279_v45, 0.0  ;;  %v276_v54 = vadd.f32 %v469_v27, %v256_v49 }
  0xb4   :  { %v443_v48 = vpack.c.bf16 %v287_v47, %v286_v46  ;;  %v164_v50 = vpop.f32.mrf.mxu2  ;;  %v284_v58 = vmax.f32 %v276_v54, 0.0 }
  0xb5   :  { %v265_v51 = vpop.f32.mrf.mxu3 }
  0xb6   :  { %451 = vst [vmem:[%s592_s5 + $0x10] sm:$0xff] %v443_v48   ;;  %v156_v52 = vpop.f32.mrf.mxu0  ;;  %v266_v56 = vadd.f32 %v265_v51, %v164_v50 }
  0xb7   :  { %v257_v53 = vpop.f32.mrf.mxu1 }
  0xb8   :  { %v258_v55 = vadd.f32 %v257_v53, %v156_v52  ;;  %v280_v62 = vadd.f32 %v469_v27, %v266_v56 }
  0xba   :  { %v277_v57 = vadd.f32 %v469_v27, %v258_v55  ;;  %v288_v2 = vmax.f32 %v280_v62, 0.0 }
  0xbc   :  { %v285_v59 = vmax.f32 %v277_v57, 0.0  ;;  %v166_v60 = vpop.f32.mrf.mxu2 }
  0xbd   :  { %v267_v61 = vpop.f32.mrf.mxu3 }
  0xbe   :  { %v438_v63 = vpack.c.bf16 %v285_v59, %v284_v58  ;;  %v268_v0 = vadd.f32 %v267_v61, %v166_v60 }
  0xc0   :  { %450 = vst [vmem:[%s592_s5 + $0x8] sm:$0xff] %v438_v63   ;;  %v281_v1 = vadd.f32 %v469_v27, %v268_v0 }
  0xc2   :  { %v289_v3 = vmax.f32 %v281_v1, 0.0 }
  0xc4   :  { %v448_v4 = vpack.c.bf16 %v289_v3, %v288_v2 }
  0xc6   :  { %452 = vst [vmem:[%s592_s5 + $0x18] sm:$0xff] %v448_v4  }

// kernel: bottleneck_forward.4
= control target key start
LH: loop header
LB: loop body
LE: loop exit
PB: predicated region body
PF: predicated region fallthrough
CT: control target
= control target key end

     0   :  { %vm224_vm0 = vsmask.f32 7424  ;;  %vm639_vm1 = vsmask.f32 5376  ;;  %vm872_vm2 = vcmask 1044480   ;;  %vm961_vm3 = vcmask 1041408   ;;  %s7412_s1 = inlined_call_operand.vmem [shape: bf16[9,128,128], index: 1, kind: input, shape index: {}]   ;;  %s7413_s0 = inlined_call_operand.vmem [shape: bf16[4,4,25,128], index: 0, kind: input, shape index: {}]   ;;  %s7414_s2 = inlined_call_operand.vmem [shape: f32[1,128], index: 2, kind: input, shape index: {}]   ;;  %s7415_s3 = inlined_call_operand.vmem [shape: bf16[4,20,128], index: 3, kind: output, shape index: {}]  }
   0x1   :  { %v5608_v0 = vld [vmem:[%s7412_s1 + $0x78] sm:$0xff]  ;;  %v5607_v4 = vld [vmem:[%s7412_s1 + $0x70] sm:$0xff]  ;;  %v5606_v8 = vld [vmem:[%s7412_s1 + $0x68] sm:$0xff]  ;;  %vm962_vm4 = vsmask.f32 1280 }
   0x2   :  { %v5600_v1 = vld [vmem:[%s7412_s1 + $0x38] sm:$0xff]  ;;  %113 = vmatpush.bf16.msra.mxu0 %v5608_v0  ;;  %v5599_v5 = vld [vmem:[%s7412_s1 + $0x30] sm:$0xff]  ;;  %v5598_v9 = vld [vmem:[%s7412_s1 + $0x28] sm:$0xff] }
   0x3   :  { %v5616_v2 = vld [vmem:[%s7412_s1 + $0xb8] sm:$0xff]  ;;  %189 = vmatpush.bf16.msra.mxu1 %v5600_v1  ;;  %v5615_v6 = vld [vmem:[%s7412_s1 + $0xb0] sm:$0xff]  ;;  %v5614_v10 = vld [vmem:[%s7412_s1 + $0xa8] sm:$0xff] }
   0x4   :  { %v5625_v3 = vld [vmem:[%s7412_s1 + $0xf8] sm:$0xff]  ;;  %290 = vmatpush.bf16.msra.mxu2 %v5616_v2  ;;  %v5624_v7 = vld [vmem:[%s7412_s1 + $0xf0] sm:$0xff]  ;;  %v5623_v11 = vld [vmem:[%s7412_s1 + $0xe8] sm:$0xff] }
   0x5   :  { %390 = vmatpush.bf16.msra.mxu3 %v5625_v3  ;;  %v5605_v12 = vld [vmem:[%s7412_s1 + $0x60] sm:$0xff]  ;;  %v17_v16 = vld [vmem:[%s7413_s0 + $0x8] sm:$0x3]  ;;  %v5604_v17 = vld [vmem:[%s7412_s1 + $0x58] sm:$0xff] }
   0x6   :  { %114 = vmatpush.bf16.msra.mxu0 %v5607_v4  ;;  %v5597_v13 = vld [vmem:[%s7412_s1 + $0x20] sm:$0xff]  ;;  %v5596_v18 = vld [vmem:[%s7412_s1 + $0x18] sm:$0xff]  ;;  %v136_v21 = vunpack.c.l.b16 %v17_v16  ;;  %v5603_v23 = vld [vmem:[%s7412_s1 + $0x50] sm:$0xff] }
   0x7   :  { %190 = vmatpush.bf16.msra.mxu1 %v5599_v5  ;;  %v5613_v14 = vld [vmem:[%s7412_s1 + $0xa0] sm:$0xff]  ;;  %v5612_v19 = vld [vmem:[%s7412_s1 + $0x98] sm:$0xff]  ;;  %v5595_v24 = vld [vmem:[%s7412_s1 + $0x10] sm:$0xff] }
   0x8   :  { %291 = vmatpush.bf16.msra.mxu2 %v5615_v6  ;;  %v5622_v15 = vld [vmem:[%s7412_s1 + $0xe0] sm:$0xff]  ;;  %v5621_v20 = vld [vmem:[%s7412_s1 + $0xd8] sm:$0xff]  ;;  %v5611_v25 = vld [vmem:[%s7412_s1 + $0x90] sm:$0xff]  ;;  %v6070_v28 = vpack.c.b16 %v136_v21, %v136_v21 }
   0x9   :  { %391 = vmatpush.bf16.msra.mxu3 %v5624_v7  ;;  %v5898_v22 = vld [vmem:[%s7413_s0] sm:$0xff]   ;;  %v5620_v26 = vld [vmem:[%s7412_s1 + $0xd0] sm:$0xff]  ;;  %v5602_v29 = vld [vmem:[%s7412_s1 + $0x48] sm:$0xff] }
   0xa   :  { %115 = vmatpush.bf16.msra.mxu0 %v5606_v8  ;;  %v228_v27 = vshll.u32 %v5898_v22, 16  ;;  %v5594_v30 = vld [vmem:[%s7412_s1 + $0x8] sm:$0xff]  ;;  %v226_v33 = vshrl.u32 %v5898_v22, 16  ;;  %v233_v35 = vshll.u32 %v6070_v28, 16  ;;  %v5601_v36 = vld [vmem:[%s7412_s1 + $0x40] sm:$0xff]  ;;  %v5650_v42 = vld [vmem:[%s7412_s1 + $0x1b8] sm:$0xff] }
   0xb   :  { %191 = vmatpush.bf16.msra.mxu1 %v5598_v9  ;;  %v5610_v31 = vld [vmem:[%s7412_s1 + $0x88] sm:$0xff]  ;;  %v5593_v37 = vld [vmem:[%s7412_s1] sm:$0xff]  ;;  %v5634_v43 = vld [vmem:[%s7412_s1 + $0x138] sm:$0xff]  ;;  %v237_v0 = vshrl.u32 %v6070_v28, 16 }
   0xc   :  { %292 = vmatpush.bf16.msra.mxu2 %v5614_v10  ;;  %v5619_v32 = vld [vmem:[%s7412_s1 + $0xc8] sm:$0xff]  ;;  %v230_v34 = vrot.slane %v228_v27, 1  ;;  %v5609_v38 = vld [vmem:[%s7412_s1 + $0x80] sm:$0xff]  ;;  %v235_v41 = vrot.slane %v233_v35, 1  ;;  %v5939_v44 = vld [vmem:[%s7413_s0 + $0x10] sm:$0xff]  }
   0xd   :  { %392 = vmatpush.bf16.msra.mxu3 %v5623_v11  ;;  %v5618_v39 = vld [vmem:[%s7412_s1 + $0xc0] sm:$0xff]  ;;  %v5642_v47 = vld [vmem:[%s7412_s1 + $0x178] sm:$0xff]  ;;  %v5649_v49 = vld [vmem:[%s7412_s1 + $0x1b0] sm:$0xff] }
   0xe   :  { %116 = vmatpush.bf16.msra.mxu0 %v5605_v12  ;;  %v231_v40 = vor.u32 %v230_v34, %v226_v33  ;;  %v6109_v45 = vld [vmem:[%s7413_s0 + $0x20] sm:$0xff]  ;;  %v5658_v48 = vld [vmem:[%s7412_s1 + $0x1f8] sm:$0xff]  ;;  %v5633_v50 = vld [vmem:[%s7412_s1 + $0x130] sm:$0xff] }
   0xf   :  { %192 = vmatpush.bf16.msra.mxu1 %v5597_v13  ;;  %v5641_v51 = vld [vmem:[%s7412_s1 + $0x170] sm:$0xff]  ;;  %v5648_v53 = vld [vmem:[%s7412_s1 + $0x1a8] sm:$0xff]  ;;  %v3784_v55 = vld [vmem:[%s7413_s0 + $0x18] sm:$0x3]  ;;  %v239_v13 = vor.u32 %v237_v0, %v235_v41 }
  0x10   :  { %293 = vmatpush.bf16.msra.mxu2 %v5613_v14  ;;  %v236_v46 = vsel %vm224_vm0, %v231_v40, %v235_v41  ;;  %v5657_v52 = vld [vmem:[%s7412_s1 + $0x1f0] sm:$0xff]  ;;  %v5632_v54 = vld [vmem:[%s7412_s1 + $0x128] sm:$0xff]  ;;  %v5647_v59 = vld [vmem:[%s7412_s1 + $0x1a0] sm:$0xff]  ;;  %v60_v62 = vunpack.c.l.b16 %v3784_v55 }
  0x11   :  { %393 = vmatpush.bf16.msra.mxu3 %v5622_v15  ;;  %v5640_v56 = vld [vmem:[%s7412_s1 + $0x168] sm:$0xff]  ;;  %v5631_v60 = vld [vmem:[%s7412_s1 + $0x120] sm:$0xff]  ;;  %v4120_v63 = vld [vmem:[%s7413_s0 + $0x18] sm:$0xf] }
  0x12   :  { %117 = vmatpush.bf16.msra.mxu0 %v5604_v17  ;;  %v5656_v57 = vld [vmem:[%s7412_s1 + $0x1e8] sm:$0xff]  ;;  %v5639_v2 = vld [vmem:[%s7412_s1 + $0x160] sm:$0xff]  ;;  %v5646_v4 = vld [vmem:[%s7412_s1 + $0x198] sm:$0xff]  ;;  %v750_v9 = vunpack.c.l.b16 %v4120_v63  ;;  %v62_v10 = vpack.c.b16 %v60_v62, %v60_v62 }
  0x13   :  { %193 = vmatpush.bf16.msra.mxu1 %v5596_v18  ;;  %v3915_v58 = vld [vmem:[%s7413_s0 + $0x28] sm:$0x3]  ;;  %v5655_v3 = vld [vmem:[%s7412_s1 + $0x1e0] sm:$0xff]  ;;  %v5630_v6 = vld [vmem:[%s7412_s1 + $0x118] sm:$0xff] }
  0x14   :  { %294 = vmatpush.bf16.msra.mxu2 %v5612_v19  ;;  %v615_v61 = vld [vmem:[%s7413_s0 + $0x8] sm:$0xf]  ;;  %v337_v1 = vunpack.c.l.b16 %v3915_v58  ;;  %v5940_v7 = vld [vmem:[%s7413_s0] sm:$0xf0]  ;;  %v5941_v8 = vld [vmem:[%s7413_s0] sm:$0xc] }
  0x15   :  { %394 = vmatpush.bf16.msra.mxu3 %v5621_v20  ;;  %v636_v5 = vunpack.c.l.b16 %v615_v61  ;;  %v5943_v11 = vld [vmem:[%s7413_s0 + $0x10] sm:$0xf0]  ;;  %v5944_v12 = vld [vmem:[%s7413_s0 + $0x10] sm:$0xc]  ;;  %v5638_v15 = vld [vmem:[%s7412_s1 + $0x158] sm:$0xff]  ;;  %v5942_v17 = vor.u32 %v5941_v8, %v5940_v7 }
  0x16   :  { %118 = vmatpush.bf16.msra.mxu0 %v5603_v23  ;;  %v6186_v14 = vpack.c.b16 %v337_v1, %v337_v1  ;;  %v5654_v16 = vld [vmem:[%s7412_s1 + $0x1d8] sm:$0xff]  ;;  %v5645_v19 = vld [vmem:[%s7412_s1 + $0x190] sm:$0xff]  ;;  %v5945_v21 = vor.u32 %v5944_v12, %v5943_v11  ;;  %v531_v23 = vshll.u32 %v6109_v45, 16  ;;  %v5652_v40 = vld [vmem:[%s7412_s1 + $0x1c8] sm:$0xff] }
  0x17   :  { %194 = vmatpush.bf16.msra.mxu1 %v5595_v24  ;;  %v638_v18 = vpack.c.b16 %v636_v5, %v636_v5  ;;  %v5629_v20 = vld [vmem:[%s7412_s1 + $0x110] sm:$0xff]  ;;  %v644_v27 = vshll.u32 %v5942_v17, 16  ;;  %v5684_v61 = vld [vmem:[%s7412_s1 + $0x78] sm:$0xff]  ;;  %v5674_v7 = vld [vmem:[%s7412_s1 + $0x28] sm:$0xff] }
  0x18   :  { %295 = vmatpush.bf16.msra.mxu2 %v5611_v25  ;;  %v5637_v24 = vld [vmem:[%s7412_s1 + $0x150] sm:$0xff]  ;;  %v757_v33 = vshll.u32 %v5945_v21, 16  ;;  %v5692_v62 = vld [vmem:[%s7412_s1 + $0xb8] sm:$0xff]  ;;  %v5666_v8 = vld [vmem:[%s7412_s1 + $0x228] sm:$0xff] }
  0x19   :  { %395 = vmatpush.bf16.msra.mxu3 %v5620_v26  ;;  %v5653_v25 = vld [vmem:[%s7412_s1 + $0x1d0] sm:$0xff]  ;;  %v641_v26 = vshrl.u32 %v5942_v17, 16  ;;  %v5673_v11 = vld [vmem:[%s7412_s1 + $0x20] sm:$0xff]  ;;  %v3970_v12 = vld [vmem:[%s7413_s0 + $0x38] sm:$0x3] }
  0x1a   :  { %119 = vmatpush.bf16.msra.mxu0 %v5602_v29  ;;  %v649_v29 = vshrl.u32 %v638_v18, 16  ;;  %v5626_v63 = vld [vmem:[%s7413_s0 + $0x30] sm:$0xff]  ;;  %v437_v17 = vunpack.c.l.b16 %v3970_v12  ;;  %v4518_v12 = vld [vmem:[%s7413_s0 + $0x48] sm:$0xf]  ;;  %vm7159_vm5 = vmand %vm961_vm3, %vm962_vm4 }
  0x1b   :  { %195 = vmatpush.bf16.msra.mxu1 %v5594_v30  ;;  %v652_v30 = vshll.u32 %v638_v18, 16  ;;  %v643_v41 = vrot.slane %v641_v26, 2  ;;  %v5675_v0 = vld [vmem:[%s7412_s1 + $0x30] sm:$0xff]  ;;  %v5672_v18 = vld [vmem:[%s7412_s1 + $0x18] sm:$0xff] }
  0x1c   :  { %296 = vmatpush.bf16.msra.mxu2 %v5610_v31  ;;  %v5628_v31 = vld [vmem:[%s7412_s1 + $0x108] sm:$0xff]  ;;  %v5683_v5 = vld [vmem:[%s7412_s1 + $0x70] sm:$0xff] }
  0x1d   :  { %396 = vmatpush.bf16.msra.mxu3 %v5619_v32  ;;  %v754_v32 = vshrl.u32 %v5945_v21, 16  ;;  %v5680_v21 = vld [vmem:[%s7412_s1 + $0x58] sm:$0xff]  ;;  %v5663_v26 = vld [vmem:[%s7412_s1 + $0x210] sm:$0xff] }
  0x1e   :  { %120 = vmatpush.bf16.msra.mxu0 %v5601_v36  ;;  %v529_v36 = vshrl.u32 %v6109_v45, 16 }
  0x1f   :  { %196 = vmatpush.bf16.msra.mxu1 %v5593_v37  ;;  %v533_v37 = vrot.slane %v531_v23, 1  ;;  %v439_v23 = vpack.c.b16 %v437_v17, %v437_v17  ;;  %v5722_v17 = vld [vmem:[%s7412_s1 + $0x198] sm:$0xff] }
  0x20   :  { %297 = vmatpush.bf16.msra.mxu2 %v5609_v38  ;;  %v536_v38 = vshll.u32 %v6186_v14, 16 }
  0x21   :  { %397 = vmatpush.bf16.msra.mxu3 %v5618_v39  ;;  %121 = vmatmul.bf16.vlgmr.msra.gmra.mxu0 %v5939_v44  ;;  %v5636_v39 = vld [vmem:[%s7412_s1 + $0x148] sm:$0xff]  ;;  %v654_v44 = vrot.slane %v652_v30, 3  ;;  %v534_v55 = vor.u32 %v533_v37, %v529_v36 }
  0x22   :  { %490 = vmatpush.bf16.msrb.mxu0 %v5634_v43  ;;  %197 = vmatmul.bf16.vlgmr.msra.gmra.mxu1 %v5898_v22  ;;  %v752_v22 = vpack.c.b16 %v750_v9, %v750_v9  ;;  %v651_v43 = vrot.slane %v649_v29, 2  ;;  %v5682_v9 = vld [vmem:[%s7412_s1 + $0x68] sm:$0xff]  ;;  %v5687_v29 = vld [vmem:[%s7412_s1 + $0x90] sm:$0xff] }
  0x23   :  { %298 = vmatmul.bf16.vlgmr.msra.gmra.mxu2 %v236_v46  ;;  %593 = vmatpush.bf16.msrb.mxu1 %v5642_v47  ;;  %v5627_v46 = vld [vmem:[%s7412_s1 + $0x100] sm:$0xff]  ;;  %v756_v47 = vrot.slane %v754_v32, 2  ;;  %v5662_v32 = vld [vmem:[%s7412_s1 + $0x208] sm:$0xff] }
  0x24   :  { %707 = vmatpush.bf16.msrb.mxu2 %v5650_v42  ;;  %398 = vmatmul.bf16.vlgmr.msra.gmra.mxu3 %v6109_v45  ;;  %v762_v34 = vshrl.u32 %v752_v22, 16  ;;  %v765_v35 = vshll.u32 %v752_v22, 16  ;;  %v646_v42 = vrot.slane %v644_v27, 3  ;;  %v5643_v45 = vld [vmem:[%s7412_s1 + $0x180] sm:$0xff]  ;;  %v6241_v58 = vor.u32 %v654_v44, %v651_v43  ;;  %v5688_v22 = vld [vmem:[%s7412_s1 + $0x98] sm:$0xff]  ;;  %v5679_v27 = vld [vmem:[%s7412_s1 + $0x50] sm:$0xff] }
  0x25   :  { %820 = vmatpush.bf16.msrb.mxu3 %v5658_v48  ;;  %v759_v48 = vrot.slane %v757_v33, 3  ;;  %v4187_v33 = vld [vmem:[%s7413_s0] sm:$0x8]  ;;  %v5660_v36 = vld [vmem:[%s7413_s0 + $0x8] sm:$0x10]  ;;  %v5718_v44 = vld [vmem:[%s7412_s1 + $0x178] sm:$0xff] }
  0x26   :  { %491 = vmatpush.bf16.msrb.mxu0 %v5633_v50  ;;  %v767_v50 = vrot.slane %v765_v35, 3  ;;  %v4191_v35 = vld [vmem:[%s7413_s0 + $0x8] sm:$0xf] }
  0x27   :  { %594 = vmatpush.bf16.msrb.mxu1 %v5641_v51  ;;  %v5676_v51 = vld [vmem:[%s7412_s1 + $0x38] sm:$0xff]  ;;  %v5678_v37 = vld [vmem:[%s7412_s1 + $0x48] sm:$0xff]  ;;  %v4192_v43 = vor.u32 %v5660_v36, %v4191_v35 }
  0x28   :  { %708 = vmatpush.bf16.msrb.mxu2 %v5649_v49  ;;  %v764_v49 = vrot.slane %v762_v34, 2  ;;  %v5659_v34 = vld [vmem:[%s7413_s0] sm:$0xf0]  ;;  %v5720_v36 = vld [vmem:[%s7412_s1 + $0x188] sm:$0xff] }
  0x29   :  { %821 = vmatpush.bf16.msrb.mxu3 %v5657_v52  ;;  %v5668_v52 = vld [vmem:[%s7412_s1 + $0x238] sm:$0xff] }
  0x2a   :  { %492 = vmatpush.bf16.msrb.mxu0 %v5632_v54  ;;  %v5651_v54 = vld [vmem:[%s7412_s1 + $0x1c0] sm:$0xff] }
  0x2b   :  { %595 = vmatpush.bf16.msrb.mxu1 %v5640_v56  ;;  %v538_v56 = vrot.slane %v536_v38, 1  ;;  %v5686_v38 = vld [vmem:[%s7412_s1 + $0x88] sm:$0xff] }
  0x2c   :  { %709 = vmatpush.bf16.msrb.mxu2 %v5648_v53  ;;  %v5635_v53 = vld [vmem:[%s7412_s1 + $0x140] sm:$0xff] }
  0x2d   :  { %822 = vmatpush.bf16.msrb.mxu3 %v5656_v57  ;;  %v647_v57 = vor.u32 %v646_v42, %v643_v41  ;;  %v539_v1 = vsel %vm224_vm0, %v534_v55, %v538_v56  ;;  %v5669_v41 = vld [vmem:[%s7412_s1] sm:$0xff]  ;;  %v4188_v42 = vor.u32 %v5659_v34, %v4187_v33  ;;  %v5726_v55 = vld [vmem:[%s7412_s1 + $0x1b8] sm:$0xff]  ;;  %v5695_v33 = vld [vmem:[%s7412_s1 + $0xc8] sm:$0xff] }
  0x2e   :  { %493 = vmatpush.bf16.msrb.mxu0 %v5631_v60  ;;  %v6243_v60 = vor.u32 %v767_v50, %v764_v49 }
  0x2f   :  { %596 = vmatpush.bf16.msrb.mxu1 %v5639_v2  ;;  %v656_v2 = vsel %vm639_vm1, %v647_v57, %v6241_v58 }
  0x30   :  { %710 = vmatpush.bf16.msrb.mxu2 %v5647_v59  ;;  %v760_v59 = vor.u32 %v759_v48, %v756_v47  ;;  %v5685_v47 = vld [vmem:[%s7412_s1 + $0x80] sm:$0xff] }
  0x31   :  { %823 = vmatpush.bf16.msrb.mxu3 %v5655_v3  ;;  %126 = vmatmul.bf16.gmra.mxu0 %v62_v10  ;;  %v5667_v3 = vld [vmem:[%s7412_s1 + $0x230] sm:$0xff]  ;;  %v5690_v10 = vld [vmem:[%s7412_s1 + $0xa8] sm:$0xff] }
  0x32   :  { %494 = vmatpush.bf16.msrb.mxu0 %v5630_v6  ;;  %202 = vmatmul.bf16.gmra.mxu1 %v6070_v28  ;;  %v5644_v28 = vld [vmem:[%s7412_s1 + $0x188] sm:$0xff]  ;;  %v5691_v6 = vld [vmem:[%s7412_s1 + $0xb0] sm:$0xff] }
  0x33   :  { %303 = vmatmul.bf16.gmra.mxu2 %v239_v13  ;;  %597 = vmatpush.bf16.msrb.mxu1 %v5638_v15  ;;  %v5665_v13 = vld [vmem:[%s7412_s1 + $0x220] sm:$0xff] }
  0x34   :  { %711 = vmatpush.bf16.msrb.mxu2 %v5646_v4  ;;  %403 = vmatmul.bf16.gmra.mxu3 %v6186_v14  ;;  %v769_v4 = vsel %vm639_vm1, %v760_v59, %v6243_v60  ;;  %v5681_v15 = vld [vmem:[%s7412_s1 + $0x60] sm:$0xff]  ;;  %v5709_v59 = vld [vmem:[%s7412_s1 + $0x130] sm:$0xff] }
  0x35   :  { %824 = vmatpush.bf16.msrb.mxu3 %v5654_v16  ;;  %v5689_v16 = vld [vmem:[%s7412_s1 + $0xa0] sm:$0xff] }
  0x36   :  { %495 = vmatpush.bf16.msrb.mxu0 %v5629_v20  ;;  %v5664_v20 = vld [vmem:[%s7412_s1 + $0x218] sm:$0xff] }
  0x37   :  { %598 = vmatpush.bf16.msrb.mxu1 %v5637_v24  ;;  %v4227_v24 = vld [vmem:[%s7413_s0 + $0x48] sm:$0x3] }
  0x38   :  { %712 = vmatpush.bf16.msrb.mxu2 %v5645_v19  ;;  %v540_v19 = vshrl.u32 %v6186_v14, 16  ;;  %v5671_v14 = vld [vmem:[%s7412_s1 + $0x10] sm:$0xff]  ;;  %v1088_v30 = vunpack.c.l.b16 %v4227_v24 }
  0x39   :  { %825 = vmatpush.bf16.msrb.mxu3 %v5653_v25 }
  0x3a   :  { %496 = vmatpush.bf16.msrb.mxu0 %v5628_v31  ;;  %v542_v25 = vor.u32 %v540_v19, %v538_v56  ;;  %v5946_v31 = vld [vmem:[%s7413_s0 + $0x40] sm:$0xff]   ;;  %v5717_v56 = vld [vmem:[%s7412_s1 + $0x170] sm:$0xff]  ;;  %v4361_v19 = vld [vmem:[%s7413_s0 + $0x68] sm:$0x3] }
  0x3b   :  { %599 = vmatpush.bf16.msrb.mxu1 %v5636_v39  ;;  %v1178_v39 = vshll.u32 %v5946_v31, 16  ;;  %v1176_v48 = vshrl.u32 %v5946_v31, 16 }
  0x3c   :  { %713 = vmatpush.bf16.msrb.mxu2 %v5644_v28  ;;  %v5670_v28 = vld [vmem:[%s7412_s1 + $0x8] sm:$0xff] }
  0x3d   :  { %826 = vmatpush.bf16.msrb.mxu3 %v5652_v40  ;;  %v6355_v40 = vpack.c.b16 %v1088_v30, %v1088_v30  ;;  %v1180_v49 = vrot.slane %v1178_v39, 1  ;;  %v5712_v30 = vld [vmem:[%s7412_s1 + $0x148] sm:$0xff] }
  0x3e   :  { %497 = vmatpush.bf16.msrb.mxu0 %v5627_v46  ;;  %v5677_v46 = vld [vmem:[%s7412_s1 + $0x40] sm:$0xff] }
  0x3f   :  { %600 = vmatpush.bf16.msrb.mxu1 %v5635_v53  ;;  %v1183_v50 = vshll.u32 %v6355_v40, 16  ;;  %v873_v53 = vrot.slane %v4188_v42, 3  ;;  %v1181_v57 = vor.u32 %v1180_v49, %v1176_v48  ;;  %v5703_v42 = vld [vmem:[%s7412_s1 + $0x100] sm:$0xff] }
  0x40   :  { %714 = vmatpush.bf16.msrb.mxu2 %v5643_v45  ;;  %v5661_v45 = vld [vmem:[%s7412_s1 + $0x200] sm:$0xff] }
  0x41   :  { %827 = vmatpush.bf16.msrb.mxu3 %v5651_v54  ;;  %498 = vmatmul.bf16.vlgmr.msrb.gmra.mxu0 %v5626_v63  ;;  %v6379_v54 = vrot.slane %v4192_v43, 3  ;;  %v5760_v43 = vld [vmem:[%s7412_s1 + $0x78] sm:$0xff]  ;;  %v5719_v49 = vld [vmem:[%s7412_s1 + $0x180] sm:$0xff] }
  0x42   :  { %926 = vmatpush.bf16.msra.mxu0 %v5668_v52  ;;  %601 = vmatmul.bf16.vlgmr.msrb.gmra.mxu1 %v539_v1  ;;  %v5710_v52 = vld [vmem:[%s7412_s1 + $0x138] sm:$0xff]  ;;  %v5716_v1 = vld [vmem:[%s7412_s1 + $0x168] sm:$0xff] }
  0x43   :  { %1065 = vmatpush.bf16.msra.mxu1 %v5684_v61  ;;  %715 = vmatmul.bf16.vlgmr.msrb.gmra.mxu2 %v656_v2  ;;  %v5947_v61 = vld [vmem:[%s7413_s0 + $0x50] sm:$0xff]   ;;  %v5708_v2 = vld [vmem:[%s7412_s1 + $0x128] sm:$0xff] }
  0x44   :  { %1141 = vmatpush.bf16.msra.mxu2 %v5676_v51  ;;  %828 = vmatmul.bf16.vlgmr.msrb.gmra.mxu3 %v769_v4  ;;  %v5701_v51 = vld [vmem:[%s7412_s1 + $0xf8] sm:$0xff]  ;;  %v5724_v4 = vld [vmem:[%s7412_s1 + $0x1a8] sm:$0xff] }
  0x45   :  { %1240 = vmatpush.bf16.msra.mxu3 %v5692_v62  ;;  %v5700_v62 = vld [vmem:[%s7412_s1 + $0xf0] sm:$0xff] }
  0x46   :  { %927 = vmatpush.bf16.msra.mxu0 %v5667_v3  ;;  %v5699_v3 = vld [vmem:[%s7412_s1 + $0xe8] sm:$0xff] }
  0x47   :  { %1066 = vmatpush.bf16.msra.mxu1 %v5683_v5  ;;  %v5715_v5 = vld [vmem:[%s7412_s1 + $0x160] sm:$0xff] }
  0x48   :  { %1142 = vmatpush.bf16.msra.mxu2 %v5675_v0  ;;  %v5725_v0 = vld [vmem:[%s7412_s1 + $0x1b0] sm:$0xff] }
  0x49   :  { %1241 = vmatpush.bf16.msra.mxu3 %v5691_v6  ;;  %v5707_v6 = vld [vmem:[%s7412_s1 + $0x120] sm:$0xff] }
  0x4a   :  { %928 = vmatpush.bf16.msra.mxu0 %v5666_v8  ;;  %v4230_v8 = vld [vmem:[%s7413_s0 + $0x58] sm:$0x3] }
  0x4b   :  { %1067 = vmatpush.bf16.msra.mxu1 %v5682_v9  ;;  %v5723_v9 = vld [vmem:[%s7412_s1 + $0x1a0] sm:$0xff] }
  0x4c   :  { %1143 = vmatpush.bf16.msra.mxu2 %v5674_v7  ;;  %v5698_v7 = vld [vmem:[%s7412_s1 + $0xe0] sm:$0xff] }
  0x4d   :  { %1242 = vmatpush.bf16.msra.mxu3 %v5690_v10  ;;  %v5714_v10 = vld [vmem:[%s7412_s1 + $0x158] sm:$0xff] }
  0x4e   :  { %929 = vmatpush.bf16.msra.mxu0 %v5665_v13  ;;  %v1012_v13 = vunpack.c.l.b16 %v4230_v8  ;;  %v5731_v8 = vld [vmem:[%s7412_s1 + $0x1e0] sm:$0xff] }
  0x4f   :  { %1068 = vmatpush.bf16.msra.mxu1 %v5681_v15  ;;  %v1187_v15 = vshrl.u32 %v6355_v40, 16 }
  0x50   :  { %1144 = vmatpush.bf16.msra.mxu2 %v5673_v11  ;;  %v5706_v11 = vld [vmem:[%s7412_s1 + $0x118] sm:$0xff] }
  0x51   :  { %1243 = vmatpush.bf16.msra.mxu3 %v5689_v16  ;;  %503 = vmatmul.bf16.gmra.mxu0 %v439_v23  ;;  %v5697_v16 = vld [vmem:[%s7412_s1 + $0xd8] sm:$0xff]  ;;  %v5949_v23 = vld [vmem:[%s7413_s0 + $0x40] sm:$0xc] }
  0x52   :  { %930 = vmatpush.bf16.msra.mxu0 %v5664_v20  ;;  %606 = vmatmul.bf16.gmra.mxu1 %v542_v25  ;;  %v1582_v20 = vunpack.c.l.b16 %v4518_v12  ;;  %v5696_v25 = vld [vmem:[%s7412_s1 + $0xd0] sm:$0xff]  ;;  %v5756_v12 = vld [vmem:[%s7412_s1 + $0x58] sm:$0xff] }
  0x53   :  { %1069 = vmatpush.bf16.msra.mxu1 %v5680_v21  ;;  %720 = vmatmul.bf16.gmra.mxu2 %v6241_v58  ;;  %v1185_v58 = vrot.slane %v1183_v50, 1  ;;  %v5705_v21 = vld [vmem:[%s7412_s1 + $0x110] sm:$0xff] }
  0x54   :  { %1145 = vmatpush.bf16.msra.mxu2 %v5672_v18  ;;  %833 = vmatmul.bf16.gmra.mxu3 %v6243_v60  ;;  %v875_v60 = vsel %vm872_vm2, %v873_v53, %v6379_v54  ;;  %v5713_v18 = vld [vmem:[%s7412_s1 + $0x150] sm:$0xff] }
  0x55   :  { %1244 = vmatpush.bf16.msra.mxu3 %v5688_v22  ;;  %v1186_v63 = vsel %vm224_vm0, %v1181_v57, %v1185_v58  ;;  %v5948_v22 = vld [vmem:[%s7413_s0 + $0x40] sm:$0xf0]  ;;  %v1189_v24 = vor.u32 %v1187_v15, %v1185_v58  ;;  %v5743_v57 = vld [vmem:[%s7412_s1 + $0x230] sm:$0xff]  ;;  %v5730_v15 = vld [vmem:[%s7412_s1 + $0x1d8] sm:$0xff] }
  0x56   :  { %931 = vmatpush.bf16.msra.mxu0 %v5663_v26  ;;  %v6466_v26 = vld [vmem:[%s7413_s0 + $0x60] sm:$0xff] }
  0x57   :  { %1070 = vmatpush.bf16.msra.mxu1 %v5679_v27  ;;  %v1286_v27 = vunpack.c.l.b16 %v4361_v19  ;;  %v1478_v35 = vshll.u32 %v6466_v26, 16 }
  0x58   :  { %1146 = vmatpush.bf16.msra.mxu2 %v5671_v14  ;;  %v1014_v14 = vpack.c.b16 %v1012_v13, %v1012_v13  ;;  %v4568_v13 = vld [vmem:[%s7413_s0 + $0x58] sm:$0xf] }
  0x59   :  { %1245 = vmatpush.bf16.msra.mxu3 %v5687_v29  ;;  %v5721_v29 = vld [vmem:[%s7412_s1 + $0x190] sm:$0xff]  ;;  %v6482_v34 = vpack.c.b16 %v1286_v27, %v1286_v27 }
  0x5a   :  { %932 = vmatpush.bf16.msra.mxu0 %v5662_v32  ;;  %v5704_v32 = vld [vmem:[%s7412_s1 + $0x108] sm:$0xff] }
  0x5b   :  { %1071 = vmatpush.bf16.msra.mxu1 %v5678_v37  ;;  %v5711_v37 = vld [vmem:[%s7412_s1 + $0x140] sm:$0xff]  ;;  %v1483_v48 = vshll.u32 %v6482_v34, 16  ;;  %v1487_v19 = vshrl.u32 %v6482_v34, 16 }
  0x5c   :  { %1147 = vmatpush.bf16.msra.mxu2 %v5670_v28  ;;  %v5950_v28 = vor.u32 %v5949_v23, %v5948_v22  ;;  %v5951_v22 = vld [vmem:[%s7413_s0 + $0x50] sm:$0xf0]  ;;  %v5952_v23 = vld [vmem:[%s7413_s0 + $0x50] sm:$0xc] }
  0x5d   :  { %1246 = vmatpush.bf16.msra.mxu3 %v5686_v38 }
  0x5e   :  { %933 = vmatpush.bf16.msra.mxu0 %v5661_v45  ;;  %v1586_v38 = vshrl.u32 %v5950_v28, 16  ;;  %v1589_v39 = vshll.u32 %v5950_v28, 16  ;;  %v5694_v45 = vld [vmem:[%s7412_s1 + $0xc0] sm:$0xff]  ;;  %v5754_v28 = vld [vmem:[%s7412_s1 + $0x48] sm:$0xff] }
  0x5f   :  { %1072 = vmatpush.bf16.msra.mxu1 %v5677_v46  ;;  %v1476_v46 = vshrl.u32 %v6466_v26, 16 }
  0x60   :  { %1148 = vmatpush.bf16.msra.mxu2 %v5669_v41  ;;  %v1588_v50 = vrot.slane %v1586_v38, 2 }
  0x61   :  { %1247 = vmatpush.bf16.msra.mxu3 %v5685_v47  ;;  %934 = vmatmul.bf16.vlgmr.msra.gmra.mxu0 %v875_v60  ;;  %v1480_v47 = vrot.slane %v1478_v35, 1  ;;  %v5753_v35 = vld [vmem:[%s7412_s1 + $0x40] sm:$0xff] }
  0x62   :  { %1339 = vmatpush.bf16.msrb.mxu0 %v5701_v51  ;;  %1073 = vmatmul.bf16.vlgmr.msra.gmra.mxu1 %v5947_v61  ;;  %v1591_v51 = vrot.slane %v1589_v39, 3 }
  0x63   :  { %1438 = vmatpush.bf16.msrb.mxu1 %v5710_v52  ;;  %1149 = vmatmul.bf16.vlgmr.msra.gmra.mxu2 %v5946_v31  ;;  %v1584_v31 = vpack.c.b16 %v1582_v20, %v1582_v20  ;;  %v1481_v58 = vor.u32 %v1480_v47, %v1476_v46  ;;  %v1694_v20 = vunpack.c.l.b16 %v4568_v13  ;;  %v5786_v46 = vld [vmem:[%s7412_s1 + $0x138] sm:$0xff]  ;;  %v5791_v13 = vld [vmem:[%s7412_s1 + $0x160] sm:$0xff] }
  0x64   :  { %1540 = vmatpush.bf16.msrb.mxu2 %v5718_v44  ;;  %1248 = vmatmul.bf16.vlgmr.msra.gmra.mxu3 %v1186_v63  ;;  %v5744_v44 = vld [vmem:[%s7412_s1 + $0x238] sm:$0xff]  ;;  %v1592_v60 = vor.u32 %v1591_v51, %v1588_v50  ;;  %v5751_v63 = vld [vmem:[%s7412_s1 + $0x30] sm:$0xff] }
  0x65   :  { %1652 = vmatpush.bf16.msrb.mxu3 %v5726_v55  ;;  %v1597_v41 = vshll.u32 %v1584_v31, 16  ;;  %v5752_v55 = vld [vmem:[%s7412_s1 + $0x38] sm:$0xff] }
  0x66   :  { %1340 = vmatpush.bf16.msrb.mxu0 %v5700_v62  ;;  %v5733_v62 = vld [vmem:[%s7412_s1 + $0x1f0] sm:$0xff]  ;;  %v5768_v51 = vld [vmem:[%s7412_s1 + $0xb8] sm:$0xff] }
  0x67   :  { %1439 = vmatpush.bf16.msrb.mxu1 %v5709_v59  ;;  %v1599_v53 = vrot.slane %v1597_v41, 3  ;;  %v1485_v59 = vrot.slane %v1483_v48, 1  ;;  %v4643_v41 = vld [vmem:[%s7413_s0 + $0x48] sm:$0xf] }
  0x68   :  { %1541 = vmatpush.bf16.msrb.mxu2 %v5717_v56  ;;  %v5759_v56 = vld [vmem:[%s7412_s1 + $0x70] sm:$0xff] }
  0x69   :  { %1653 = vmatpush.bf16.msrb.mxu3 %v5725_v0  ;;  %v5702_v0 = vld [vmem:[%s7413_s0 + $0x70] sm:$0xff]  ;;  %v1489_v27 = vor.u32 %v1487_v19, %v1485_v59 }
  0x6a   :  { %1341 = vmatpush.bf16.msrb.mxu0 %v5699_v3 }
  0x6b   :  { %1440 = vmatpush.bf16.msrb.mxu1 %v5708_v2  ;;  %v5758_v2 = vld [vmem:[%s7412_s1 + $0x68] sm:$0xff] }
  0x6c   :  { %1542 = vmatpush.bf16.msrb.mxu2 %v5716_v1  ;;  %v1486_v1 = vsel %vm224_vm0, %v1481_v58, %v1485_v59  ;;  %v5767_v59 = vld [vmem:[%s7412_s1 + $0xb0] sm:$0xff] }
  0x6d   :  { %1654 = vmatpush.bf16.msrb.mxu3 %v5724_v4  ;;  %v5732_v4 = vld [vmem:[%s7412_s1 + $0x1e8] sm:$0xff] }
  0x6e   :  { %1342 = vmatpush.bf16.msrb.mxu0 %v5698_v7  ;;  %v5757_v7 = vld [vmem:[%s7412_s1 + $0x60] sm:$0xff] }
  0x6f   :  { %1441 = vmatpush.bf16.msrb.mxu1 %v5707_v6  ;;  %v5750_v6 = vld [vmem:[%s7412_s1 + $0x28] sm:$0xff] }
  0x70   :  { %1543 = vmatpush.bf16.msrb.mxu2 %v5715_v5  ;;  %v5742_v5 = vld [vmem:[%s7412_s1 + $0x228] sm:$0xff] }
  0x71   :  { %1655 = vmatpush.bf16.msrb.mxu3 %v5723_v9  ;;  %939 = vmatmul.bf16.gmra.mxu0 %v6379_v54  ;;  %v5734_v54 = vld [vmem:[%s7412_s1 + $0x1f8] sm:$0xff]  ;;  %v5741_v9 = vld [vmem:[%s7412_s1 + $0x220] sm:$0xff] }
  0x72   :  { %1343 = vmatpush.bf16.msrb.mxu0 %v5697_v16  ;;  %1078 = vmatmul.bf16.gmra.mxu1 %v1014_v14  ;;  %v5740_v16 = vld [vmem:[%s7412_s1 + $0x218] sm:$0xff]  ;;  %v5729_v14 = vld [vmem:[%s7412_s1 + $0x1d0] sm:$0xff] }
  0x73   :  { %1442 = vmatpush.bf16.msrb.mxu1 %v5706_v11  ;;  %1154 = vmatmul.bf16.gmra.mxu2 %v6355_v40  ;;  %v1594_v40 = vshrl.u32 %v1584_v31, 16  ;;  %v4416_v11 = vld [vmem:[%s7413_s0 + $0x78] sm:$0x3]  ;;  %v5728_v31 = vld [vmem:[%s7412_s1 + $0x1c8] sm:$0xff] }
  0x74   :  { %1544 = vmatpush.bf16.msrb.mxu2 %v5714_v10  ;;  %1253 = vmatmul.bf16.gmra.mxu3 %v1189_v24  ;;  %v5749_v10 = vld [vmem:[%s7412_s1 + $0x20] sm:$0xff]  ;;  %v5739_v24 = vld [vmem:[%s7412_s1 + $0x210] sm:$0xff] }
  0x75   :  { %1656 = vmatpush.bf16.msrb.mxu3 %v5722_v17  ;;  %v1596_v52 = vrot.slane %v1594_v40, 2  ;;  %v5748_v17 = vld [vmem:[%s7412_s1 + $0x18] sm:$0xff]  ;;  %v5735_v40 = vld [vmem:[%s7413_s0 + $0x40] sm:$0xf0] }
  0x76   :  { %1344 = vmatpush.bf16.msrb.mxu0 %v5696_v25  ;;  %v5747_v25 = vld [vmem:[%s7412_s1 + $0x10] sm:$0xff] }
  0x77   :  { %1443 = vmatpush.bf16.msrb.mxu1 %v5705_v21  ;;  %v6520_v61 = vor.u32 %v1599_v53, %v1596_v52  ;;  %v5755_v21 = vld [vmem:[%s7412_s1 + $0x50] sm:$0xff]  ;;  %v5777_v52 = vld [vmem:[%s7412_s1 + $0xf8] sm:$0xff] }
  0x78   :  { %1545 = vmatpush.bf16.msrb.mxu2 %v5713_v18  ;;  %v1385_v18 = vunpack.c.l.b16 %v4416_v11  ;;  %v5765_v11 = vld [vmem:[%s7412_s1 + $0xa0] sm:$0xff] }
  0x79   :  { %1657 = vmatpush.bf16.msrb.mxu3 %v5721_v29  ;;  %v1601_v3 = vsel %vm639_vm1, %v1592_v60, %v6520_v61  ;;  %v5953_v29 = vor.u32 %v5952_v23, %v5951_v22  ;;  %v5776_v60 = vld [vmem:[%s7412_s1 + $0xf0] sm:$0xff]  ;;  %v4683_v22 = vld [vmem:[%s7413_s0 + $0x88] sm:$0x3]  ;;  %v5773_v23 = vld [vmem:[%s7412_s1 + $0xd8] sm:$0xff] }
  0x7a   :  { %1345 = vmatpush.bf16.msrb.mxu0 %v5695_v33  ;;  %v5746_v33 = vld [vmem:[%s7412_s1 + $0x8] sm:$0xff] }
  0x7b   :  { %1444 = vmatpush.bf16.msrb.mxu1 %v5704_v32  ;;  %v5738_v32 = vld [vmem:[%s7412_s1 + $0x208] sm:$0xff] }
  0x7c   :  { %1546 = vmatpush.bf16.msrb.mxu2 %v5712_v30  ;;  %v1696_v30 = vpack.c.b16 %v1694_v20, %v1694_v20  ;;  %v4686_v20 = vld [vmem:[%s7413_s0 + $0x98] sm:$0x3] }
  0x7d   :  { %1658 = vmatpush.bf16.msrb.mxu3 %v5720_v36  ;;  %v1698_v36 = vshrl.u32 %v5953_v29, 16 }
  0x7e   :  { %1346 = vmatpush.bf16.msrb.mxu0 %v5694_v45  ;;  %v1706_v38 = vshrl.u32 %v1696_v30, 16  ;;  %v1709_v39 = vshll.u32 %v1696_v30, 16  ;;  %v5745_v45 = vld [vmem:[%s7412_s1] sm:$0xff]  ;;  %v5789_v30 = vld [vmem:[%s7412_s1 + $0x150] sm:$0xff] }
  0x7f   :  { %1445 = vmatpush.bf16.msrb.mxu1 %v5703_v42  ;;  %v5727_v42 = vld [vmem:[%s7412_s1 + $0x1c0] sm:$0xff]  ;;  %v1700_v47 = vrot.slane %v1698_v36, 2 }
  0x80   :  { %1547 = vmatpush.bf16.msrb.mxu2 %v5711_v37  ;;  %v1701_v37 = vshll.u32 %v5953_v29, 16  ;;  %v1711_v50 = vrot.slane %v1709_v39, 3  ;;  %v5772_v29 = vld [vmem:[%s7412_s1 + $0xd0] sm:$0xff]  ;;  %v5762_v39 = vld [vmem:[%s7412_s1 + $0x88] sm:$0xff] }
  0x81   :  { %1659 = vmatpush.bf16.msrb.mxu3 %v5719_v49  ;;  %1347 = vmatmul.bf16.vlgmr.msrb.gmra.mxu0 %v6466_v26  ;;  %v1387_v26 = vpack.c.b16 %v1385_v18, %v1385_v18  ;;  %v1708_v49 = vrot.slane %v1706_v38, 2 }
  0x82   :  { %1764 = vmatpush.bf16.msra.mxu0 %v5734_v54  ;;  %1446 = vmatmul.bf16.vlgmr.msrb.gmra.mxu1 %v5702_v0  ;;  %v1703_v48 = vrot.slane %v1701_v37, 3  ;;  %v5784_v0 = vld [vmem:[%s7412_s1 + $0x128] sm:$0xff] }
  0x83   :  { %1868 = vmatpush.bf16.msra.mxu1 %v5744_v44  ;;  %1548 = vmatmul.bf16.vlgmr.msrb.gmra.mxu2 %v1486_v1  ;;  %v5736_v44 = vld [vmem:[%s7413_s0 + $0x48] sm:$0x10]  ;;  %v6649_v58 = vor.u32 %v1711_v50, %v1708_v49 }
  0x84   :  { %2002 = vmatpush.bf16.msra.mxu2 %v5760_v43  ;;  %1660 = vmatmul.bf16.vlgmr.msrb.gmra.mxu3 %v1601_v3  ;;  %v5737_v43 = vld [vmem:[%s7412_s1 + $0x200] sm:$0xff]  ;;  %v4644_v54 = vor.u32 %v5736_v44, %v4643_v41 }
  0x85   :  { %2078 = vmatpush.bf16.msra.mxu3 %v5752_v55  ;;  %v5794_v55 = vld [vmem:[%s7412_s1 + $0x178] sm:$0xff]  ;;  %v6769_v41 = vld [vmem:[%s7413_s0 + $0xa0] sm:$0xff] }
  0x86   :  { %1765 = vmatpush.bf16.msra.mxu0 %v5733_v62  ;;  %v6657_v62 = vrot.slane %v4644_v54, 3  ;;  %v2415_v50 = vshll.u32 %v6769_v41, 16  ;;  %v5810_v54 = vld [vmem:[%s7412_s1 + $0x1f8] sm:$0xff] }
  0x87   :  { %1869 = vmatpush.bf16.msra.mxu1 %v5743_v57  ;;  %v1704_v57 = vor.u32 %v1703_v48, %v1700_v47  ;;  %v5770_v47 = vld [vmem:[%s7412_s1 + $0xc0] sm:$0xff] }
  0x88   :  { %2003 = vmatpush.bf16.msra.mxu2 %v5759_v56  ;;  %v5785_v56 = vld [vmem:[%s7412_s1 + $0x130] sm:$0xff]  ;;  %v5787_v48 = vld [vmem:[%s7412_s1 + $0x140] sm:$0xff] }
  0x89   :  { %2079 = vmatpush.bf16.msra.mxu3 %v5751_v63  ;;  %v5793_v63 = vld [vmem:[%s7412_s1 + $0x170] sm:$0xff]  ;;  %v1713_v3 = vsel %vm639_vm1, %v1704_v57, %v6649_v58 }
  0x8a   :  { %1766 = vmatpush.bf16.msra.mxu0 %v5732_v4 }
  0x8b   :  { %1870 = vmatpush.bf16.msra.mxu1 %v5742_v5  ;;  %v5955_v5 = vld [vmem:[%s7413_s0 + $0x90] sm:$0xff]  }
  0x8c   :  { %2004 = vmatpush.bf16.msra.mxu2 %v5758_v2 }
  0x8d   :  { %2080 = vmatpush.bf16.msra.mxu3 %v5750_v6  ;;  %v5766_v6 = vld [vmem:[%s7412_s1 + $0xa8] sm:$0xff] }
  0x8e   :  { %1767 = vmatpush.bf16.msra.mxu0 %v5731_v8  ;;  %v5775_v8 = vld [vmem:[%s7412_s1 + $0xe8] sm:$0xff] }
  0x8f   :  { %1871 = vmatpush.bf16.msra.mxu1 %v5741_v9  ;;  %v5792_v9 = vld [vmem:[%s7412_s1 + $0x168] sm:$0xff] }
  0x90   :  { %2005 = vmatpush.bf16.msra.mxu2 %v5757_v7  ;;  %v6682_v7 = vld [vmem:[%s7413_s0 + $0x80] sm:$0xff]  }
  0x91   :  { %2081 = vmatpush.bf16.msra.mxu3 %v5749_v10  ;;  %1352 = vmatmul.bf16.gmra.mxu0 %v6482_v34  ;;  %v4639_v34 = vld [vmem:[%s7413_s0 + $0x40] sm:$0x8]  ;;  %v2115_v44 = vshll.u32 %v6682_v7, 16 }
  0x92   :  { %1768 = vmatpush.bf16.msra.mxu0 %v5730_v15  ;;  %1451 = vmatmul.bf16.gmra.mxu1 %v1387_v26  ;;  %v4640_v53 = vor.u32 %v5735_v40, %v4639_v34  ;;  %v5783_v10 = vld [vmem:[%s7412_s1 + $0x120] sm:$0xff]  ;;  %v2025_v26 = vunpack.c.l.b16 %v4683_v22  ;;  %v5771_v34 = vld [vmem:[%s7412_s1 + $0xc8] sm:$0xff] }
  0x93   :  { %1872 = vmatpush.bf16.msra.mxu1 %v5740_v16  ;;  %1553 = vmatmul.bf16.gmra.mxu2 %v1489_v27  ;;  %v5763_v27 = vld [vmem:[%s7412_s1 + $0x90] sm:$0xff]  ;;  %v5788_v40 = vld [vmem:[%s7412_s1 + $0x148] sm:$0xff] }
  0x94   :  { %2006 = vmatpush.bf16.msra.mxu2 %v5756_v12  ;;  %1665 = vmatmul.bf16.gmra.mxu3 %v6520_v61  ;;  %v1815_v61 = vrot.slane %v4640_v53, 3  ;;  %v5774_v12 = vld [vmem:[%s7412_s1 + $0xe0] sm:$0xff]  ;;  %v6755_v38 = vpack.c.b16 %v2025_v26, %v2025_v26  ;;  %v5802_v53 = vld [vmem:[%s7412_s1 + $0x1b8] sm:$0xff] }
  0x95   :  { %2082 = vmatpush.bf16.msra.mxu3 %v5748_v17  ;;  %v5782_v17 = vld [vmem:[%s7412_s1 + $0x118] sm:$0xff]  ;;  %v5807_v26 = vld [vmem:[%s7412_s1 + $0x1e0] sm:$0xff] }
  0x96   :  { %1769 = vmatpush.bf16.msra.mxu0 %v5729_v14  ;;  %v1817_v4 = vsel %vm872_vm2, %v1815_v61, %v6657_v62  ;;  %v5790_v14 = vld [vmem:[%s7412_s1 + $0x158] sm:$0xff]  ;;  %v5819_v61 = vld [vmem:[%s7412_s1 + $0x230] sm:$0xff] }
  0x97   :  { %1873 = vmatpush.bf16.msra.mxu1 %v5739_v24  ;;  %v5781_v24 = vld [vmem:[%s7412_s1 + $0x110] sm:$0xff] }
  0x98   :  { %2007 = vmatpush.bf16.msra.mxu2 %v5755_v21  ;;  %v5764_v21 = vld [vmem:[%s7412_s1 + $0x98] sm:$0xff] }
  0x99   :  { %2083 = vmatpush.bf16.msra.mxu3 %v5747_v25  ;;  %v1949_v25 = vunpack.c.l.b16 %v4686_v20 }
  0x9a   :  { %1770 = vmatpush.bf16.msra.mxu0 %v5728_v31 }
  0x9b   :  { %1874 = vmatpush.bf16.msra.mxu1 %v5738_v32  ;;  %v5780_v32 = vld [vmem:[%s7412_s1 + $0x108] sm:$0xff]  ;;  %v1951_v37 = vpack.c.b16 %v1949_v25, %v1949_v25  ;;  %v5817_v25 = vld [vmem:[%s7412_s1 + $0x220] sm:$0xff] }
  0x9c   :  { %2008 = vmatpush.bf16.msra.mxu2 %v5754_v28 }
  0x9d   :  { %2084 = vmatpush.bf16.msra.mxu3 %v5746_v33  ;;  %v4817_v33 = vld [vmem:[%s7413_s0 + $0xa8] sm:$0x3] }
  0x9e   :  { %1771 = vmatpush.bf16.msra.mxu0 %v5727_v42  ;;  %v6665_v1 = vpop.f32.mrf.mxu0  ;;  %v2223_v42 = vunpack.c.l.b16 %v4817_v33  ;;  %v5806_v33 = vld [vmem:[%s7412_s1 + $0x1d8] sm:$0xff] }
  0x9f   :  { %1875 = vmatpush.bf16.msra.mxu1 %v5737_v43  ;;  %v6667_v2 = vpop.f32.mrf.mxu1  ;;  %v5779_v43 = vld [vmem:[%s7412_s1 + $0x100] sm:$0xff] }
  0xa0   :  { %2009 = vmatpush.bf16.msra.mxu2 %v5753_v35  ;;  %v6790_v49 = vpack.c.b16 %v2223_v42, %v2223_v42  ;;  %v5798_v42 = vld [vmem:[%s7412_s1 + $0x198] sm:$0xff] }
  0xa1   :  { %2085 = vmatpush.bf16.msra.mxu3 %v5745_v45  ;;  %1772 = vmatmul.bf16.vlgmr.msra.gmra.mxu0 %v1713_v3  ;;  %v5820_v45 = vld [vmem:[%s7412_s1 + $0x238] sm:$0xff]  ;;  %v5801_v3 = vld [vmem:[%s7412_s1 + $0x1b0] sm:$0xff] }
  0xa2   :  { %2177 = vmatpush.bf16.msrb.mxu0 %v5768_v51  ;;  %1876 = vmatmul.bf16.vlgmr.msra.gmra.mxu1 %v1817_v4  ;;  %v5809_v4 = vld [vmem:[%s7412_s1 + $0x1f0] sm:$0xff] }
  0xa3   :  { %2276 = vmatpush.bf16.msrb.mxu1 %v5777_v52  ;;  %2010 = vmatmul.bf16.vlgmr.msra.gmra.mxu2 %v5955_v5 }
  0xa4   :  { %2375 = vmatpush.bf16.msrb.mxu2 %v5786_v46  ;;  %2086 = vmatmul.bf16.vlgmr.msra.gmra.mxu3 %v6682_v7  ;;  %v5761_v46 = vld [vmem:[%s7412_s1 + $0x80] sm:$0xff] }
  0xa5   :  { %2477 = vmatpush.bf16.msrb.mxu3 %v5794_v55  ;;  %v2113_v55 = vshrl.u32 %v6682_v7, 16  ;;  %v5835_v7 = vld [vmem:[%s7412_s1 + $0x70] sm:$0xff] }
  0xa6   :  { %2178 = vmatpush.bf16.msrb.mxu0 %v5767_v59  ;;  %v6703_v15 = vpop.f32.mrf.mxu2  ;;  %v6710_v18 = vpop.f32.mrf.mxu0  ;;  %v2120_v59 = vshll.u32 %v6755_v38, 16 }
  0xa7   :  { %2277 = vmatpush.bf16.msrb.mxu1 %v5776_v60  ;;  %v6705_v16 = vpop.f32.mrf.mxu3  ;;  %v6712_v19 = vpop.f32.mrf.mxu1  ;;  %v5836_v60 = vld [vmem:[%s7412_s1 + $0x78] sm:$0xff] }
  0xa8   :  { %2376 = vmatpush.bf16.msrb.mxu2 %v5785_v56  ;;  %v2117_v56 = vrot.slane %v2115_v44, 1  ;;  %v5815_v44 = vld [vmem:[%s7412_s1 + $0x210] sm:$0xff] }
  0xa9   :  { %2478 = vmatpush.bf16.msrb.mxu3 %v5793_v63  ;;  %v2417_v63 = vrot.slane %v2415_v50, 1 }
  0xaa   :  { %2179 = vmatpush.bf16.msrb.mxu0 %v5766_v6  ;;  %v2118_v5 = vor.u32 %v2117_v56, %v2113_v55  ;;  %v6819_v6 = vrot.slane %v2120_v59, 1  ;;  %v2424_v55 = vshrl.u32 %v6790_v49, 16  ;;  %v5959_v56 = vld [vmem:[%s7413_s0 + $0x90] sm:$0xf0] }
  0xab   :  { %2278 = vmatpush.bf16.msrb.mxu1 %v5775_v8  ;;  %v5818_v8 = vld [vmem:[%s7412_s1 + $0x228] sm:$0xff]  ;;  %v5831_v59 = vld [vmem:[%s7412_s1 + $0x50] sm:$0xff] }
  0xac   :  { %2377 = vmatpush.bf16.msrb.mxu2 %v5784_v0  ;;  %v2420_v0 = vshll.u32 %v6790_v49, 16  ;;  %v2123_v20 = vsel %vm224_vm0, %v2118_v5, %v6819_v6 }
  0xad   :  { %2479 = vmatpush.bf16.msrb.mxu3 %v5792_v9 }
  0xae   :  { %2180 = vmatpush.bf16.msrb.mxu0 %v5765_v11  ;;  %v6741_v28 = vpop.f32.mrf.mxu2  ;;  %v6751_v35 = vpop.f32.mrf.mxu0 }
  0xaf   :  { %2279 = vmatpush.bf16.msrb.mxu1 %v5774_v12  ;;  %v6743_v31 = vpop.f32.mrf.mxu3  ;;  %v6753_v36 = vpop.f32.mrf.mxu1 }
  0xb0   :  { %2378 = vmatpush.bf16.msrb.mxu2 %v5783_v10  ;;  %v6827_v10 = vrot.slane %v2420_v0, 1 }
  0xb1   :  { %2480 = vmatpush.bf16.msrb.mxu3 %v5791_v13  ;;  %1777 = vmatmul.bf16.gmra.mxu0 %v6649_v58  ;;  %v5808_v13 = vld [vmem:[%s7412_s1 + $0x1e8] sm:$0xff] }
  0xb2   :  { %2181 = vmatpush.bf16.msrb.mxu0 %v5764_v21  ;;  %1881 = vmatmul.bf16.gmra.mxu1 %v6657_v62  ;;  %v2413_v62 = vshrl.u32 %v6769_v41, 16  ;;  %v5778_v21 = vld [vmem:[%s7413_s0 + $0xb0] sm:$0xff] }
  0xb3   :  { %2280 = vmatpush.bf16.msrb.mxu1 %v5773_v23  ;;  %2015 = vmatmul.bf16.gmra.mxu2 %v1951_v37  ;;  %v5800_v23 = vld [vmem:[%s7412_s1 + $0x1a8] sm:$0xff] }
  0xb4   :  { %2379 = vmatpush.bf16.msrb.mxu2 %v5782_v17  ;;  %2091 = vmatmul.bf16.gmra.mxu3 %v6755_v38  ;;  %v2418_v9 = vor.u32 %v2417_v63, %v2413_v62  ;;  %v5804_v63 = vld [vmem:[%s7412_s1 + $0x1c8] sm:$0xff] }
  0xb5   :  { %2481 = vmatpush.bf16.msrb.mxu3 %v5790_v14 }
  0xb6   :  { %2182 = vmatpush.bf16.msrb.mxu0 %v5763_v27  ;;  %v6793_v51 = vpop.f32.mrf.mxu2  ;;  %v129_v57 = vpop.f32.mrf.mxu0  ;;  %v2423_v14 = vsel %vm224_vm0, %v2418_v9, %v6827_v10  ;;  %v5799_v27 = vld [vmem:[%s7412_s1 + $0x1a0] sm:$0xff] }
  0xb7   :  { %2281 = vmatpush.bf16.msrb.mxu1 %v5772_v29  ;;  %v6795_v52 = vpop.f32.mrf.mxu3  ;;  %v205_v58 = vpop.f32.mrf.mxu1  ;;  %v5833_v29 = vld [vmem:[%s7412_s1 + $0x60] sm:$0xff]  ;;  %v5960_v57 = vld [vmem:[%s7413_s0 + $0x90] sm:$0xc] }
  0xb8   :  { %2380 = vmatpush.bf16.msrb.mxu2 %v5781_v24  ;;  %v5834_v24 = vld [vmem:[%s7412_s1 + $0x68] sm:$0xff]  ;;  %v5961_v9 = vor.u32 %v5960_v57, %v5959_v56 }
  0xb9   :  { %2482 = vmatpush.bf16.msrb.mxu3 %v5789_v30  ;;  %v5816_v30 = vld [vmem:[%s7412_s1 + $0x218] sm:$0xff] }
  0xba   :  { %2183 = vmatpush.bf16.msrb.mxu0 %v5762_v39 }
  0xbb   :  { %2282 = vmatpush.bf16.msrb.mxu1 %v5771_v34  ;;  %v4974_v34 = vld [vmem:[%s7413_s0 + $0x88] sm:$0xf] }
  0xbc   :  { %2381 = vmatpush.bf16.msrb.mxu2 %v5780_v32 }
  0xbd   :  { %2483 = vmatpush.bf16.msrb.mxu3 %v5788_v40 }
  0xbe   :  { %2184 = vmatpush.bf16.msrb.mxu0 %v5761_v46  ;;  %v306_v11 = vpop.f32.mrf.mxu2  ;;  %v6832_v17 = vpop.f32.mrf.mxu0  ;;  %v2124_v46 = vshrl.u32 %v6755_v38, 16  ;;  %v5797_v38 = vld [vmem:[%s7412_s1 + $0x190] sm:$0xff] }
  0xbf   :  { %2283 = vmatpush.bf16.msrb.mxu1 %v5770_v47  ;;  %v406_v12 = vpop.f32.mrf.mxu3  ;;  %v6839_v22 = vpop.f32.mrf.mxu1  ;;  %v5805_v47 = vld [vmem:[%s7412_s1 + $0x1d0] sm:$0xff] }
  0xc0   :  { %2382 = vmatpush.bf16.msrb.mxu2 %v5779_v43  ;;  %v5832_v43 = vld [vmem:[%s7412_s1 + $0x58] sm:$0xff]  ;;  %v2126_v62 = vor.u32 %v2124_v46, %v6819_v6  ;;  %v2426_v6 = vor.u32 %v2424_v55, %v6827_v10  ;;  %v5796_v12 = vld [vmem:[%s7412_s1 + $0x188] sm:$0xff]  ;;  %v5803_v10 = vld [vmem:[%s7412_s1 + $0x1c0] sm:$0xff] }
  0xc1   :  { %2484 = vmatpush.bf16.msrb.mxu3 %v5787_v48  ;;  %2185 = vmatmul.bf16.vlgmr.msrb.gmra.mxu0 %v2123_v20  ;;  %v2519_v48 = vunpack.c.l.b16 %v4974_v34 }
  0xc2   :  { %2589 = vmatpush.bf16.msra.mxu0 %v5802_v53  ;;  %2284 = vmatmul.bf16.vlgmr.msrb.gmra.mxu1 %v6769_v41  ;;  %v4872_v41 = vld [vmem:[%s7413_s0 + $0xb8] sm:$0x3]  ;;  %v5956_v53 = vld [vmem:[%s7413_s0 + $0x80] sm:$0xf0] }
  0xc3   :  { %2701 = vmatpush.bf16.msra.mxu1 %v5810_v54  ;;  %2383 = vmatmul.bf16.vlgmr.msrb.gmra.mxu2 %v5778_v21  ;;  %v2322_v50 = vunpack.c.l.b16 %v4872_v41  ;;  %v5957_v54 = vld [vmem:[%s7413_s0 + $0x80] sm:$0xc] }
  0xc4   :  { %2805 = vmatpush.bf16.msra.mxu2 %v5820_v45  ;;  %2485 = vmatmul.bf16.vlgmr.msrb.gmra.mxu3 %v2423_v14  ;;  %v5024_v45 = vld [vmem:[%s7413_s0 + $0x98] sm:$0xf]  ;;  %v5958_v0 = vor.u32 %v5957_v54, %v5956_v53  ;;  %v5852_v53 = vld [vmem:[%s7412_s1 + $0xf0] sm:$0xff] }
  0xc5   :  { %2939 = vmatpush.bf16.msra.mxu3 %v5836_v60  ;;  %v2631_v58 = vunpack.c.l.b16 %v5024_v45  ;;  %v5814_v60 = vld [vmem:[%s7412_s1 + $0x208] sm:$0xff] }
  0xc6   :  { %2590 = vmatpush.bf16.msra.mxu0 %v5801_v3  ;;  %v6865_v32 = vpop.f32.mrf.mxu2  ;;  %v6872_v39 = vpop.f32.mrf.mxu0  ;;  %v2521_v3 = vpack.c.b16 %v2519_v48, %v2519_v48  ;;  %v2523_v21 = vshrl.u32 %v5958_v0, 16 }
  0xc7   :  { %2702 = vmatpush.bf16.msra.mxu1 %v5809_v4  ;;  %v6870_v37 = vpop.f32.mrf.mxu3  ;;  %v6877_v40 = vpop.f32.mrf.mxu1  ;;  %v199_v4 = vadd.f32 %v6667_v2, %v6665_v1  ;;  %v5830_v1 = vld [vmem:[%s7412_s1 + $0x48] sm:$0xff]  ;;  %v5813_v2 = vld [vmem:[%s7412_s1 + $0x200] sm:$0xff] }
  0xc8   :  { %2806 = vmatpush.bf16.msra.mxu2 %v5819_v61  ;;  %v2531_v14 = vshrl.u32 %v2521_v3, 16 }
  0xc9   :  { %2940 = vmatpush.bf16.msra.mxu3 %v5835_v7  ;;  %v308_v20 = vadd.f32 %v6703_v15, %v199_v4  ;;  %v5853_v15 = vld [vmem:[%s7412_s1 + $0xf8] sm:$0xff]  ;;  %v204_v4 = vadd.f32 %v6753_v36, %v6751_v35 }
  0xca   :  { %2591 = vmatpush.bf16.msra.mxu0 %v5800_v23  ;;  %v2526_v23 = vshll.u32 %v5958_v0, 16  ;;  %v2533_v48 = vrot.slane %v2531_v14, 2 }
  0xcb   :  { %2703 = vmatpush.bf16.msra.mxu1 %v5808_v13  ;;  %v2633_v13 = vpack.c.b16 %v2631_v58, %v2631_v58  ;;  %v5843_v58 = vld [vmem:[%s7412_s1 + $0xb0] sm:$0xff] }
  0xcc   :  { %2807 = vmatpush.bf16.msra.mxu2 %v5818_v8  ;;  %v2324_v8 = vpack.c.b16 %v2322_v50, %v2322_v50  ;;  %v5862_v50 = vld [vmem:[%s7412_s1 + $0x138] sm:$0xff] }
  0xcd   :  { %2941 = vmatpush.bf16.msra.mxu3 %v5834_v24  ;;  %v2534_v24 = vshll.u32 %v2521_v3, 16  ;;  %v2643_v34 = vshrl.u32 %v2633_v13, 16  ;;  %v2646_v41 = vshll.u32 %v2633_v13, 16 }
  0xce   :  { %2592 = vmatpush.bf16.msra.mxu0 %v5799_v27  ;;  %v6920_v61 = vpop.f32.mrf.mxu2  ;;  %v6930_v7 = vpop.f32.mrf.mxu0  ;;  %v5095_v27 = vld [vmem:[%s7413_s0 + $0x80] sm:$0x8] }
  0xcf   :  { %2704 = vmatpush.bf16.msra.mxu1 %v5807_v26  ;;  %v6928_v5 = vpop.f32.mrf.mxu3  ;;  %v6932_v11 = vpop.f32.mrf.mxu1  ;;  %v2638_v26 = vshll.u32 %v5961_v9, 16 }
  0xd0   :  { %2808 = vmatpush.bf16.msra.mxu2 %v5817_v25  ;;  %v2635_v25 = vshrl.u32 %v5961_v9, 16  ;;  %v5851_v9 = vld [vmem:[%s7412_s1 + $0xe8] sm:$0xff] }
  0xd1   :  { %2942 = vmatpush.bf16.msra.mxu3 %v5833_v29  ;;  %2190 = vmatmul.bf16.gmra.mxu0 %v2126_v62  ;;  %v5844_v29 = vld [vmem:[%s7412_s1 + $0xb8] sm:$0xff]  ;;  %v2640_v57 = vrot.slane %v2638_v26, 3  ;;  %v2648_v62 = vrot.slane %v2646_v41, 3  ;;  %v5859_v41 = vld [vmem:[%s7412_s1 + $0x120] sm:$0xff] }
  0xd2   :  { %2593 = vmatpush.bf16.msra.mxu0 %v5798_v42  ;;  %2289 = vmatmul.bf16.gmra.mxu1 %v6790_v49  ;;  %v5795_v49 = vld [vmem:[%s7412_s1 + $0x180] sm:$0xff]  ;;  %v2637_v56 = vrot.slane %v2635_v25, 2 }
  0xd3   :  { %2705 = vmatpush.bf16.msra.mxu1 %v5806_v33  ;;  %2388 = vmatmul.bf16.gmra.mxu2 %v2324_v8  ;;  %v5829_v33 = vld [vmem:[%s7412_s1 + $0x40] sm:$0xff]  ;;  %v5861_v8 = vld [vmem:[%s7412_s1 + $0x130] sm:$0xff] }
  0xd4   :  { %2809 = vmatpush.bf16.msra.mxu2 %v5816_v30  ;;  %v201_v30 = vadd.f32 %v6712_v19, %v6710_v18  ;;  %2490 = vmatmul.bf16.gmra.mxu3 %v2426_v6  ;;  %v5811_v42 = vld [vmem:[%s7413_s0 + $0x80] sm:$0xf0]  ;;  %v5099_v18 = vld [vmem:[%s7413_s0 + $0x88] sm:$0xf]  ;;  %v5812_v19 = vld [vmem:[%s7413_s0 + $0x88] sm:$0x10] }
  0xd5   :  { %2943 = vmatpush.bf16.msra.mxu3 %v5832_v43  ;;  %v408_v43 = vadd.f32 %v6705_v16, %v308_v20  ;;  %v2525_v16 = vrot.slane %v2523_v21, 2  ;;  %v5100_v0 = vor.u32 %v5812_v19, %v5099_v18  ;;  %v2641_v20 = vor.u32 %v2640_v57, %v2637_v56  ;;  %v7056_v18 = vld [vmem:[%s7414_s2] ss:$0 sm:$0xff]  ;;  %v5857_v57 = vld [vmem:[%s7412_s1 + $0x110] sm:$0xff] }
  0xd6   :  { %2594 = vmatpush.bf16.msra.mxu0 %v5797_v38  ;;  %v309_v45 = vadd.f32 %v6741_v28, %v201_v30  ;;  %v6980_v46 = vpop.f32.mrf.mxu2  ;;  %v506_v28 = vpop.f32.mrf.mxu0  ;;  %v2536_v38 = vrot.slane %v2534_v24, 3  ;;  %v5841_v30 = vld [vmem:[%s7412_s1 + $0xa0] sm:$0xff] }
  0xd7   :  { %2706 = vmatpush.bf16.msra.mxu1 %v5805_v47  ;;  %v2528_v47 = vrot.slane %v2526_v23, 3  ;;  %v508_v54 = vadd.f32 %v6832_v17, %v408_v43  ;;  %v6989_v55 = vpop.f32.mrf.mxu3  ;;  %v5827_v17 = vld [vmem:[%s7412_s1 + $0x30] sm:$0xff] }
  0xd8   :  { %2810 = vmatpush.bf16.msra.mxu2 %v5815_v44  ;;  %v5828_v44 = vld [vmem:[%s7412_s1 + $0x38] sm:$0xff]  ;;  %v409_v3 = vadd.f32 %v6743_v31, %v309_v45  ;;  %v7007_v13 = vor.u32 %v2536_v38, %v2533_v48  ;;  %v5842_v31 = vld [vmem:[%s7412_s1 + $0xa8] sm:$0xff]  ;;  %v5839_v28 = vld [vmem:[%s7412_s1 + $0x90] sm:$0xff] }
  0xd9   :  { %2944 = vmatpush.bf16.msra.mxu3 %v5831_v59  ;;  %v609_v59 = vpop.f32.mrf.mxu1  ;;  %v611_v6 = vadd.f32 %v6839_v22, %v508_v54  ;;  %v5826_v22 = vld [vmem:[%s7412_s1 + $0x28] sm:$0xff]  ;;  %v5142_v54 = vld [vmem:[%s7413_s0 + $0xd8] sm:$0x3] }
  0xda   :  { %2595 = vmatpush.bf16.msra.mxu0 %v5796_v12  ;;  %v2529_v12 = vor.u32 %v2528_v47, %v2525_v16  ;;  %v509_v35 = vadd.f32 %v6872_v39, %v409_v3  ;;  %v5860_v39 = vld [vmem:[%s7412_s1 + $0x128] sm:$0xff] }
  0xdb   :  { %2707 = vmatpush.bf16.msra.mxu1 %v5804_v63  ;;  %v5096_v63 = vor.u32 %v5811_v42, %v5095_v27  ;;  %v725_v21 = vadd.f32 %v6865_v32, %v611_v6  ;;  %v5850_v27 = vld [vmem:[%s7412_s1 + $0xe0] sm:$0xff] }
  0xdc   :  { %2811 = vmatpush.bf16.msra.mxu2 %v5814_v60  ;;  %v2645_v60 = vrot.slane %v2643_v34, 2  ;;  %v2538_v24 = vsel %vm639_vm1, %v2529_v12, %v7007_v13  ;;  %v612_v25 = vadd.f32 %v6877_v40, %v509_v35  ;;  %v5825_v40 = vld [vmem:[%s7412_s1 + $0x20] sm:$0xff] }
  0xdd   :  { %2945 = vmatpush.bf16.msra.mxu3 %v5830_v1  ;;  %v2752_v1 = vrot.slane %v5096_v63, 3  ;;  %v5838_v63 = vld [vmem:[%s7412_s1 + $0x88] sm:$0xff] }
  0xde   :  { %2596 = vmatpush.bf16.msra.mxu0 %v5795_v49  ;;  %v7013_v36 = vor.u32 %v2648_v62, %v2645_v60  ;;  %v723_v23 = vpop.f32.mrf.mxu2  ;;  %v726_v34 = vadd.f32 %v6920_v61, %v612_v25  ;;  %v5840_v61 = vld [vmem:[%s7412_s1 + $0x98] sm:$0xff]  ;;  %v2886_v60 = vunpack.c.l.b16 %v5142_v54  ;;  %v5847_v62 = vld [vmem:[%s7412_s1 + $0xc8] sm:$0xff] }
  0xdf   :  { %2708 = vmatpush.bf16.msra.mxu1 %v5803_v10  ;;  %v310_v10 = vadd.f32 %v6793_v51, %v204_v4  ;;  %v836_v14 = vpop.f32.mrf.mxu3  ;;  %v5855_v23 = vld [vmem:[%s7412_s1 + $0x100] sm:$0xff] }
  0xe0   :  { %2812 = vmatpush.bf16.msra.mxu2 %v5813_v2  ;;  %v7015_v2 = vrot.slane %v5100_v0, 3  ;;  %v2650_v51 = vsel %vm639_vm1, %v2641_v20, %v7013_v36  ;;  %v5139_v0 = vld [vmem:[%s7413_s0 + $0xc8] sm:$0x3]  ;;  %v5870_v14 = vld [vmem:[%s7412_s1 + $0x178] sm:$0xff] }
  0xe1   :  { %2946 = vmatpush.bf16.msra.mxu3 %v5829_v33  ;;  %v7028_v26 = vpop.f32.mrf.mxu1  ;;  %v410_v49 = vadd.f32 %v6795_v52, %v310_v10  ;;  %v838_v33 = vadd.f32 %v6870_v37, %v725_v21  ;;  %2597 = vmatmul.bf16.vlgmr.msra.gmra.mxu0 %v2538_v24  ;;  %v5849_v52 = vld [vmem:[%s7412_s1 + $0xd8] sm:$0xff]  ;;  %v2962_v35 = vunpack.c.l.b16 %v5139_v0  ;;  %v7133_v10 = vld [vmem:[%s7413_s0 + $0xc0] sm:$0xff]  }
  0xe2   :  { %3015 = vmatpush.bf16.msrb.mxu0 %v5828_v44  ;;  %v2754_v32 = vsel %vm872_vm2, %v2752_v1, %v7015_v2  ;;  %2709 = vmatmul.bf16.vlgmr.msra.gmra.mxu1 %v2650_v51  ;;  %v5824_v37 = vld [vmem:[%s7412_s1 + $0x18] sm:$0xff]  ;;  %v5821_v1 = vld [vmem:[%s7412_s1] sm:$0xff]  ;;  %v3052_v24 = vshll.u32 %v7133_v10, 16  ;;  %v964_v51 = vld [vmem:[%s7415_s3 + $0x8] sm:$0x3] }
  0xe3   :  { %3114 = vmatpush.bf16.msrb.mxu1 %v5844_v29  ;;  %v5964_v29 = vld [vmem:[%s7413_s0 + $0xd0] sm:$0xff]   ;;  %2813 = vmatmul.bf16.vlgmr.msra.gmra.mxu2 %v2754_v32  ;;  %v510_v42 = vadd.f32 %v6930_v7, %v410_v49  ;;  %v839_v7 = vadd.f32 %v6928_v5, %v726_v34  ;;  %v5858_v44 = vld [vmem:[%s7412_s1 + $0x118] sm:$0xff]  ;;  %v7152_v25 = vpack.c.b16 %v2962_v35, %v2962_v35 }
  0xe4   :  { %3213 = vmatpush.bf16.msrb.mxu2 %v5853_v15  ;;  %v935_v15 = vpop.f32.mrf.mxu0  ;;  %2947 = vmatmul.bf16.vlgmr.msra.gmra.mxu3 %v5964_v29  ;;  %v5848_v5 = vld [vmem:[%s7412_s1 + $0xd0] sm:$0xff]  ;;  %v5892_v0 = vld [vmem:[%s7412_s1 + $0x218] sm:$0xff] }
  0xe5   :  { %3312 = vmatpush.bf16.msrb.mxu3 %v5862_v50  ;;  %v944_v43 = vadd.f32 %v935_v15, %v838_v33  ;;  %v613_v47 = vadd.f32 %v6932_v11, %v510_v42  ;;  %v5823_v11 = vld [vmem:[%s7412_s1 + $0x10] sm:$0xff]  ;;  %v3050_v42 = vshrl.u32 %v7133_v10, 16 }
  0xe6   :  { %3016 = vmatpush.bf16.msrb.mxu0 %v5827_v17  ;;  %v7068_v19 = vpop.f32.mrf.mxu2  ;;  %v5885_v29 = vld [vmem:[%s7412_s1 + $0x1f0] sm:$0xff] }
  0xe7   :  { %3115 = vmatpush.bf16.msrb.mxu1 %v5843_v58  ;;  %v7073_v45 = vpop.f32.mrf.mxu3  ;;  %v950_v48 = vadd.f32 %v7056_v18, %v944_v43  ;;  %v727_v38 = vadd.f32 %v6980_v46, %v613_v47  ;;  %v5822_v46 = vld [vmem:[%s7412_s1 + $0x8] sm:$0xff]  ;;  %v5869_v49 = vld [vmem:[%s7412_s1 + $0x170] sm:$0xff]  ;;  %v3054_v43 = vrot.slane %v3052_v24, 1 }
  0xe8   :  { %3214 = vmatpush.bf16.msrb.mxu2 %v5852_v53  ;;  %v5877_v33 = vld [vmem:[%s7412_s1 + $0x1b0] sm:$0xff] }
  0xe9   :  { %3313 = vmatpush.bf16.msrb.mxu3 %v5861_v8  ;;  %v7077_v53 = vpop.f32.mrf.mxu1  ;;  %v953_v58 = vmax.f32 %v950_v48, 0.0  ;;  %v840_v17 = vadd.f32 %v6989_v55, %v727_v38  ;;  %v5856_v8 = vld [vmem:[%s7412_s1 + $0x108] sm:$0xff]  ;;  %v5846_v55 = vld [vmem:[%s7412_s1 + $0xc0] sm:$0xff]  ;;  %v5865_v35 = vld [vmem:[%s7412_s1 + $0x150] sm:$0xff] }
  0xea   :  { %3017 = vmatpush.bf16.msrb.mxu0 %v5826_v22  ;;  %v5837_v22 = vld [vmem:[%s7412_s1 + $0x80] sm:$0xff]  ;;  %v5894_v48 = vld [vmem:[%s7412_s1 + $0x228] sm:$0xff] }
  0xeb   :  { %3116 = vmatpush.bf16.msrb.mxu1 %v5842_v31  ;;  %v2888_v31 = vpack.c.b16 %v2886_v60, %v2886_v60  ;;  %v5893_v60 = vld [vmem:[%s7412_s1 + $0x220] sm:$0xff] }
  0xec   :  { %3215 = vmatpush.bf16.msrb.mxu2 %v5851_v9  ;;  %v937_v16 = vpop.f32.mrf.mxu0 }
  0xed   :  { %3314 = vmatpush.bf16.msrb.mxu3 %v5860_v39  ;;  %v945_v50 = vadd.f32 %v937_v16, %v839_v7  ;;  %v5886_v39 = vld [vmem:[%s7412_s1 + $0x1f8] sm:$0xff]  ;;  %v5868_v7 = vld [vmem:[%s7412_s1 + $0x168] sm:$0xff]  ;;  %v3055_v16 = vor.u32 %v3054_v43, %v3050_v42  ;;  %v5879_v43 = vld [vmem:[%s7412_s1 + $0x1c0] sm:$0xff] }
  0xee   :  { %3018 = vmatpush.bf16.msrb.mxu0 %v5825_v40  ;;  %v7109_v4 = vpop.f32.mrf.mxu2 }
  0xef   :  { %3117 = vmatpush.bf16.msrb.mxu1 %v5841_v30  ;;  %v951_v56 = vadd.f32 %v7056_v18, %v945_v50  ;;  %v7114_v9 = vpop.f32.mrf.mxu3 }
  0xf0   :  { %3216 = vmatpush.bf16.msrb.mxu2 %v5850_v27 }
  0xf1   :  { %3315 = vmatpush.bf16.msrb.mxu3 %v5859_v41  ;;  %v954_v59 = vmax.f32 %v951_v56, 0.0  ;;  %v7119_v20 = vpop.f32.mrf.mxu1  ;;  %2602 = vmatmul.bf16.gmra.mxu0 %v7007_v13  ;;  %v5878_v13 = vld [vmem:[%s7412_s1 + $0x1b8] sm:$0xff] }
  0xf2   :  { %3019 = vmatpush.bf16.msrb.mxu0 %v5824_v37  ;;  %2714 = vmatmul.bf16.gmra.mxu1 %v7013_v36  ;;  %v5896_v36 = vld [vmem:[%s7412_s1 + $0x238] sm:$0xff]  ;;  %v5895_v37 = vld [vmem:[%s7412_s1 + $0x230] sm:$0xff] }
  0xf3   :  { %3118 = vmatpush.bf16.msrb.mxu1 %v5840_v61  ;;  %v5908_v3 = vpack.c.bf16 %v954_v59, %v953_v58  ;;  %2818 = vmatmul.bf16.gmra.mxu2 %v7015_v2  ;;  %v5884_v61 = vld [vmem:[%s7412_s1 + $0x1e8] sm:$0xff]  ;;  %v5867_v58 = vld [vmem:[%s7412_s1 + $0x160] sm:$0xff] }
  0xf4   :  { %3217 = vmatpush.bf16.msrb.mxu2 %v5849_v52  ;;  %v940_v6 = vpop.f32.mrf.mxu0  ;;  %2952 = vmatmul.bf16.gmra.mxu3 %v2888_v31  ;;  %v3057_v52 = vshll.u32 %v7152_v25, 16  ;;  %v5875_v59 = vld [vmem:[%s7412_s1 + $0x1a0] sm:$0xff] }
  0xf5   :  { %3316 = vmatpush.bf16.msrb.mxu3 %v5858_v44  ;;  %5909 = vst [vmem:[%s7415_s3] sm:$0xff] %v5908_v3   ;;  %v946_v12 = vadd.f32 %v940_v6, %v840_v17  ;;  %v5876_v44 = vld [vmem:[%s7412_s1 + $0x1a8] sm:$0xff]  ;;  %v5881_v3 = vld [vmem:[%s7412_s1 + $0x1d0] sm:$0xff] }
  0xf6   :  { %3020 = vmatpush.bf16.msrb.mxu0 %v5823_v11  ;;  %v7166_v27 = vpop.f32.mrf.mxu2  ;;  %v7198_v47 = vrot.slane %v3057_v52, 1 }
  0xf7   :  { %3119 = vmatpush.bf16.msrb.mxu1 %v5839_v28  ;;  %v952_v21 = vadd.f32 %v7056_v18, %v946_v12  ;;  %v7171_v40 = vpop.f32.mrf.mxu3  ;;  %v7211_v28 = vld [vmem:[%s7413_s0 + $0xe0] sm:$0xff]  ;;  %v5273_v12 = vld [vmem:[%s7413_s0 + $0xe8] sm:$0x3] }
  0xf8   :  { %3218 = vmatpush.bf16.msrb.mxu2 %v5848_v5  ;;  %v5883_v5 = vld [vmem:[%s7412_s1 + $0x1e0] sm:$0xff]  ;;  %v3060_v56 = vsel %vm224_vm0, %v3055_v16, %v7198_v47 }
  0xf9   :  { %3317 = vmatpush.bf16.msrb.mxu3 %v5857_v57  ;;  %v955_v15 = vmax.f32 %v952_v21, 0.0  ;;  %v1081_v41 = vpop.f32.mrf.mxu1  ;;  %v5854_v57 = vld [vmem:[%s7413_s0 + $0xf0] sm:$0xff]  ;;  %v5480_v21 = vld [vmem:[%s7413_s0 + $0xd8] sm:$0xf] }
  0xfa   :  { %3021 = vmatpush.bf16.msrb.mxu0 %v5822_v46  ;;  %v5866_v46 = vld [vmem:[%s7412_s1 + $0x158] sm:$0xff]  ;;  %v1151_v41 = vadd.f32 %v7068_v19, %v7028_v26  ;;  %v5863_v19 = vld [vmem:[%s7412_s1 + $0x140] sm:$0xff] }
  0xfb   :  { %3120 = vmatpush.bf16.msrb.mxu1 %v5838_v63  ;;  %v958_v32 = vpack.c.bf16 %v955_v15, %v955_v15  ;;  %v5874_v63 = vld [vmem:[%s7412_s1 + $0x198] sm:$0xff]  ;;  %v3160_v15 = vunpack.c.l.b16 %v5273_v12 }
  0xfc   :  { %3219 = vmatpush.bf16.msrb.mxu2 %v5847_v62  ;;  %v942_v30 = vpop.f32.mrf.mxu0  ;;  %v5882_v62 = vld [vmem:[%s7412_s1 + $0x1d8] sm:$0xff] }
  0xfd   :  { %3318 = vmatpush.bf16.msrb.mxu3 %v5856_v8  ;;  %v965_v34 = vsel %vm7159_vm5, %v958_v32, %v964_v51  ;;  %v5864_v51 = vld [vmem:[%s7412_s1 + $0x148] sm:$0xff]  ;;  %v5968_v32 = vld [vmem:[%s7413_s0 + $0xd0] sm:$0xf0]  ;;  %v3568_v30 = vunpack.c.l.b16 %v5480_v21 }
  0xfe   :  { %3022 = vmatpush.bf16.msrb.mxu0 %v5821_v1  ;;  %966 = vst [vmem:[%s7415_s3 + $0x8] sm:$0x3] %v965_v34  ;;  %v1157_v50 = vpop.f32.mrf.mxu2  ;;  %v5430_v1 = vld [vmem:[%s7413_s0 + $0xc8] sm:$0xf] }
  0xff   :  { %3121 = vmatpush.bf16.msrb.mxu1 %v5837_v22  ;;  %v1256_v54 = vpop.f32.mrf.mxu3  ;;  %v5873_v22 = vld [vmem:[%s7412_s1 + $0x190] sm:$0xff]  ;;  %v3456_v24 = vunpack.c.l.b16 %v5430_v1  ;;  %v3570_v50 = vpack.c.b16 %v3568_v30, %v3568_v30 }
 0x100   :  { %3220 = vmatpush.bf16.msrb.mxu2 %v5846_v55  ;;  %v5328_v55 = vld [vmem:[%s7413_s0 + $0xf8] sm:$0x3]  ;;  %v3352_v54 = vshll.u32 %v7211_v28, 16 }
 0x101   :  { %3319 = vmatpush.bf16.msrb.mxu3 %v5855_v23  ;;  %v7213_v38 = vpop.f32.mrf.mxu1  ;;  %3023 = vmatmul.bf16.vlgmr.msrb.gmra.mxu0 %v7133_v10  ;;  %v5891_v10 = vld [vmem:[%s7412_s1 + $0x210] sm:$0xff]  ;;  %v5880_v23 = vld [vmem:[%s7412_s1 + $0x1c8] sm:$0xff] }
 0x102   :  { %3414 = vmatpush.bf16.msra.mxu0 %v5870_v14  ;;  %3122 = vmatmul.bf16.vlgmr.msrb.gmra.mxu1 %v3060_v56  ;;  %v5966_v14 = vld [vmem:[%s7413_s0 + $0xc0] sm:$0xc] }
 0x103   :  { %3526 = vmatpush.bf16.msra.mxu1 %v5878_v13  ;;  %3221 = vmatmul.bf16.vlgmr.msrb.gmra.mxu2 %v7211_v28  ;;  %v3061_v13 = vshrl.u32 %v7152_v25, 16 }
 0x104   :  { %3638 = vmatpush.bf16.msra.mxu2 %v5886_v39  ;;  %v7206_v11 = vpop.f32.mrf.mxu0  ;;  %3320 = vmatmul.bf16.vlgmr.msrb.gmra.mxu3 %v5854_v57  ;;  %v5965_v39 = vld [vmem:[%s7413_s0 + $0xc0] sm:$0xf0]  ;;  %v1258_v57 = vadd.f32 %v7073_v45, %v1151_v41  ;;  %v3350_v45 = vshrl.u32 %v7211_v28, 16  ;;  %v5888_v28 = vld [vmem:[%s7413_s0 + $0xc8] sm:$0x10] }
 0x105   :  { %3742 = vmatpush.bf16.msra.mxu3 %v5896_v36  ;;  %v3259_v36 = vunpack.c.l.b16 %v5328_v55  ;;  %v5967_v34 = vor.u32 %v5966_v14, %v5965_v39 }
 0x106   :  { %3415 = vmatpush.bf16.msra.mxu0 %v5869_v49  ;;  %v7243_v17 = vpop.f32.mrf.mxu2  ;;  %v5872_v49 = vld [vmem:[%s7412_s1 + $0x188] sm:$0xff] }
 0x107   :  { %3527 = vmatpush.bf16.msra.mxu1 %v5877_v33  ;;  %v7248_v8 = vpop.f32.mrf.mxu3  ;;  %v5890_v33 = vld [vmem:[%s7412_s1 + $0x208] sm:$0xff]  ;;  %v3261_v26 = vpack.c.b16 %v3259_v36, %v3259_v36  ;;  %v3460_v56 = vshrl.u32 %v5967_v34, 16 }
 0x108   :  { %3639 = vmatpush.bf16.msra.mxu2 %v5885_v29  ;;  %v5969_v29 = vld [vmem:[%s7413_s0 + $0xd0] sm:$0xc] }
 0x109   :  { %3743 = vmatpush.bf16.msra.mxu3 %v5895_v37  ;;  %v7255_v31 = vpop.f32.mrf.mxu1  ;;  %v5970_v16 = vor.u32 %v5969_v29, %v5968_v32  ;;  %v3462_v55 = vrot.slane %v3460_v56, 2 }
 0x10a   :  { %3416 = vmatpush.bf16.msra.mxu0 %v5868_v7  ;;  %v7312_v7 = vpack.c.b16 %v3160_v15, %v3160_v15 }
 0x10b   :  { %3528 = vmatpush.bf16.msra.mxu1 %v5876_v44  ;;  %v3458_v44 = vpack.c.b16 %v3456_v24, %v3456_v24 }
 0x10c   :  { %3640 = vmatpush.bf16.msra.mxu2 %v5884_v61  ;;  %v7250_v6 = vpop.f32.mrf.mxu0  ;;  %v3063_v61 = vor.u32 %v3061_v13, %v7198_v47  ;;  %v5889_v47 = vld [vmem:[%s7412_s1 + $0x200] sm:$0xff]  ;;  %v3357_v12 = vshll.u32 %v7312_v7, 16 }
 0x10d   :  { %3744 = vmatpush.bf16.msra.mxu3 %v5894_v48 }
 0x10e   :  { %3417 = vmatpush.bf16.msra.mxu0 %v5867_v58  ;;  %v7302_v42 = vpop.f32.mrf.mxu2  ;;  %v3463_v58 = vshll.u32 %v5967_v34, 16 }
 0x10f   :  { %3529 = vmatpush.bf16.msra.mxu1 %v5875_v59  ;;  %v7307_v52 = vpop.f32.mrf.mxu3  ;;  %v3468_v59 = vshrl.u32 %v3458_v44, 16 }
 0x110   :  { %3641 = vmatpush.bf16.msra.mxu2 %v5883_v5  ;;  %v5871_v5 = vld [vmem:[%s7412_s1 + $0x180] sm:$0xff]  ;;  %v3465_v39 = vrot.slane %v3463_v58, 3 }
 0x111   :  { %3745 = vmatpush.bf16.msra.mxu3 %v5893_v60  ;;  %v7314_v48 = vpop.f32.mrf.mxu1  ;;  %3028 = vmatmul.bf16.gmra.mxu0 %v7152_v25  ;;  %v3471_v60 = vshll.u32 %v3458_v44, 16  ;;  %v3354_v25 = vrot.slane %v3352_v54, 1  ;;  %v3470_v14 = vrot.slane %v3468_v59, 2 }
 0x112   :  { %3418 = vmatpush.bf16.msra.mxu0 %v5866_v46  ;;  %3127 = vmatmul.bf16.gmra.mxu1 %v3063_v61  ;;  %v1357_v46 = vadd.f32 %v7206_v11, %v1258_v57  ;;  %v1153_v11 = vadd.f32 %v7109_v4, %v7077_v53  ;;  %v3466_v41 = vor.u32 %v3465_v39, %v3462_v55  ;;  %v3361_v55 = vshrl.u32 %v7312_v7, 16 }
 0x113   :  { %3530 = vmatpush.bf16.msra.mxu1 %v5874_v63  ;;  %3226 = vmatmul.bf16.gmra.mxu2 %v7312_v7  ;;  %v3575_v63 = vshll.u32 %v5970_v16, 16  ;;  %v3473_v13 = vrot.slane %v3471_v60, 3  ;;  %v3355_v34 = vor.u32 %v3354_v25, %v3350_v45 }
 0x114   :  { %3642 = vmatpush.bf16.msra.mxu2 %v5882_v62  ;;  %v7309_v37 = vpop.f32.mrf.mxu0  ;;  %v3572_v62 = vshrl.u32 %v5970_v16, 16  ;;  %3325 = vmatmul.bf16.gmra.mxu3 %v3261_v26  ;;  %v1456_v53 = vadd.f32 %v7213_v38, %v1357_v46  ;;  %v1259_v30 = vadd.f32 %v7114_v9, %v1153_v11 }
 0x115   :  { %3746 = vmatpush.bf16.msra.mxu3 %v5892_v0  ;;  %v3580_v0 = vshrl.u32 %v3570_v50, 16  ;;  %v3577_v24 = vrot.slane %v3575_v63, 3  ;;  %v3474_v61 = vor.u32 %v3473_v13, %v3470_v14 }
 0x116   :  { %3419 = vmatpush.bf16.msra.mxu0 %v5865_v35  ;;  %v5551_v35 = vld [vmem:[%s7413_s0 + $0xc0] sm:$0x8]  ;;  %v1554_v1 = vpop.f32.mrf.mxu2  ;;  %v3574_v15 = vrot.slane %v3572_v62, 2 }
 0x117   :  { %3531 = vmatpush.bf16.msra.mxu1 %v5873_v22  ;;  %v5887_v22 = vld [vmem:[%s7413_s0 + $0xc0] sm:$0xf0]  ;;  %v1666_v21 = vpop.f32.mrf.mxu3  ;;  %v3582_v36 = vrot.slane %v3580_v0, 2 }
 0x118   :  { %3643 = vmatpush.bf16.msra.mxu2 %v5881_v3  ;;  %v3583_v3 = vshll.u32 %v3570_v50, 16  ;;  %v5552_v32 = vor.u32 %v5887_v22, %v5551_v35  ;;  %v3578_v44 = vor.u32 %v3577_v24, %v3574_v15  ;;  %v4679_v15 = vld [vmem:[%s7415_s3 + $0x14] sm:$0x3] }
 0x119   :  { %3747 = vmatpush.bf16.msra.mxu3 %v5891_v10  ;;  %v5555_v10 = vld [vmem:[%s7413_s0 + $0xc8] sm:$0xf]  ;;  %v1454_v4 = vpop.f32.mrf.mxu1 }
 0x11a   :  { %3420 = vmatpush.bf16.msra.mxu0 %v5864_v51  ;;  %v3585_v51 = vrot.slane %v3583_v3, 3  ;;  %v5556_v29 = vor.u32 %v5888_v28, %v5555_v10  ;;  %v3689_v26 = vrot.slane %v5552_v32, 3 }
 0x11b   :  { %3532 = vmatpush.bf16.msra.mxu1 %v5872_v49  ;;  %v1558_v49 = vadd.f32 %v7243_v17, %v1456_v53 }
 0x11c   :  { %3644 = vmatpush.bf16.msra.mxu2 %v5880_v23  ;;  %v1355_v23 = vpop.f32.mrf.mxu0  ;;  %v3586_v16 = vor.u32 %v3585_v51, %v3582_v36  ;;  %v3690_v38 = vrot.slane %v5556_v29, 3 }
 0x11d   :  { %3748 = vmatpush.bf16.msra.mxu3 %v5890_v33  ;;  %v3359_v33 = vrot.slane %v3357_v12, 1  ;;  %v1670_v50 = vadd.f32 %v7248_v8, %v1558_v49 }
 0x11e   :  { %3421 = vmatpush.bf16.msra.mxu0 %v5863_v19  ;;  %v1156_v19 = vadd.f32 %v7166_v27, %v7119_v20  ;;  %v3587_v58 = vsel %vm639_vm1, %v3578_v44, %v3586_v16  ;;  %v3691_v59 = vsel %vm872_vm2, %v3689_v26, %v3690_v38 }
 0x11f   :  { %3533 = vmatpush.bf16.msra.mxu1 %v5871_v5  ;;  %v1556_v5 = vpop.f32.mrf.mxu2  ;;  %v3360_v17 = vsel %vm224_vm0, %v3355_v34, %v3359_v33  ;;  %v3363_v10 = vor.u32 %v3361_v55, %v3359_v33 }
 0x120   :  { %3645 = vmatpush.bf16.msra.mxu2 %v5879_v43  ;;  %v1358_v43 = vadd.f32 %v7250_v6, %v1259_v30  ;;  %v3475_v6 = vsel %vm639_vm1, %v3466_v41, %v3474_v61  ;;  %v1260_v60 = vadd.f32 %v7171_v40, %v1156_v19 }
 0x121   :  { %3749 = vmatpush.bf16.msra.mxu3 %v5889_v47  ;;  %v1668_v47 = vpop.f32.mrf.mxu3  ;;  %v1877_v57 = vpop.f32.mrf.mxu1  ;;  %3422 = vmatmul.bf16.vlgmr.msra.gmra.mxu0 %v3360_v17 }
 0x122   :  { %v1457_v54 = vadd.f32 %v7255_v31, %v1358_v43  ;;  %3534 = vmatmul.bf16.vlgmr.msra.gmra.mxu1 %v3475_v6  ;;  %v1359_v8 = vadd.f32 %v7309_v37, %v1260_v60 }
 0x123   :  { %3646 = vmatmul.bf16.vlgmr.msra.gmra.mxu2 %v3587_v58 }
 0x124   :  { %v1773_v9 = vpop.f32.mrf.mxu0  ;;  %v1559_v20 = vadd.f32 %v7302_v42, %v1457_v54  ;;  %3750 = vmatmul.bf16.vlgmr.msra.gmra.mxu3 %v3691_v59  ;;  %v1458_v12 = vadd.f32 %v7314_v48, %v1359_v8 }
 0x125   :  { %v1782_v56 = vadd.f32 %v1773_v9, %v1670_v50 }
 0x126   :  { %v1671_v62 = vadd.f32 %v7307_v52, %v1559_v20  ;;  %v1560_v25 = vadd.f32 %v1554_v1, %v1458_v12 }
 0x127   :  { %v1886_v27 = vadd.f32 %v1877_v57, %v1782_v56  ;;  %v2011_v63 = vpop.f32.mrf.mxu2 }
 0x128   :  { %v1672_v52 = vadd.f32 %v1666_v21, %v1560_v25 }
 0x129   :  { %v1889_v31 = vadd.f32 %v7056_v18, %v1886_v27  ;;  %v2087_v0 = vpop.f32.mrf.mxu3  ;;  %v1879_v42 = vpop.f32.mrf.mxu1 }
 0x12a   :  { %v2088_v19 = vadd.f32 %v2087_v0, %v2011_v63 }
 0x12b   :  { %v1892_v46 = vmax.f32 %v1889_v31, 0.0 }
 0x12c   :  { %v1775_v3 = vpop.f32.mrf.mxu0 }
 0x12d   :  { %v1895_v40 = vpack.c.bf16 %v1892_v46, %v1892_v46  ;;  %v1783_v45 = vadd.f32 %v1775_v3, %v1671_v62 }
 0x12f   :  { %4677 = vst [vmem:[%s7415_s3 + $0xc] sm:$0xf] %v1895_v40  ;;  %v1887_v37 = vadd.f32 %v1879_v42, %v1783_v45  ;;  %v2013_v22 = vpop.f32.mrf.mxu2 }
 0x131   :  { %v1890_v35 = vadd.f32 %v7056_v18, %v1887_v37  ;;  %v2089_v28 = vpop.f32.mrf.mxu3  ;;  %v1882_v14 = vpop.f32.mrf.mxu1  ;;  %3427 = vmatmul.bf16.gmra.mxu0 %v3363_v10 }
 0x132   :  { %3539 = vmatmul.bf16.gmra.mxu1 %v3474_v61  ;;  %v2090_v17 = vadd.f32 %v2089_v28, %v2013_v22 }
 0x133   :  { %v1893_v11 = vmax.f32 %v1890_v35, 0.0  ;;  %3651 = vmatmul.bf16.gmra.mxu2 %v3586_v16 }
 0x134   :  { %v1778_v23 = vpop.f32.mrf.mxu0  ;;  %3755 = vmatmul.bf16.gmra.mxu3 %v3690_v38 }
 0x135   :  { %v1896_v48 = vpack.c.bf16 %v1893_v11, %v1893_v11  ;;  %v1784_v39 = vadd.f32 %v1778_v23, %v1672_v52 }
 0x137   :  { %4678 = vst [vmem:[%s7415_s3 + $0x10] sm:$0xf] %v1896_v48  ;;  %v1888_v1 = vadd.f32 %v1882_v14, %v1784_v39  ;;  %v2016_v13 = vpop.f32.mrf.mxu2 }
 0x139   :  { %v1891_v7 = vadd.f32 %v7056_v18, %v1888_v1  ;;  %v2092_v53 = vpop.f32.mrf.mxu3  ;;  %v1884_v36 = vpop.f32.mrf.mxu1 }
 0x13a   :  { %v2093_v27 = vadd.f32 %v2092_v53, %v2016_v13 }
 0x13b   :  { %v1894_v21 = vmax.f32 %v1891_v7, 0.0 }
 0x13c   :  { %v1780_v4 = vpop.f32.mrf.mxu0 }
 0x13d   :  { %v1897_v24 = vpack.c.bf16 %v1894_v21, %v1894_v21 }
 0x13f   :  { %v1902_v51 = vsel %vm7159_vm5, %v1897_v24, %v4679_v15  ;;  %v2018_v32 = vpop.f32.mrf.mxu2 }
 0x140   :  { %4680 = vst [vmem:[%s7415_s3 + $0x14] sm:$0x3] %v1902_v51 }
 0x141   :  { %v2094_v29 = vpop.f32.mrf.mxu3  ;;  %v2285_v49 = vpop.f32.mrf.mxu1 }
 0x142   :  { %v5135_v29 = vld [vmem:[%s7415_s3 + $0x20] sm:$0x3] }
 0x144   :  { %v2186_v30 = vpop.f32.mrf.mxu0 }
 0x145   :  { %v2195_v9 = vadd.f32 %v2186_v30, %v2088_v19 }
 0x147   :  { %v2384_v33 = vpop.f32.mrf.mxu2  ;;  %v2294_v54 = vadd.f32 %v2285_v49, %v2195_v9 }
 0x149   :  { %v2486_v34 = vpop.f32.mrf.mxu3  ;;  %v2287_v43 = vpop.f32.mrf.mxu1  ;;  %v2393_v6 = vadd.f32 %v2384_v33, %v2294_v54 }
 0x14b   :  { %v2495_v8 = vadd.f32 %v2486_v34, %v2393_v6 }
 0x14c   :  { %v2188_v41 = vpop.f32.mrf.mxu0 }
 0x14d   :  { %v2196_v56 = vadd.f32 %v2188_v41, %v2090_v17 }
 0x14f   :  { %v2386_v61 = vpop.f32.mrf.mxu2  ;;  %v2295_v20 = vadd.f32 %v2287_v43, %v2196_v56 }
 0x151   :  { %v2488_v44 = vpop.f32.mrf.mxu3  ;;  %v2290_v26 = vpop.f32.mrf.mxu1  ;;  %v2394_v31 = vadd.f32 %v2386_v61, %v2295_v20 }
 0x153   :  { %v2496_v63 = vadd.f32 %v2488_v44, %v2394_v31 }
 0x154   :  { %v2191_v16 = vpop.f32.mrf.mxu0 }
 0x155   :  { %v2197_v62 = vadd.f32 %v2191_v16, %v2093_v27 }
 0x157   :  { %v2389_v38 = vpop.f32.mrf.mxu2  ;;  %v2296_v45 = vadd.f32 %v2290_v26, %v2197_v62 }
 0x159   :  { %v2491_v50 = vpop.f32.mrf.mxu3  ;;  %v2292_v47 = vpop.f32.mrf.mxu1  ;;  %v2395_v37 = vadd.f32 %v2389_v38, %v2296_v45 }
 0x15b   :  { %v2497_v11 = vadd.f32 %v2491_v50, %v2395_v37 }
 0x15c   :  { %v2193_v5 = vpop.f32.mrf.mxu0 }
 0x15f   :  { %v2391_v57 = vpop.f32.mrf.mxu2 }
 0x161   :  { %v2493_v58 = vpop.f32.mrf.mxu3  ;;  %v2710_v60 = vpop.f32.mrf.mxu1 }
 0x164   :  { %v2598_v59 = vpop.f32.mrf.mxu0 }
 0x165   :  { %v2607_v46 = vadd.f32 %v2598_v59, %v2495_v8 }
 0x167   :  { %v2814_v3 = vpop.f32.mrf.mxu2  ;;  %v2719_v42 = vadd.f32 %v2710_v60, %v2607_v46 }
 0x169   :  { %v2948_v0 = vpop.f32.mrf.mxu3  ;;  %v2712_v40 = vpop.f32.mrf.mxu1  ;;  %v2823_v55 = vadd.f32 %v2814_v3, %v2719_v42 }
 0x16b   :  { %v2826_v22 = vadd.f32 %v7056_v18, %v2823_v55 }
 0x16c   :  { %v2600_v12 = vpop.f32.mrf.mxu0 }
 0x16d   :  { %v2608_v25 = vadd.f32 %v2600_v12, %v2496_v63  ;;  %v2829_v1 = vmax.f32 %v2826_v22, 0.0 }
 0x16f   :  { %v2720_v35 = vadd.f32 %v2712_v40, %v2608_v25  ;;  %v2816_v52 = vpop.f32.mrf.mxu2 }
 0x171   :  { %v2824_v10 = vadd.f32 %v2816_v52, %v2720_v35  ;;  %v2950_v28 = vpop.f32.mrf.mxu3  ;;  %v2715_v48 = vpop.f32.mrf.mxu1 }
 0x173   :  { %v2827_v39 = vadd.f32 %v7056_v18, %v2824_v10 }
 0x174   :  { %v2603_v23 = vpop.f32.mrf.mxu0 }
 0x175   :  { %v2609_v14 = vadd.f32 %v2603_v23, %v2497_v11  ;;  %v2830_v7 = vmax.f32 %v2827_v39, 0.0 }
 0x177   :  { %v5929_v21 = vpack.c.bf16 %v2830_v7, %v2829_v1  ;;  %v2721_v13 = vadd.f32 %v2715_v48, %v2609_v14  ;;  %v2819_v15 = vpop.f32.mrf.mxu2 }
 0x179   :  { %5962 = vst [vmem:[%s7415_s3 + $0x18] sm:$0xff] %v5929_v21   ;;  %v2825_v53 = vadd.f32 %v2819_v15, %v2721_v13  ;;  %v2953_v4 = vpop.f32.mrf.mxu3  ;;  %v2717_v36 = vpop.f32.mrf.mxu1 }
 0x17b   :  { %v2828_v51 = vadd.f32 %v7056_v18, %v2825_v53 }
 0x17c   :  { %v2605_v24 = vpop.f32.mrf.mxu0 }
 0x17d   :  { %v2831_v32 = vmax.f32 %v2828_v51, 0.0 }
 0x17f   :  { %v2834_v30 = vpack.c.bf16 %v2831_v32, %v2831_v32  ;;  %v2821_v49 = vpop.f32.mrf.mxu2 }
 0x181   :  { %v2839_v33 = vsel %vm7159_vm5, %v2834_v30, %v5135_v29  ;;  %v2955_v34 = vpop.f32.mrf.mxu3  ;;  %v3123_v43 = vpop.f32.mrf.mxu1 }
 0x182   :  { %5136 = vst [vmem:[%s7415_s3 + $0x20] sm:$0x3] %v2839_v33 }
 0x184   :  { %v3024_v41 = vpop.f32.mrf.mxu0 }
 0x185   :  { %v3025_v47 = vadd.f32 %v3024_v41, %v2948_v0  ;;  %v5591_v41 = vld [vmem:[%s7415_s3 + $0x2c] sm:$0x3] }
 0x187   :  { %v3222_v61 = vpop.f32.mrf.mxu2  ;;  %v3132_v57 = vadd.f32 %v3123_v43, %v3025_v47 }
 0x189   :  { %v3321_v44 = vpop.f32.mrf.mxu3  ;;  %v3125_v26 = vpop.f32.mrf.mxu1  ;;  %v3231_v6 = vadd.f32 %v3222_v61, %v3132_v57 }
 0x18b   :  { %v3330_v60 = vadd.f32 %v3321_v44, %v3231_v6 }
 0x18c   :  { %v3026_v16 = vpop.f32.mrf.mxu0 }
 0x18d   :  { %v3027_v58 = vadd.f32 %v3026_v16, %v2950_v28 }
 0x18f   :  { %v3224_v38 = vpop.f32.mrf.mxu2  ;;  %v3133_v31 = vadd.f32 %v3125_v26, %v3027_v58 }
 0x191   :  { %v3323_v19 = vpop.f32.mrf.mxu3  ;;  %v3128_v5 = vpop.f32.mrf.mxu1  ;;  %v3232_v46 = vadd.f32 %v3224_v38, %v3133_v31 }
 0x193   :  { %v3331_v40 = vadd.f32 %v3323_v19, %v3232_v46 }
 0x194   :  { %v3029_v50 = vpop.f32.mrf.mxu0 }
 0x195   :  { %v3030_v3 = vadd.f32 %v3029_v50, %v2953_v4 }
 0x197   :  { %v3227_v9 = vpop.f32.mrf.mxu2  ;;  %v3134_v37 = vadd.f32 %v3128_v5, %v3030_v3 }
 0x199   :  { %v3326_v17 = vpop.f32.mrf.mxu3  ;;  %v3130_v56 = vpop.f32.mrf.mxu1  ;;  %v3233_v52 = vadd.f32 %v3227_v9, %v3134_v37 }
 0x19b   :  { %v3332_v23 = vadd.f32 %v3326_v17, %v3233_v52 }
 0x19c   :  { %v3031_v54 = vpop.f32.mrf.mxu0 }
 0x19f   :  { %v3229_v59 = vpop.f32.mrf.mxu2 }
 0x1a1   :  { %v3328_v20 = vpop.f32.mrf.mxu3  ;;  %v3535_v8 = vpop.f32.mrf.mxu1 }
 0x1a4   :  { %v3423_v27 = vpop.f32.mrf.mxu0 }
 0x1a5   :  { %v3432_v62 = vadd.f32 %v3423_v27, %v3330_v60 }
 0x1a7   :  { %v3544_v63 = vadd.f32 %v3535_v8, %v3432_v62  ;;  %v3647_v12 = vpop.f32.mrf.mxu2 }
 0x1a9   :  { %v3656_v0 = vadd.f32 %v3647_v12, %v3544_v63  ;;  %v3751_v45 = vpop.f32.mrf.mxu3  ;;  %v3537_v25 = vpop.f32.mrf.mxu1 }
 0x1ab   :  { %v3760_v55 = vadd.f32 %v3751_v45, %v3656_v0 }
 0x1ac   :  { %v3425_v42 = vpop.f32.mrf.mxu0 }
 0x1ad   :  { %v3433_v35 = vadd.f32 %v3425_v42, %v3331_v40  ;;  %v3763_v11 = vadd.f32 %v7056_v18, %v3760_v55 }
 0x1af   :  { %v3766_v22 = vmax.f32 %v3763_v11, 0.0  ;;  %v3545_v10 = vadd.f32 %v3537_v25, %v3433_v35  ;;  %v3649_v28 = vpop.f32.mrf.mxu2 }
 0x1b1   :  { %v3769_v48 = vpack.c.bf16 %v3766_v22, %v3766_v22  ;;  %v3657_v39 = vadd.f32 %v3649_v28, %v3545_v10  ;;  %v3753_v14 = vpop.f32.mrf.mxu3  ;;  %v3540_v7 = vpop.f32.mrf.mxu1 }
 0x1b3   :  { %5589 = vst [vmem:[%s7415_s3 + $0x24] sm:$0xf] %v3769_v48  ;;  %v3761_v21 = vadd.f32 %v3753_v14, %v3657_v39 }
 0x1b4   :  { %v3428_v1 = vpop.f32.mrf.mxu0 }
 0x1b5   :  { %v3434_v13 = vadd.f32 %v3428_v1, %v3332_v23  ;;  %v3764_v15 = vadd.f32 %v7056_v18, %v3761_v21 }
 0x1b7   :  { %v3767_v53 = vmax.f32 %v3764_v15, 0.0  ;;  %v3546_v4 = vadd.f32 %v3540_v7, %v3434_v13  ;;  %v3652_v24 = vpop.f32.mrf.mxu2 }
 0x1b9   :  { %v3770_v36 = vpack.c.bf16 %v3767_v53, %v3767_v53  ;;  %v3658_v51 = vadd.f32 %v3652_v24, %v3546_v4  ;;  %v3756_v32 = vpop.f32.mrf.mxu3  ;;  %v3542_v30 = vpop.f32.mrf.mxu1 }
 0x1bb   :  { %5590 = vst [vmem:[%s7415_s3 + $0x28] sm:$0xf] %v3770_v36  ;;  %v3762_v49 = vadd.f32 %v3756_v32, %v3658_v51 }
 0x1bc   :  { %v3430_v29 = vpop.f32.mrf.mxu0 }
 0x1bd   :  { %v3765_v33 = vadd.f32 %v7056_v18, %v3762_v49 }
 0x1bf   :  { %v3768_v34 = vmax.f32 %v3765_v33, 0.0  ;;  %v3654_v43 = vpop.f32.mrf.mxu2 }
 0x1c1   :  { %v3771_v61 = vpack.c.bf16 %v3768_v34, %v3768_v34  ;;  %v3758_v44 = vpop.f32.mrf.mxu3 }
 0x1c3   :  { %v3776_v16 = vsel %vm7159_vm5, %v3771_v61, %v5591_v41 }
 0x1c4   :  { %5592 = vst [vmem:[%s7415_s3 + $0x2c] sm:$0x3] %v3776_v16 }

</bundles_post_ra>
